<compile_context>
chip_gen: v7x
topology: tpu7x:2x2x1
jax: 0.10.0
libtpu: 0.0.40
codegen_flags: <defaults>
</compile_context>

<pallas_src>
import math

import jax
import jax.numpy as jnp
from jax.experimental import pallas as pl
from jax.experimental.pallas import tpu as pltpu  # noqa: F401 (not needed at this size)

B   = 2               # batch
L   = 16              # max_code_length
HID = 32              # hidden
NH  = 4               # attention heads
DK  = HID // NH       # head dim
P   = 8               # max_path_num
FF  = 64              # feed-forward hidden (4 * hidden)
BH  = B * NH          # merged (batch, head) axis
LN_EPS = 1e-6
VEC_W = 3 * HID       # width of the packed small-vector slab
INV_SQRT_DK = 1.0 / math.sqrt(DK)


def _layer_norm(x, gamma, beta):
    # BERT-pytorch LayerNorm: gamma * (x - mean) / (std + eps) + beta, unbiased std.
    # Exact divide (not the approx EUP reciprocal) for parity with the reference.
    mean = jnp.mean(x, axis=-1, keepdims=True)
    diff = x - mean
    var = jnp.sum(diff * diff, axis=-1, keepdims=True) / (HID - 1)
    std = jnp.sqrt(var)
    return gamma * diff / (std + LN_EPS) + beta


def _gelu(x):
    # tanh-approximation GELU (BERT-pytorch GELU()).
    return 0.5 * x * (1.0 + jnp.tanh(
        math.sqrt(2.0 / math.pi) * (x + 0.044715 * x * x * x)))


def transformer_block_kernel(
    x_ref, pm_ref, bias_ref, rk_ref, rv_ref,
    wqkv_ref, wo_ref, w1_ref, w2_ref, vec_ref,
    out_ref,
):
    x = x_ref[...]                                    # (B*L, HID) f32

    # unpack the small-vector slab (static slices, zero runtime cost)
    b_qkv = vec_ref[0:1, 0:3 * HID]                   # (1, 3*HID)
    b1    = vec_ref[1:2, 0:FF]
    bo    = vec_ref[2:3, 0:HID]
    b2    = vec_ref[2:3, HID:2 * HID]
    ln1_g = vec_ref[3:4, 0:HID]
    ln1_b = vec_ref[3:4, HID:2 * HID]
    ln2_g = vec_ref[4:5, 0:HID]
    ln2_b = vec_ref[4:5, HID:2 * HID]

    # ---------------- attention sublayer (pre-norm residual) ----------------
    xn = _layer_norm(x, ln1_g, ln1_b)                 # (B*L, HID) f32

    # fused Q|K|V projection: ONE 2-D MXU matmul (bf16 in, f32 accumulate)
    qkv = jnp.dot(xn.astype(jnp.bfloat16), wqkv_ref[...],
                  preferred_element_type=jnp.float32) + b_qkv      # (B*L, 3*HID)

    # static per-(batch, head) slicing -> (BH, L, DK); cheap tile copies only
    def split_bh(col0):
        tiles = [qkv[b * L:(b + 1) * L, col0 + h * DK: col0 + (h + 1) * DK][None]
                 for b in range(B) for h in range(NH)]
        return jnp.concatenate(tiles, axis=0)

    q = split_bh(0).astype(jnp.bfloat16)
    k = split_bh(HID).astype(jnp.bfloat16)
    v = split_bh(2 * HID).astype(jnp.bfloat16)

    # path map broadcast across heads in-kernel (int32, major-axis broadcast only)
    pm_bh = jnp.broadcast_to(pm_ref[...][:, None], (B, NH, L, L)).reshape(BH, L, L)
    path_masks = [pm_bh == p for p in range(P)]       # reused by gather + scatter-add

    # content scores + per-path scores, all (batch, head) pairs batched
    scores = jnp.einsum('bld,bmd->blm', q, k,
                        preferred_element_type=jnp.float32)        # (BH, L, L)
    path_scores = jnp.einsum('bld,bpd->blp', q, rk_ref[...],
                             preferred_element_type=jnp.float32)   # (BH, L, P)

    # gather: rel[b,i,j] = path_scores[b,i, path_map[b,i,j]]  (P-way select loop)
    rel = jnp.zeros((BH, L, L), jnp.float32)
    for p in range(P):
        rel = rel + jnp.where(path_masks[p], path_scores[:, :, p:p + 1], 0.0)

    # bias_ref already holds ap/sqrt(dk) + (-1e9 where masked), folded in wrapper
    scores = (scores + rel) * INV_SQRT_DK + bias_ref[...]

    # max-stabilized softmax; normalization on the EUP (denominator >= 1, safe)
    scores = scores - jnp.max(scores, axis=-1, keepdims=True)
    e = jnp.exp(scores)
    p_attn = e * pl.reciprocal(jnp.sum(e, axis=-1, keepdims=True), approx=True)
    # attention dropout: identity in eval mode

    # scatter-add of attention probs onto paths, fused with the r_v contraction:
    #   out_rel[b,i,:] += (sum_j [pm==p] * p_attn[b,i,j]) * r_v[b,p,:]
    out_rel = jnp.zeros((BH, L, DK), jnp.float32)
    for p in range(P):
        s_p = jnp.sum(jnp.where(path_masks[p], p_attn, 0.0), axis=-1, keepdims=True)
        out_rel = out_rel + s_p * rv_ref[:, p:p + 1, :]

    out_h = jnp.einsum('blm,bmd->bld', p_attn.astype(jnp.bfloat16), v,
                       preferred_element_type=jnp.float32) + out_rel  # (BH, L, DK)

    # merge heads back to (B*L, NH*DK) and do the output projection as ONE matmul
    rows = [jnp.concatenate([out_h[b * NH + h] for h in range(NH)], axis=-1)
            for b in range(B)]                                     # B x (L, HID)
    concat_heads = jnp.concatenate(rows, axis=0)                   # (B*L, HID)
    attn_out = jnp.dot(concat_heads.astype(jnp.bfloat16), wo_ref[...],
                       preferred_element_type=jnp.float32) + bo

    x = x + attn_out                    # sublayer dropout: identity in eval mode

    # ---------------- feed-forward sublayer (pre-norm residual) -------------
    xn2 = _layer_norm(x, ln2_g, ln2_b)
    h1 = _gelu(jnp.dot(xn2.astype(jnp.bfloat16), w1_ref[...],
                       preferred_element_type=jnp.float32) + b1)
    ffn = jnp.dot(h1.astype(jnp.bfloat16), w2_ref[...],
                  preferred_element_type=jnp.float32) + b2
    # final block dropout: identity in eval mode
    # TODO(synk): a fully lane-dense (8,128) output slab would avoid masked
    # vst.msk stores; skipped at this tiny size (relayout cost ~ cancels gain).
    out_ref[...] = x + ffn


def init_params(key):
    ks = jax.random.split(key, 6)
    std = 0.02
    return dict(
        wq=jax.random.normal(ks[0], (HID, HID), jnp.float32) * std,
        bq=jnp.zeros((HID,), jnp.float32),
        wk=jax.random.normal(ks[1], (HID, HID), jnp.float32) * std,
        bk=jnp.zeros((HID,), jnp.float32),
        wv=jax.random.normal(ks[2], (HID, HID), jnp.float32) * std,
        bv=jnp.zeros((HID,), jnp.float32),
        wo=jax.random.normal(ks[3], (HID, HID), jnp.float32) * std,
        bo=jnp.zeros((HID,), jnp.float32),
        ln1_g=jnp.ones((HID,), jnp.float32), ln1_b=jnp.zeros((HID,), jnp.float32),
        ln2_g=jnp.ones((HID,), jnp.float32), ln2_b=jnp.zeros((HID,), jnp.float32),
        w1=jax.random.normal(ks[4], (HID, FF), jnp.float32) * std,
        b1=jnp.zeros((FF,), jnp.float32),
        w2=jax.random.normal(ks[5], (FF, HID), jnp.float32) * std,
        b2=jnp.zeros((HID,), jnp.float32),
    )


def _pack_params(prm):
    # fused Q|K|V weight (HID, 3*HID) and matching bias; weights in bf16 (MXU-native)
    w_qkv = jnp.concatenate([prm['wq'], prm['wk'], prm['wv']], axis=1).astype(jnp.bfloat16)
    b_qkv = jnp.concatenate([prm['bq'], prm['bk'], prm['bv']])            # (3*HID,)

    def row(*vs):
        r = jnp.concatenate([v.reshape(1, -1) for v in vs], axis=1)
        return jnp.pad(r, ((0, 0), (0, VEC_W - r.shape[1])))

    vecs = jnp.concatenate([row(b_qkv),
                            row(prm['b1']),
                            row(prm['bo'], prm['b2']),
                            row(prm['ln1_g'], prm['ln1_b']),
                            row(prm['ln2_g'], prm['ln2_b'])],
                           axis=0).astype(jnp.float32)                    # (5, VEC_W)

    return (w_qkv,
            prm['wo'].astype(jnp.bfloat16),
            prm['w1'].astype(jnp.bfloat16),
            prm['w2'].astype(jnp.bfloat16),
            vecs)


@jax.jit
def transformer_block(content, mask, r_k, r_v, path_map, ap, params):
    # Wrapper-side layout plumbing (free XLA ops): fold batch into sublanes for
    # the dense math, merge (batch, head) for the relation tensors, and fold
    # the padding mask into one pre-scaled additive bias (post-softmax
    # equivalent to masked_fill(-1e9)).
    x2d  = content.reshape(B * L, HID)
    mask_bias = jnp.where(mask == 0, -1e9, 0.0).astype(jnp.float32)        # (B,1,L,L)
    bias = (ap * INV_SQRT_DK + mask_bias).reshape(BH, L, L)                # (BH,L,L)
    pm   = path_map.astype(jnp.int32)                                      # (B,L,L)
    rk   = r_k.reshape(BH, P, DK).astype(jnp.bfloat16)                     # MXU operand
    rv   = r_v.reshape(BH, P, DK).astype(jnp.float32)                      # VPU operand
    w_qkv, wo, w1, w2, vecs = _pack_params(params)

    # Single gridless invocation: whole problem (tens of KiB) fits in VMEM, so
    # per-grid-step overhead would dominate any split at this size.
    out2d = pl.pallas_call(
        transformer_block_kernel,
        out_shape=jax.ShapeDtypeStruct((B * L, HID), jnp.float32),
    )(x2d, pm, bias, rk, rv, w_qkv, wo, w1, w2, vecs)
    return out2d.reshape(B, L, HID)


if __name__ == "__main__":
    key = jax.random.PRNGKey(0)
    k_c, k_rk, k_rv, k_pm, k_ap, k_p = jax.random.split(key, 6)

    content  = jax.random.normal(k_c, (B, L, HID), jnp.float32)
    r_k      = jax.random.normal(k_rk, (B, NH, P, DK), jnp.float32)
    r_v      = jax.random.normal(k_rv, (B, NH, P, DK), jnp.float32)
    path_map = jax.random.randint(k_pm, (B, L, L), 0, P, jnp.int32)
    ap       = jax.random.normal(k_ap, (B, NH, L, L), jnp.float32) * 0.1

    # padding mask: batch 0 attends to all 16 keys, batch 1 only to the first 12
    valid = jnp.array([L, 12])
    key_pos = jnp.arange(L)[None, None, None, :]                  # (1,1,1,L)
    mask = (key_pos < valid[:, None, None, None]).astype(jnp.int32)
    mask = jnp.broadcast_to(mask, (B, 1, L, L)).astype(jnp.int32)

    params = init_params(k_p)

    out = transformer_block(content, mask, r_k, r_v, path_map, ap, params)
    jax.block_until_ready(out)
    assert out.shape == (B, L, HID)
    print("KERNEL_OK")
</pallas_src>

<mosaic_0001>
module attributes {stable_mosaic.version = 11 : i64} {
  func.func @transformer_block_kernel(%arg0: memref<32x32xf32, #tpu.memory_space<vmem>>, %arg1: memref<2x16x16xi32, #tpu.memory_space<vmem>>, %arg2: memref<8x16x16xf32, #tpu.memory_space<vmem>>, %arg3: memref<8x8x8xbf16, #tpu.memory_space<vmem>>, %arg4: memref<8x8x8xf32, #tpu.memory_space<vmem>>, %arg5: memref<32x96xbf16, #tpu.memory_space<vmem>>, %arg6: memref<32x32xbf16, #tpu.memory_space<vmem>>, %arg7: memref<32x64xbf16, #tpu.memory_space<vmem>>, %arg8: memref<64x32xbf16, #tpu.memory_space<vmem>>, %arg9: memref<5x96xf32, #tpu.memory_space<vmem>>, %arg10: memref<32x32xf32, #tpu.memory_space<vmem>>) attributes {dimension_semantics = [], scalar_prefetch = 0 : i64, scratch_operands = 0 : i64, tpu.core_type = #tpu.core_type<tc>} {
    %c0 = arith.constant 0 : index
    %c0_0 = arith.constant 0 : index
    %0 = vector.load %arg0[%c0, %c0_0] : memref<32x32xf32, #tpu.memory_space<vmem>>, vector<32x32xf32>
    %c0_1 = arith.constant 0 : index
    %c0_2 = arith.constant 0 : index
    %1 = vector.load %arg9[%c0_1, %c0_2] : memref<5x96xf32, #tpu.memory_space<vmem>>, vector<1x96xf32>
    %c1 = arith.constant 1 : index
    %c0_3 = arith.constant 0 : index
    %2 = vector.load %arg9[%c1, %c0_3] : memref<5x96xf32, #tpu.memory_space<vmem>>, vector<1x64xf32>
    %c2 = arith.constant 2 : index
    %c0_4 = arith.constant 0 : index
    %3 = vector.load %arg9[%c2, %c0_4] : memref<5x96xf32, #tpu.memory_space<vmem>>, vector<1x32xf32>
    %c2_5 = arith.constant 2 : index
    %c32 = arith.constant 32 : index
    %4 = vector.load %arg9[%c2_5, %c32] : memref<5x96xf32, #tpu.memory_space<vmem>>, vector<1x32xf32>
    %c3 = arith.constant 3 : index
    %c0_6 = arith.constant 0 : index
    %5 = vector.load %arg9[%c3, %c0_6] : memref<5x96xf32, #tpu.memory_space<vmem>>, vector<1x32xf32>
    %c3_7 = arith.constant 3 : index
    %c32_8 = arith.constant 32 : index
    %6 = vector.load %arg9[%c3_7, %c32_8] : memref<5x96xf32, #tpu.memory_space<vmem>>, vector<1x32xf32>
    %c4 = arith.constant 4 : index
    %c0_9 = arith.constant 0 : index
    %7 = vector.load %arg9[%c4, %c0_9] : memref<5x96xf32, #tpu.memory_space<vmem>>, vector<1x32xf32>
    %c4_10 = arith.constant 4 : index
    %c32_11 = arith.constant 32 : index
    %8 = vector.load %arg9[%c4_10, %c32_11] : memref<5x96xf32, #tpu.memory_space<vmem>>, vector<1x32xf32>
    %cst = arith.constant dense<0.000000e+00> : vector<32xf32>
    %9 = vector.multi_reduction <add>, %0, %cst [1] : vector<32x32xf32> to vector<32xf32>
    %10 = vector.shape_cast %9 : vector<32xf32> to vector<32x1xf32>
    %cst_12 = arith.constant 3.200000e+01 : f32
    %11 = vector.broadcast %cst_12 : f32 to vector<32x1xf32>
    %12 = arith.divf %10, %11 : vector<32x1xf32>
    %13 = vector.broadcast %12 : vector<32x1xf32> to vector<32x32xf32>
    %14 = arith.subf %0, %13 : vector<32x32xf32>
    %15 = arith.mulf %14, %14 : vector<32x32xf32>
    %cst_13 = arith.constant dense<0.000000e+00> : vector<32xf32>
    %16 = vector.multi_reduction <add>, %15, %cst_13 [1] : vector<32x32xf32> to vector<32xf32>
    %17 = vector.shape_cast %16 : vector<32xf32> to vector<32x1xf32>
    %cst_14 = arith.constant 3.100000e+01 : f32
    %18 = vector.broadcast %cst_14 : f32 to vector<32x1xf32>
    %19 = arith.divf %17, %18 : vector<32x1xf32>
    %20 = math.sqrt %19 : vector<32x1xf32>
    %21 = vector.broadcast %5 : vector<1x32xf32> to vector<32x32xf32>
    %22 = arith.mulf %21, %14 : vector<32x32xf32>
    %cst_15 = arith.constant 9.99999997E-7 : f32
    %23 = vector.broadcast %cst_15 : f32 to vector<32x1xf32>
    %24 = arith.addf %20, %23 : vector<32x1xf32>
    %25 = vector.broadcast %24 : vector<32x1xf32> to vector<32x32xf32>
    %26 = arith.divf %22, %25 : vector<32x32xf32>
    %27 = vector.broadcast %6 : vector<1x32xf32> to vector<32x32xf32>
    %28 = arith.addf %26, %27 : vector<32x32xf32>
    %29 = arith.truncf %28 : vector<32x32xf32> to vector<32x32xbf16>
    %c0_16 = arith.constant 0 : index
    %c0_17 = arith.constant 0 : index
    %30 = vector.load %arg5[%c0_16, %c0_17] : memref<32x96xbf16, #tpu.memory_space<vmem>>, vector<32x96xbf16>
    %cst_18 = arith.constant dense<0.000000e+00> : vector<32x96xf32>
    %31 = tpu.matmul %29, %30, %cst_18 {dimension_numbers = #tpu.dot_dimension_numbers<[1], [0], [0], [1], [0, 0, 1, 1], [], []>} : vector<32x32xbf16>, vector<32x96xbf16>, vector<32x96xf32> -> vector<32x96xf32>
    %32 = vector.broadcast %1 : vector<1x96xf32> to vector<32x96xf32>
    %33 = arith.addf %31, %32 : vector<32x96xf32>
    %34 = vector.extract_strided_slice %33 {offsets = [0, 0], sizes = [16, 8], strides = [1, 1]} : vector<32x96xf32> to vector<16x8xf32>
    %35 = vector.shape_cast %34 : vector<16x8xf32> to vector<1x16x8xf32>
    %36 = vector.extract_strided_slice %33 {offsets = [0, 8], sizes = [16, 8], strides = [1, 1]} : vector<32x96xf32> to vector<16x8xf32>
    %37 = vector.shape_cast %36 : vector<16x8xf32> to vector<1x16x8xf32>
    %38 = vector.extract_strided_slice %33 {offsets = [0, 16], sizes = [16, 8], strides = [1, 1]} : vector<32x96xf32> to vector<16x8xf32>
    %39 = vector.shape_cast %38 : vector<16x8xf32> to vector<1x16x8xf32>
    %40 = vector.extract_strided_slice %33 {offsets = [0, 24], sizes = [16, 8], strides = [1, 1]} : vector<32x96xf32> to vector<16x8xf32>
    %41 = vector.shape_cast %40 : vector<16x8xf32> to vector<1x16x8xf32>
    %42 = vector.extract_strided_slice %33 {offsets = [16, 0], sizes = [16, 8], strides = [1, 1]} : vector<32x96xf32> to vector<16x8xf32>
    %43 = vector.shape_cast %42 : vector<16x8xf32> to vector<1x16x8xf32>
    %44 = vector.extract_strided_slice %33 {offsets = [16, 8], sizes = [16, 8], strides = [1, 1]} : vector<32x96xf32> to vector<16x8xf32>
    %45 = vector.shape_cast %44 : vector<16x8xf32> to vector<1x16x8xf32>
    %46 = vector.extract_strided_slice %33 {offsets = [16, 16], sizes = [16, 8], strides = [1, 1]} : vector<32x96xf32> to vector<16x8xf32>
    %47 = vector.shape_cast %46 : vector<16x8xf32> to vector<1x16x8xf32>
    %48 = vector.extract_strided_slice %33 {offsets = [16, 24], sizes = [16, 8], strides = [1, 1]} : vector<32x96xf32> to vector<16x8xf32>
    %49 = vector.shape_cast %48 : vector<16x8xf32> to vector<1x16x8xf32>
    %50 = tpu.concatenate %35, %37, %39, %41, %43, %45, %47, %49 in 0 : vector<1x16x8xf32>, vector<1x16x8xf32>, vector<1x16x8xf32>, vector<1x16x8xf32>, vector<1x16x8xf32>, vector<1x16x8xf32>, vector<1x16x8xf32>, vector<1x16x8xf32> -> vector<8x16x8xf32>
    %51 = arith.truncf %50 : vector<8x16x8xf32> to vector<8x16x8xbf16>
    %52 = vector.extract_strided_slice %33 {offsets = [0, 32], sizes = [16, 8], strides = [1, 1]} : vector<32x96xf32> to vector<16x8xf32>
    %53 = vector.shape_cast %52 : vector<16x8xf32> to vector<1x16x8xf32>
    %54 = vector.extract_strided_slice %33 {offsets = [0, 40], sizes = [16, 8], strides = [1, 1]} : vector<32x96xf32> to vector<16x8xf32>
    %55 = vector.shape_cast %54 : vector<16x8xf32> to vector<1x16x8xf32>
    %56 = vector.extract_strided_slice %33 {offsets = [0, 48], sizes = [16, 8], strides = [1, 1]} : vector<32x96xf32> to vector<16x8xf32>
    %57 = vector.shape_cast %56 : vector<16x8xf32> to vector<1x16x8xf32>
    %58 = vector.extract_strided_slice %33 {offsets = [0, 56], sizes = [16, 8], strides = [1, 1]} : vector<32x96xf32> to vector<16x8xf32>
    %59 = vector.shape_cast %58 : vector<16x8xf32> to vector<1x16x8xf32>
    %60 = vector.extract_strided_slice %33 {offsets = [16, 32], sizes = [16, 8], strides = [1, 1]} : vector<32x96xf32> to vector<16x8xf32>
    %61 = vector.shape_cast %60 : vector<16x8xf32> to vector<1x16x8xf32>
    %62 = vector.extract_strided_slice %33 {offsets = [16, 40], sizes = [16, 8], strides = [1, 1]} : vector<32x96xf32> to vector<16x8xf32>
    %63 = vector.shape_cast %62 : vector<16x8xf32> to vector<1x16x8xf32>
    %64 = vector.extract_strided_slice %33 {offsets = [16, 48], sizes = [16, 8], strides = [1, 1]} : vector<32x96xf32> to vector<16x8xf32>
    %65 = vector.shape_cast %64 : vector<16x8xf32> to vector<1x16x8xf32>
    %66 = vector.extract_strided_slice %33 {offsets = [16, 56], sizes = [16, 8], strides = [1, 1]} : vector<32x96xf32> to vector<16x8xf32>
    %67 = vector.shape_cast %66 : vector<16x8xf32> to vector<1x16x8xf32>
    %68 = tpu.concatenate %53, %55, %57, %59, %61, %63, %65, %67 in 0 : vector<1x16x8xf32>, vector<1x16x8xf32>, vector<1x16x8xf32>, vector<1x16x8xf32>, vector<1x16x8xf32>, vector<1x16x8xf32>, vector<1x16x8xf32>, vector<1x16x8xf32> -> vector<8x16x8xf32>
    %69 = arith.truncf %68 : vector<8x16x8xf32> to vector<8x16x8xbf16>
    %70 = vector.extract_strided_slice %33 {offsets = [0, 64], sizes = [16, 8], strides = [1, 1]} : vector<32x96xf32> to vector<16x8xf32>
    %71 = vector.shape_cast %70 : vector<16x8xf32> to vector<1x16x8xf32>
    %72 = vector.extract_strided_slice %33 {offsets = [0, 72], sizes = [16, 8], strides = [1, 1]} : vector<32x96xf32> to vector<16x8xf32>
    %73 = vector.shape_cast %72 : vector<16x8xf32> to vector<1x16x8xf32>
    %74 = vector.extract_strided_slice %33 {offsets = [0, 80], sizes = [16, 8], strides = [1, 1]} : vector<32x96xf32> to vector<16x8xf32>
    %75 = vector.shape_cast %74 : vector<16x8xf32> to vector<1x16x8xf32>
    %76 = vector.extract_strided_slice %33 {offsets = [0, 88], sizes = [16, 8], strides = [1, 1]} : vector<32x96xf32> to vector<16x8xf32>
    %77 = vector.shape_cast %76 : vector<16x8xf32> to vector<1x16x8xf32>
    %78 = vector.extract_strided_slice %33 {offsets = [16, 64], sizes = [16, 8], strides = [1, 1]} : vector<32x96xf32> to vector<16x8xf32>
    %79 = vector.shape_cast %78 : vector<16x8xf32> to vector<1x16x8xf32>
    %80 = vector.extract_strided_slice %33 {offsets = [16, 72], sizes = [16, 8], strides = [1, 1]} : vector<32x96xf32> to vector<16x8xf32>
    %81 = vector.shape_cast %80 : vector<16x8xf32> to vector<1x16x8xf32>
    %82 = vector.extract_strided_slice %33 {offsets = [16, 80], sizes = [16, 8], strides = [1, 1]} : vector<32x96xf32> to vector<16x8xf32>
    %83 = vector.shape_cast %82 : vector<16x8xf32> to vector<1x16x8xf32>
    %84 = vector.extract_strided_slice %33 {offsets = [16, 88], sizes = [16, 8], strides = [1, 1]} : vector<32x96xf32> to vector<16x8xf32>
    %85 = vector.shape_cast %84 : vector<16x8xf32> to vector<1x16x8xf32>
    %86 = tpu.concatenate %71, %73, %75, %77, %79, %81, %83, %85 in 0 : vector<1x16x8xf32>, vector<1x16x8xf32>, vector<1x16x8xf32>, vector<1x16x8xf32>, vector<1x16x8xf32>, vector<1x16x8xf32>, vector<1x16x8xf32>, vector<1x16x8xf32> -> vector<8x16x8xf32>
    %87 = arith.truncf %86 : vector<8x16x8xf32> to vector<8x16x8xbf16>
    %c0_19 = arith.constant 0 : index
    %c0_20 = arith.constant 0 : index
    %c0_21 = arith.constant 0 : index
    %88 = vector.load %arg1[%c0_19, %c0_20, %c0_21] : memref<2x16x16xi32, #tpu.memory_space<vmem>>, vector<2x16x16xi32>
    %89 = vector.shape_cast %88 : vector<2x16x16xi32> to vector<2x1x16x16xi32>
    %90 = vector.shape_cast %89 : vector<2x1x16x16xi32> to vector<2x1x16x16xi32>
    %91 = vector.broadcast %90 : vector<2x1x16x16xi32> to vector<2x4x16x16xi32>
    %92 = vector.shape_cast %91 : vector<2x4x16x16xi32> to vector<8x16x16xi32>
    %c0_i32 = arith.constant 0 : i32
    %93 = vector.broadcast %c0_i32 : i32 to vector<8x16x16xi32>
    %94 = arith.cmpi eq, %92, %93 : vector<8x16x16xi32>
    %c1_i32 = arith.constant 1 : i32
    %95 = vector.broadcast %c1_i32 : i32 to vector<8x16x16xi32>
    %96 = arith.cmpi eq, %92, %95 : vector<8x16x16xi32>
    %c2_i32 = arith.constant 2 : i32
    %97 = vector.broadcast %c2_i32 : i32 to vector<8x16x16xi32>
    %98 = arith.cmpi eq, %92, %97 : vector<8x16x16xi32>
    %c3_i32 = arith.constant 3 : i32
    %99 = vector.broadcast %c3_i32 : i32 to vector<8x16x16xi32>
    %100 = arith.cmpi eq, %92, %99 : vector<8x16x16xi32>
    %c4_i32 = arith.constant 4 : i32
    %101 = vector.broadcast %c4_i32 : i32 to vector<8x16x16xi32>
    %102 = arith.cmpi eq, %92, %101 : vector<8x16x16xi32>
    %c5_i32 = arith.constant 5 : i32
    %103 = vector.broadcast %c5_i32 : i32 to vector<8x16x16xi32>
    %104 = arith.cmpi eq, %92, %103 : vector<8x16x16xi32>
    %c6_i32 = arith.constant 6 : i32
    %105 = vector.broadcast %c6_i32 : i32 to vector<8x16x16xi32>
    %106 = arith.cmpi eq, %92, %105 : vector<8x16x16xi32>
    %c7_i32 = arith.constant 7 : i32
    %107 = vector.broadcast %c7_i32 : i32 to vector<8x16x16xi32>
    %108 = arith.cmpi eq, %92, %107 : vector<8x16x16xi32>
    "tpu.trace_start"() <{level = 10 : i32, message = "bld,bmd->blm"}> : () -> ()
    %cst_22 = arith.constant dense<0.000000e+00> : vector<8x16x16xf32>
    %109 = tpu.matmul %51, %69, %cst_22 {dimension_numbers = #tpu.dot_dimension_numbers<[2], [2], [1], [1], [0, 0, 0, 1, 1, 1], [0], [0]>} : vector<8x16x8xbf16>, vector<8x16x8xbf16>, vector<8x16x16xf32> -> vector<8x16x16xf32>
    "tpu.trace_stop"() : () -> ()
    %c0_23 = arith.constant 0 : index
    %c0_24 = arith.constant 0 : index
    %c0_25 = arith.constant 0 : index
    %110 = vector.load %arg3[%c0_23, %c0_24, %c0_25] : memref<8x8x8xbf16, #tpu.memory_space<vmem>>, vector<8x8x8xbf16>
    "tpu.trace_start"() <{level = 10 : i32, message = "bld,bpd->blp"}> : () -> ()
    %cst_26 = arith.constant dense<0.000000e+00> : vector<8x16x8xf32>
    %111 = tpu.matmul %51, %110, %cst_26 {dimension_numbers = #tpu.dot_dimension_numbers<[2], [2], [1], [1], [0, 0, 0, 1, 1, 1], [0], [0]>} : vector<8x16x8xbf16>, vector<8x8x8xbf16>, vector<8x16x8xf32> -> vector<8x16x8xf32>
    %cst_27 = arith.constant 0.000000e+00 : f32
    "tpu.trace_stop"() : () -> ()
    %112 = vector.broadcast %cst_27 : f32 to vector<8x16x16xf32>
    %113 = vector.extract_strided_slice %111 {offsets = [0, 0, 0], sizes = [8, 16, 1], strides = [1, 1, 1]} : vector<8x16x8xf32> to vector<8x16x1xf32>
    %cst_28 = arith.constant 0.000000e+00 : f32
    %114 = vector.shape_cast %113 : vector<8x16x1xf32> to vector<8x16x1xf32>
    %115 = vector.broadcast %114 : vector<8x16x1xf32> to vector<8x16x16xf32>
    %116 = vector.broadcast %cst_28 : f32 to vector<8x16x16xf32>
    %117 = arith.select %94, %115, %116 : vector<8x16x16xi1>, vector<8x16x16xf32>
    %118 = arith.addf %112, %117 : vector<8x16x16xf32>
    %119 = vector.extract_strided_slice %111 {offsets = [0, 0, 1], sizes = [8, 16, 1], strides = [1, 1, 1]} : vector<8x16x8xf32> to vector<8x16x1xf32>
    %cst_29 = arith.constant 0.000000e+00 : f32
    %120 = vector.shape_cast %119 : vector<8x16x1xf32> to vector<8x16x1xf32>
    %121 = vector.broadcast %120 : vector<8x16x1xf32> to vector<8x16x16xf32>
    %122 = vector.broadcast %cst_29 : f32 to vector<8x16x16xf32>
    %123 = arith.select %96, %121, %122 : vector<8x16x16xi1>, vector<8x16x16xf32>
    %124 = arith.addf %118, %123 : vector<8x16x16xf32>
    %125 = vector.extract_strided_slice %111 {offsets = [0, 0, 2], sizes = [8, 16, 1], strides = [1, 1, 1]} : vector<8x16x8xf32> to vector<8x16x1xf32>
    %cst_30 = arith.constant 0.000000e+00 : f32
    %126 = vector.shape_cast %125 : vector<8x16x1xf32> to vector<8x16x1xf32>
    %127 = vector.broadcast %126 : vector<8x16x1xf32> to vector<8x16x16xf32>
    %128 = vector.broadcast %cst_30 : f32 to vector<8x16x16xf32>
    %129 = arith.select %98, %127, %128 : vector<8x16x16xi1>, vector<8x16x16xf32>
    %130 = arith.addf %124, %129 : vector<8x16x16xf32>
    %131 = vector.extract_strided_slice %111 {offsets = [0, 0, 3], sizes = [8, 16, 1], strides = [1, 1, 1]} : vector<8x16x8xf32> to vector<8x16x1xf32>
    %cst_31 = arith.constant 0.000000e+00 : f32
    %132 = vector.shape_cast %131 : vector<8x16x1xf32> to vector<8x16x1xf32>
    %133 = vector.broadcast %132 : vector<8x16x1xf32> to vector<8x16x16xf32>
    %134 = vector.broadcast %cst_31 : f32 to vector<8x16x16xf32>
    %135 = arith.select %100, %133, %134 : vector<8x16x16xi1>, vector<8x16x16xf32>
    %136 = arith.addf %130, %135 : vector<8x16x16xf32>
    %137 = vector.extract_strided_slice %111 {offsets = [0, 0, 4], sizes = [8, 16, 1], strides = [1, 1, 1]} : vector<8x16x8xf32> to vector<8x16x1xf32>
    %cst_32 = arith.constant 0.000000e+00 : f32
    %138 = vector.shape_cast %137 : vector<8x16x1xf32> to vector<8x16x1xf32>
    %139 = vector.broadcast %138 : vector<8x16x1xf32> to vector<8x16x16xf32>
    %140 = vector.broadcast %cst_32 : f32 to vector<8x16x16xf32>
    %141 = arith.select %102, %139, %140 : vector<8x16x16xi1>, vector<8x16x16xf32>
    %142 = arith.addf %136, %141 : vector<8x16x16xf32>
    %143 = vector.extract_strided_slice %111 {offsets = [0, 0, 5], sizes = [8, 16, 1], strides = [1, 1, 1]} : vector<8x16x8xf32> to vector<8x16x1xf32>
    %cst_33 = arith.constant 0.000000e+00 : f32
    %144 = vector.shape_cast %143 : vector<8x16x1xf32> to vector<8x16x1xf32>
    %145 = vector.broadcast %144 : vector<8x16x1xf32> to vector<8x16x16xf32>
    %146 = vector.broadcast %cst_33 : f32 to vector<8x16x16xf32>
    %147 = arith.select %104, %145, %146 : vector<8x16x16xi1>, vector<8x16x16xf32>
    %148 = arith.addf %142, %147 : vector<8x16x16xf32>
    %149 = vector.extract_strided_slice %111 {offsets = [0, 0, 6], sizes = [8, 16, 1], strides = [1, 1, 1]} : vector<8x16x8xf32> to vector<8x16x1xf32>
    %cst_34 = arith.constant 0.000000e+00 : f32
    %150 = vector.shape_cast %149 : vector<8x16x1xf32> to vector<8x16x1xf32>
    %151 = vector.broadcast %150 : vector<8x16x1xf32> to vector<8x16x16xf32>
    %152 = vector.broadcast %cst_34 : f32 to vector<8x16x16xf32>
    %153 = arith.select %106, %151, %152 : vector<8x16x16xi1>, vector<8x16x16xf32>
    %154 = arith.addf %148, %153 : vector<8x16x16xf32>
    %155 = vector.extract_strided_slice %111 {offsets = [0, 0, 7], sizes = [8, 16, 1], strides = [1, 1, 1]} : vector<8x16x8xf32> to vector<8x16x1xf32>
    %cst_35 = arith.constant 0.000000e+00 : f32
    %156 = vector.shape_cast %155 : vector<8x16x1xf32> to vector<8x16x1xf32>
    %157 = vector.broadcast %156 : vector<8x16x1xf32> to vector<8x16x16xf32>
    %158 = vector.broadcast %cst_35 : f32 to vector<8x16x16xf32>
    %159 = arith.select %108, %157, %158 : vector<8x16x16xi1>, vector<8x16x16xf32>
    %160 = arith.addf %154, %159 : vector<8x16x16xf32>
    %161 = arith.addf %109, %160 : vector<8x16x16xf32>
    %cst_36 = arith.constant 0.353553385 : f32
    %162 = vector.broadcast %cst_36 : f32 to vector<8x16x16xf32>
    %163 = arith.mulf %161, %162 : vector<8x16x16xf32>
    %c0_37 = arith.constant 0 : index
    %c0_38 = arith.constant 0 : index
    %c0_39 = arith.constant 0 : index
    %164 = vector.load %arg2[%c0_37, %c0_38, %c0_39] : memref<8x16x16xf32, #tpu.memory_space<vmem>>, vector<8x16x16xf32>
    %165 = arith.addf %163, %164 : vector<8x16x16xf32>
    %cst_40 = arith.constant dense<0xFF800000> : vector<8x16xf32>
    %166 = vector.multi_reduction <maximumf>, %165, %cst_40 [2] : vector<8x16x16xf32> to vector<8x16xf32>
    %167 = vector.shape_cast %166 : vector<8x16xf32> to vector<8x16x1xf32>
    %168 = vector.broadcast %167 : vector<8x16x1xf32> to vector<8x16x16xf32>
    %169 = arith.subf %165, %168 : vector<8x16x16xf32>
    %170 = math.exp %169 : vector<8x16x16xf32>
    %cst_41 = arith.constant dense<0.000000e+00> : vector<8x16xf32>
    %171 = vector.multi_reduction <add>, %170, %cst_41 [2] : vector<8x16x16xf32> to vector<8x16xf32>
    %172 = vector.shape_cast %171 : vector<8x16xf32> to vector<8x16x1xf32>
    %173 = tpu.reciprocal %172 {approx = true} : vector<8x16x1xf32> -> vector<8x16x1xf32>
    %174 = vector.broadcast %173 : vector<8x16x1xf32> to vector<8x16x16xf32>
    %175 = arith.mulf %170, %174 : vector<8x16x16xf32>
    %cst_42 = arith.constant 0.000000e+00 : f32
    %176 = vector.broadcast %cst_42 : f32 to vector<8x16x8xf32>
    %cst_43 = arith.constant 0.000000e+00 : f32
    %177 = vector.broadcast %cst_43 : f32 to vector<8x16x16xf32>
    %178 = arith.select %94, %175, %177 : vector<8x16x16xi1>, vector<8x16x16xf32>
    %cst_44 = arith.constant dense<0.000000e+00> : vector<8x16xf32>
    %179 = vector.multi_reduction <add>, %178, %cst_44 [2] : vector<8x16x16xf32> to vector<8x16xf32>
    %180 = vector.shape_cast %179 : vector<8x16xf32> to vector<8x16x1xf32>
    %c0_45 = arith.constant 0 : index
    %c0_46 = arith.constant 0 : index
    %c0_47 = arith.constant 0 : index
    %181 = vector.load %arg4[%c0_45, %c0_46, %c0_47] : memref<8x8x8xf32, #tpu.memory_space<vmem>>, vector<8x1x8xf32>
    %182 = vector.broadcast %180 : vector<8x16x1xf32> to vector<8x16x8xf32>
    %183 = vector.broadcast %181 : vector<8x1x8xf32> to vector<8x16x8xf32>
    %184 = arith.mulf %182, %183 : vector<8x16x8xf32>
    %185 = arith.addf %176, %184 : vector<8x16x8xf32>
    %cst_48 = arith.constant 0.000000e+00 : f32
    %186 = vector.broadcast %cst_48 : f32 to vector<8x16x16xf32>
    %187 = arith.select %96, %175, %186 : vector<8x16x16xi1>, vector<8x16x16xf32>
    %cst_49 = arith.constant dense<0.000000e+00> : vector<8x16xf32>
    %188 = vector.multi_reduction <add>, %187, %cst_49 [2] : vector<8x16x16xf32> to vector<8x16xf32>
    %189 = vector.shape_cast %188 : vector<8x16xf32> to vector<8x16x1xf32>
    %c0_50 = arith.constant 0 : index
    %c1_51 = arith.constant 1 : index
    %c0_52 = arith.constant 0 : index
    %190 = vector.load %arg4[%c0_50, %c1_51, %c0_52] : memref<8x8x8xf32, #tpu.memory_space<vmem>>, vector<8x1x8xf32>
    %191 = vector.broadcast %189 : vector<8x16x1xf32> to vector<8x16x8xf32>
    %192 = vector.broadcast %190 : vector<8x1x8xf32> to vector<8x16x8xf32>
    %193 = arith.mulf %191, %192 : vector<8x16x8xf32>
    %194 = arith.addf %185, %193 : vector<8x16x8xf32>
    %cst_53 = arith.constant 0.000000e+00 : f32
    %195 = vector.broadcast %cst_53 : f32 to vector<8x16x16xf32>
    %196 = arith.select %98, %175, %195 : vector<8x16x16xi1>, vector<8x16x16xf32>
    %cst_54 = arith.constant dense<0.000000e+00> : vector<8x16xf32>
    %197 = vector.multi_reduction <add>, %196, %cst_54 [2] : vector<8x16x16xf32> to vector<8x16xf32>
    %198 = vector.shape_cast %197 : vector<8x16xf32> to vector<8x16x1xf32>
    %c0_55 = arith.constant 0 : index
    %c2_56 = arith.constant 2 : index
    %c0_57 = arith.constant 0 : index
    %199 = vector.load %arg4[%c0_55, %c2_56, %c0_57] : memref<8x8x8xf32, #tpu.memory_space<vmem>>, vector<8x1x8xf32>
    %200 = vector.broadcast %198 : vector<8x16x1xf32> to vector<8x16x8xf32>
    %201 = vector.broadcast %199 : vector<8x1x8xf32> to vector<8x16x8xf32>
    %202 = arith.mulf %200, %201 : vector<8x16x8xf32>
    %203 = arith.addf %194, %202 : vector<8x16x8xf32>
    %cst_58 = arith.constant 0.000000e+00 : f32
    %204 = vector.broadcast %cst_58 : f32 to vector<8x16x16xf32>
    %205 = arith.select %100, %175, %204 : vector<8x16x16xi1>, vector<8x16x16xf32>
    %cst_59 = arith.constant dense<0.000000e+00> : vector<8x16xf32>
    %206 = vector.multi_reduction <add>, %205, %cst_59 [2] : vector<8x16x16xf32> to vector<8x16xf32>
    %207 = vector.shape_cast %206 : vector<8x16xf32> to vector<8x16x1xf32>
    %c0_60 = arith.constant 0 : index
    %c3_61 = arith.constant 3 : index
    %c0_62 = arith.constant 0 : index
    %208 = vector.load %arg4[%c0_60, %c3_61, %c0_62] : memref<8x8x8xf32, #tpu.memory_space<vmem>>, vector<8x1x8xf32>
    %209 = vector.broadcast %207 : vector<8x16x1xf32> to vector<8x16x8xf32>
    %210 = vector.broadcast %208 : vector<8x1x8xf32> to vector<8x16x8xf32>
    %211 = arith.mulf %209, %210 : vector<8x16x8xf32>
    %212 = arith.addf %203, %211 : vector<8x16x8xf32>
    %cst_63 = arith.constant 0.000000e+00 : f32
    %213 = vector.broadcast %cst_63 : f32 to vector<8x16x16xf32>
    %214 = arith.select %102, %175, %213 : vector<8x16x16xi1>, vector<8x16x16xf32>
    %cst_64 = arith.constant dense<0.000000e+00> : vector<8x16xf32>
    %215 = vector.multi_reduction <add>, %214, %cst_64 [2] : vector<8x16x16xf32> to vector<8x16xf32>
    %216 = vector.shape_cast %215 : vector<8x16xf32> to vector<8x16x1xf32>
    %c0_65 = arith.constant 0 : index
    %c4_66 = arith.constant 4 : index
    %c0_67 = arith.constant 0 : index
    %217 = vector.load %arg4[%c0_65, %c4_66, %c0_67] : memref<8x8x8xf32, #tpu.memory_space<vmem>>, vector<8x1x8xf32>
    %218 = vector.broadcast %216 : vector<8x16x1xf32> to vector<8x16x8xf32>
    %219 = vector.broadcast %217 : vector<8x1x8xf32> to vector<8x16x8xf32>
    %220 = arith.mulf %218, %219 : vector<8x16x8xf32>
    %221 = arith.addf %212, %220 : vector<8x16x8xf32>
    %cst_68 = arith.constant 0.000000e+00 : f32
    %222 = vector.broadcast %cst_68 : f32 to vector<8x16x16xf32>
    %223 = arith.select %104, %175, %222 : vector<8x16x16xi1>, vector<8x16x16xf32>
    %cst_69 = arith.constant dense<0.000000e+00> : vector<8x16xf32>
    %224 = vector.multi_reduction <add>, %223, %cst_69 [2] : vector<8x16x16xf32> to vector<8x16xf32>
    %225 = vector.shape_cast %224 : vector<8x16xf32> to vector<8x16x1xf32>
    %c0_70 = arith.constant 0 : index
    %c5 = arith.constant 5 : index
    %c0_71 = arith.constant 0 : index
    %226 = vector.load %arg4[%c0_70, %c5, %c0_71] : memref<8x8x8xf32, #tpu.memory_space<vmem>>, vector<8x1x8xf32>
    %227 = vector.broadcast %225 : vector<8x16x1xf32> to vector<8x16x8xf32>
    %228 = vector.broadcast %226 : vector<8x1x8xf32> to vector<8x16x8xf32>
    %229 = arith.mulf %227, %228 : vector<8x16x8xf32>
    %230 = arith.addf %221, %229 : vector<8x16x8xf32>
    %cst_72 = arith.constant 0.000000e+00 : f32
    %231 = vector.broadcast %cst_72 : f32 to vector<8x16x16xf32>
    %232 = arith.select %106, %175, %231 : vector<8x16x16xi1>, vector<8x16x16xf32>
    %cst_73 = arith.constant dense<0.000000e+00> : vector<8x16xf32>
    %233 = vector.multi_reduction <add>, %232, %cst_73 [2] : vector<8x16x16xf32> to vector<8x16xf32>
    %234 = vector.shape_cast %233 : vector<8x16xf32> to vector<8x16x1xf32>
    %c0_74 = arith.constant 0 : index
    %c6 = arith.constant 6 : index
    %c0_75 = arith.constant 0 : index
    %235 = vector.load %arg4[%c0_74, %c6, %c0_75] : memref<8x8x8xf32, #tpu.memory_space<vmem>>, vector<8x1x8xf32>
    %236 = vector.broadcast %234 : vector<8x16x1xf32> to vector<8x16x8xf32>
    %237 = vector.broadcast %235 : vector<8x1x8xf32> to vector<8x16x8xf32>
    %238 = arith.mulf %236, %237 : vector<8x16x8xf32>
    %239 = arith.addf %230, %238 : vector<8x16x8xf32>
    %cst_76 = arith.constant 0.000000e+00 : f32
    %240 = vector.broadcast %cst_76 : f32 to vector<8x16x16xf32>
    %241 = arith.select %108, %175, %240 : vector<8x16x16xi1>, vector<8x16x16xf32>
    %cst_77 = arith.constant dense<0.000000e+00> : vector<8x16xf32>
    %242 = vector.multi_reduction <add>, %241, %cst_77 [2] : vector<8x16x16xf32> to vector<8x16xf32>
    %243 = vector.shape_cast %242 : vector<8x16xf32> to vector<8x16x1xf32>
    %c0_78 = arith.constant 0 : index
    %c7 = arith.constant 7 : index
    %c0_79 = arith.constant 0 : index
    %244 = vector.load %arg4[%c0_78, %c7, %c0_79] : memref<8x8x8xf32, #tpu.memory_space<vmem>>, vector<8x1x8xf32>
    %245 = vector.broadcast %243 : vector<8x16x1xf32> to vector<8x16x8xf32>
    %246 = vector.broadcast %244 : vector<8x1x8xf32> to vector<8x16x8xf32>
    %247 = arith.mulf %245, %246 : vector<8x16x8xf32>
    %248 = arith.addf %239, %247 : vector<8x16x8xf32>
    %249 = arith.truncf %175 : vector<8x16x16xf32> to vector<8x16x16xbf16>
    "tpu.trace_start"() <{level = 10 : i32, message = "blm,bmd->bld"}> : () -> ()
    %cst_80 = arith.constant dense<0.000000e+00> : vector<8x16x8xf32>
    %250 = tpu.matmul %249, %87, %cst_80 {dimension_numbers = #tpu.dot_dimension_numbers<[2], [1], [1], [2], [0, 0, 0, 1, 1, 2], [0], [0]>} : vector<8x16x16xbf16>, vector<8x16x8xbf16>, vector<8x16x8xf32> -> vector<8x16x8xf32>
    "tpu.trace_stop"() : () -> ()
    %251 = arith.addf %250, %248 : vector<8x16x8xf32>
    %252 = vector.extract_strided_slice %251 {offsets = [0, 0, 0], sizes = [1, 16, 8], strides = [1, 1, 1]} : vector<8x16x8xf32> to vector<1x16x8xf32>
    %253 = vector.shape_cast %252 : vector<1x16x8xf32> to vector<16x8xf32>
    %254 = vector.extract_strided_slice %251 {offsets = [1, 0, 0], sizes = [1, 16, 8], strides = [1, 1, 1]} : vector<8x16x8xf32> to vector<1x16x8xf32>
    %255 = vector.shape_cast %254 : vector<1x16x8xf32> to vector<16x8xf32>
    %256 = vector.extract_strided_slice %251 {offsets = [2, 0, 0], sizes = [1, 16, 8], strides = [1, 1, 1]} : vector<8x16x8xf32> to vector<1x16x8xf32>
    %257 = vector.shape_cast %256 : vector<1x16x8xf32> to vector<16x8xf32>
    %258 = vector.extract_strided_slice %251 {offsets = [3, 0, 0], sizes = [1, 16, 8], strides = [1, 1, 1]} : vector<8x16x8xf32> to vector<1x16x8xf32>
    %259 = vector.shape_cast %258 : vector<1x16x8xf32> to vector<16x8xf32>
    %260 = tpu.concatenate %253, %255, %257, %259 in 1 : vector<16x8xf32>, vector<16x8xf32>, vector<16x8xf32>, vector<16x8xf32> -> vector<16x32xf32>
    %261 = vector.extract_strided_slice %251 {offsets = [4, 0, 0], sizes = [1, 16, 8], strides = [1, 1, 1]} : vector<8x16x8xf32> to vector<1x16x8xf32>
    %262 = vector.shape_cast %261 : vector<1x16x8xf32> to vector<16x8xf32>
    %263 = vector.extract_strided_slice %251 {offsets = [5, 0, 0], sizes = [1, 16, 8], strides = [1, 1, 1]} : vector<8x16x8xf32> to vector<1x16x8xf32>
    %264 = vector.shape_cast %263 : vector<1x16x8xf32> to vector<16x8xf32>
    %265 = vector.extract_strided_slice %251 {offsets = [6, 0, 0], sizes = [1, 16, 8], strides = [1, 1, 1]} : vector<8x16x8xf32> to vector<1x16x8xf32>
    %266 = vector.shape_cast %265 : vector<1x16x8xf32> to vector<16x8xf32>
    %267 = vector.extract_strided_slice %251 {offsets = [7, 0, 0], sizes = [1, 16, 8], strides = [1, 1, 1]} : vector<8x16x8xf32> to vector<1x16x8xf32>
    %268 = vector.shape_cast %267 : vector<1x16x8xf32> to vector<16x8xf32>
    %269 = tpu.concatenate %262, %264, %266, %268 in 1 : vector<16x8xf32>, vector<16x8xf32>, vector<16x8xf32>, vector<16x8xf32> -> vector<16x32xf32>
    %270 = tpu.concatenate %260, %269 in 0 : vector<16x32xf32>, vector<16x32xf32> -> vector<32x32xf32>
    %271 = arith.truncf %270 : vector<32x32xf32> to vector<32x32xbf16>
    %c0_81 = arith.constant 0 : index
    %c0_82 = arith.constant 0 : index
    %272 = vector.load %arg6[%c0_81, %c0_82] : memref<32x32xbf16, #tpu.memory_space<vmem>>, vector<32x32xbf16>
    %cst_83 = arith.constant dense<0.000000e+00> : vector<32x32xf32>
    %273 = tpu.matmul %271, %272, %cst_83 {dimension_numbers = #tpu.dot_dimension_numbers<[1], [0], [0], [1], [0, 0, 1, 1], [], []>} : vector<32x32xbf16>, vector<32x32xbf16>, vector<32x32xf32> -> vector<32x32xf32>
    %274 = vector.broadcast %3 : vector<1x32xf32> to vector<32x32xf32>
    %275 = arith.addf %273, %274 : vector<32x32xf32>
    %276 = arith.addf %0, %275 : vector<32x32xf32>
    %cst_84 = arith.constant dense<0.000000e+00> : vector<32xf32>
    %277 = vector.multi_reduction <add>, %276, %cst_84 [1] : vector<32x32xf32> to vector<32xf32>
    %278 = vector.shape_cast %277 : vector<32xf32> to vector<32x1xf32>
    %cst_85 = arith.constant 3.200000e+01 : f32
    %279 = vector.broadcast %cst_85 : f32 to vector<32x1xf32>
    %280 = arith.divf %278, %279 : vector<32x1xf32>
    %281 = vector.broadcast %280 : vector<32x1xf32> to vector<32x32xf32>
    %282 = arith.subf %276, %281 : vector<32x32xf32>
    %283 = arith.mulf %282, %282 : vector<32x32xf32>
    %cst_86 = arith.constant dense<0.000000e+00> : vector<32xf32>
    %284 = vector.multi_reduction <add>, %283, %cst_86 [1] : vector<32x32xf32> to vector<32xf32>
    %285 = vector.shape_cast %284 : vector<32xf32> to vector<32x1xf32>
    %cst_87 = arith.constant 3.100000e+01 : f32
    %286 = vector.broadcast %cst_87 : f32 to vector<32x1xf32>
    %287 = arith.divf %285, %286 : vector<32x1xf32>
    %288 = math.sqrt %287 : vector<32x1xf32>
    %289 = vector.broadcast %7 : vector<1x32xf32> to vector<32x32xf32>
    %290 = arith.mulf %289, %282 : vector<32x32xf32>
    %cst_88 = arith.constant 9.99999997E-7 : f32
    %291 = vector.broadcast %cst_88 : f32 to vector<32x1xf32>
    %292 = arith.addf %288, %291 : vector<32x1xf32>
    %293 = vector.broadcast %292 : vector<32x1xf32> to vector<32x32xf32>
    %294 = arith.divf %290, %293 : vector<32x32xf32>
    %295 = vector.broadcast %8 : vector<1x32xf32> to vector<32x32xf32>
    %296 = arith.addf %294, %295 : vector<32x32xf32>
    %297 = arith.truncf %296 : vector<32x32xf32> to vector<32x32xbf16>
    %c0_89 = arith.constant 0 : index
    %c0_90 = arith.constant 0 : index
    %298 = vector.load %arg7[%c0_89, %c0_90] : memref<32x64xbf16, #tpu.memory_space<vmem>>, vector<32x64xbf16>
    %cst_91 = arith.constant dense<0.000000e+00> : vector<32x64xf32>
    %299 = tpu.matmul %297, %298, %cst_91 {dimension_numbers = #tpu.dot_dimension_numbers<[1], [0], [0], [1], [0, 0, 1, 1], [], []>} : vector<32x32xbf16>, vector<32x64xbf16>, vector<32x64xf32> -> vector<32x64xf32>
    %300 = vector.broadcast %2 : vector<1x64xf32> to vector<32x64xf32>
    %301 = arith.addf %299, %300 : vector<32x64xf32>
    %cst_92 = arith.constant 5.000000e-01 : f32
    %302 = vector.broadcast %cst_92 : f32 to vector<32x64xf32>
    %303 = arith.mulf %302, %301 : vector<32x64xf32>
    %cst_93 = arith.constant 4.471500e-02 : f32
    %304 = vector.broadcast %cst_93 : f32 to vector<32x64xf32>
    %305 = arith.mulf %304, %301 : vector<32x64xf32>
    %306 = arith.mulf %305, %301 : vector<32x64xf32>
    %307 = arith.mulf %306, %301 : vector<32x64xf32>
    %308 = arith.addf %301, %307 : vector<32x64xf32>
    %cst_94 = arith.constant 0.797884583 : f32
    %309 = vector.broadcast %cst_94 : f32 to vector<32x64xf32>
    %310 = arith.mulf %309, %308 : vector<32x64xf32>
    %311 = math.tanh %310 : vector<32x64xf32>
    %cst_95 = arith.constant 1.000000e+00 : f32
    %312 = vector.broadcast %cst_95 : f32 to vector<32x64xf32>
    %313 = arith.addf %312, %311 : vector<32x64xf32>
    %314 = arith.mulf %303, %313 : vector<32x64xf32>
    %315 = arith.truncf %314 : vector<32x64xf32> to vector<32x64xbf16>
    %c0_96 = arith.constant 0 : index
    %c0_97 = arith.constant 0 : index
    %316 = vector.load %arg8[%c0_96, %c0_97] : memref<64x32xbf16, #tpu.memory_space<vmem>>, vector<64x32xbf16>
    %cst_98 = arith.constant dense<0.000000e+00> : vector<32x32xf32>
    %317 = tpu.matmul %315, %316, %cst_98 {dimension_numbers = #tpu.dot_dimension_numbers<[1], [0], [0], [1], [0, 0, 1, 1], [], []>} : vector<32x64xbf16>, vector<64x32xbf16>, vector<32x32xf32> -> vector<32x32xf32>
    %318 = vector.broadcast %4 : vector<1x32xf32> to vector<32x32xf32>
    %319 = arith.addf %317, %318 : vector<32x32xf32>
    %320 = arith.addf %276, %319 : vector<32x32xf32>
    %c0_99 = arith.constant 0 : index
    %c0_100 = arith.constant 0 : index
    %321 = vector.load %arg10[%c0_99, %c0_100] : memref<32x32xf32, #tpu.memory_space<vmem>>, vector<32x32xf32>
    tpu.vector_store %arg10[%c0_99, %c0_100], %320 {strides = array<i32>} : memref<32x32xf32, #tpu.memory_space<vmem>>, vector<32x32xf32>,
    return
  }
}

</mosaic_0001>

<bundles_post_ra>
// kernel: transformer_block.1
= control target key start
LH: loop header
LB: loop body
LE: loop exit
PB: predicated region body
PF: predicated region fallthrough
CT: control target
= control target key end

     0   :  { %vm7186_vm0 = vcmask 261120   ;;  %s7153_s0 = inlined_call_operand.vmem [shape: f32[32,32], index: 0, kind: input, shape index: {}]   ;;  %s7154_s1 = inlined_call_operand.vmem [shape: s32[2,16,16], index: 1, kind: input, shape index: {}]   ;;  %s7155_s2 = inlined_call_operand.vmem [shape: f32[8,16,16], index: 2, kind: input, shape index: {}]   ;;  %s7156_s3 = inlined_call_operand.vmem [shape: bf16[8,8,8], index: 3, kind: input, shape index: {}]   ;;  %s7157_s4 = inlined_call_operand.vmem [shape: f32[8,8,8], index: 4, kind: input, shape index: {}]   ;;  %s7158_s5 = inlined_call_operand.vmem [shape: bf16[32,96], index: 5, kind: input, shape index: {}]   ;;  %s7159_s6 = inlined_call_operand.vmem [shape: bf16[32,32], index: 6, kind: input, shape index: {}]   ;;  %s7160_s7 = inlined_call_operand.vmem [shape: bf16[32,64], index: 7, kind: input, shape index: {}]   ;;  %s7161_s8 = inlined_call_operand.vmem [shape: bf16[64,32], index: 8, kind: input, shape index: {}]   ;;  %s7162_s9 = inlined_call_operand.vmem [shape: f32[5,96], index: 9, kind: input, shape index: {}]   ;;  %s7163_s10 = inlined_call_operand.hbm [shape: f32[32,32], index: 10, kind: output, shape index: {}]  }
   0x1   :  { %v37_v0 = vld [vmem:[%s7153_s0] sm:$0xff]  ;;  %v39_v1 = vld [vmem:[%s7153_s0 + $0x10] sm:$0xff]  ;;  %v38_v2 = vld [vmem:[%s7153_s0 + $0x8] sm:$0xff] }
   0x2   :  { %v47_v3 = vsel %vm7186_vm0, %v37_v0, 0.0  ;;  %v53_v4 = vsel %vm7186_vm0, %v39_v1, 0.0  ;;  %v40_v5 = vld [vmem:[%s7153_s0 + $0x18] sm:$0xff]  ;;  %v50_v6 = vsel %vm7186_vm0, %v38_v2, 0.0 }
   0x3   :  { %48 = vadd.xlane.f32.xlu0 %v47_v3  ;;  %54 = vadd.xlane.f32.xlu1 %v53_v4  ;;  %v56_v7 = vsel %vm7186_vm0, %v40_v5, 0.0 }
   0x7   :  { %51 = vadd.xlane.f32.xlu0 %v50_v6  ;;  %57 = vadd.xlane.f32.xlu1 %v56_v7 }
   0x8   :  { %15 = vsyncpa [#allocation3], 0  ;;  %v4017_v12 = vld [vmem:[%s7162_s9 + $0x3] ss:$0 sm:$0xff]  ;;  %s4724_s23 = smov 96   ;;  %v4583_v34 = vld [vmem:[%s7158_s5 + $0x8] sm:$0xff]  }
   0x9   :  { %v4582_v33 = vld [vmem:[%s7158_s5] sm:$0xff]   ;;  %vm7187_vm9 = vcmask 64512   ;;  %vm7188_vm10 = vmmov 0   ;;  %s4727_s15 = smov 112   ;;  %s4728_s16 = smov 120  }
   0xa   :  { %4194 = vmatprep.subr.bf16.mxu0 %v4582_v33  ;;  %s4729_s17 = smov 104   ;;  %s4730_s18 = smov 64  }
   0xb   :  { %4195 = vmatpush3.bf16.msra.mxu0 %v4582_v33  ;;  %s4741_s19 = smov 24  }
   0xc   :  { %4196 = vmatprep.subr.bf16.mxu0 %v4583_v34 }
   0xf   :  { %4197 = vmatpush3.bf16.msra.mxu0 %v4583_v34 }
  0x90   :  { %v49_v8 = vpop.xlane.xlu0 %48  ;;  %v55_v9 = vpop.xlane.xlu1 %54 }
  0x91   :  { %v60_v10 = vmul.f32 0.03125, %v49_v8  ;;  %v62_v11 = vmul.f32 0.03125, %v55_v9 }
  0x93   :  { %v64_v13 = vsub.f32 %v37_v0, %v60_v10  ;;  %v66_v14 = vsub.f32 %v39_v1, %v62_v11 }
  0x94   :  { %v52_v15 = vpop.xlane.xlu0 %51  ;;  %v58_v16 = vpop.xlane.xlu1 %57 }
  0x95   :  { %v4818_v17 = vmul.f32 %v4017_v12, %v64_v13  ;;  %v4820_v18 = vmul.f32 %v4017_v12, %v66_v14  ;;  %v61_v19 = vmul.f32 0.03125, %v52_v15  ;;  %v63_v20 = vmul.f32 0.03125, %v58_v16 }
  0x96   :  { %v68_v21 = vmul.f32 %v64_v13, %v64_v13  ;;  %v70_v22 = vmul.f32 %v66_v14, %v66_v14 }
  0x97   :  { %v65_v23 = vsub.f32 %v38_v2, %v61_v19  ;;  %v67_v24 = vsub.f32 %v40_v5, %v63_v20  ;;  %v7164_v20 = vmov 0.0  }
  0x98   :  { %v72_v25 = vsel %vm7186_vm0, %v68_v21, 0.0  ;;  %v78_v30 = vsel %vm7186_vm0, %v70_v22, 0.0  ;;  %4202 = vmatprep.subr.bf16.mxu1 %v7164_v20  ;;  %4208 = vmatprep.subr.bf16.mxu0 %v7164_v20  ;;  %v307_v21 = vld [vmem:[%s7156_s3 + $0x4] sm:$0xf] }
  0x99   :  { %v4823_v26 = vmul.f32 %v4017_v12, %v65_v23  ;;  %v4825_v27 = vmul.f32 %v4017_v12, %v67_v24  ;;  %73 = vadd.xlane.f32.xlu0 %v72_v25  ;;  %v69_v28 = vmul.f32 %v65_v23, %v65_v23  ;;  %v71_v29 = vmul.f32 %v67_v24, %v67_v24  ;;  %v4018_v24 = vld [vmem:[%s7162_s9] ss:$0 sm:$0xff] }
  0x9a   :  { %4204 = vmatprep.mubr.msk.bf16.mxu1 %vm7188_vm10, %v7164_v20  ;;  %v366_v22 = vsel %vm7187_vm9, %v307_v21, 0 }
  0x9b   :  { %v75_v31 = vsel %vm7186_vm0, %v69_v28, 0.0  ;;  %v81_v32 = vsel %vm7186_vm0, %v71_v29, 0.0 }
  0x9c   :  { %76 = vadd.xlane.f32.xlu1 %v75_v31 }
  0x9d   :  { %79 = vadd.xlane.f32.xlu0 %v78_v30 }
  0xa0   :  { %82 = vadd.xlane.f32.xlu1 %v81_v32 }
  0xb3   :  { %138 = vrot.lane.b32.xlu0 %v4017_v12, %s4724_s23 }
 0x126   :  { %v74_v35 = vpop.xlane.xlu0 %73 }
 0x127   :  { %v85_v36 = vmul.f32 0.032258064, %v74_v35 }
 0x129   :  { %4592 = vrsqrt.f32 %v85_v36  ;;  %v77_v37 = vpop.xlane.xlu1 %76  ;;  %vm91_vm1 = vcmp.eq.f32.partialorder %v85_v36, inf  ;;  %v94_v45 = vand.u32 2147483648, %v85_v36  ;;  %vm93_vm2 = vcmp.eq.f32.partialorder %v85_v36, 0.0 }
 0x12a   :  { %v86_v38 = vmul.f32 0.032258064, %v77_v37  ;;  %v80_v39 = vpop.xlane.xlu0 %79 }
 0x12b   :  { %v87_v40 = vmul.f32 0.032258064, %v80_v39  ;;  %v7172_v39 = vmov 0  }
 0x12c   :  { %4594 = vrsqrt.f32 %v86_v38  ;;  %vm98_vm3 = vcmp.eq.f32.partialorder %v86_v38, inf  ;;  %v101_v51 = vand.u32 2147483648, %v86_v38  ;;  %vm100_vm5 = vcmp.eq.f32.partialorder %v86_v38, 0.0  ;;  %4424 = vset.pattern.permute.xlu1 %v7172_v39 }
 0x12d   :  { %4596 = vrsqrt.f32 %v87_v40  ;;  %v83_v41 = vpop.xlane.xlu1 %82  ;;  %vm105_vm4 = vcmp.eq.f32.partialorder %v87_v40, inf  ;;  %v108_v54 = vand.u32 2147483648, %v87_v40  ;;  %vm107_vm6 = vcmp.eq.f32.partialorder %v87_v40, 0.0 }
 0x12e   :  { %v88_v42 = vmul.f32 0.032258064, %v83_v41  ;;  %v139_v6 = vpop.permute.xlu0 %138 }
 0x130   :  { %4598 = vrsqrt.f32 %v88_v42  ;;  %vm112_vm7 = vcmp.eq.f32.partialorder %v88_v42, inf  ;;  %v115_v62 = vand.u32 2147483648, %v88_v42  ;;  %vm114_vm8 = vcmp.eq.f32.partialorder %v88_v42, 0.0 }
 0x133   :  { %v4593_v43 = vpop.eup %4592 }
 0x134   :  { %v90_v44 = vmul.f32 %v4593_v43, %v85_v36 }
 0x136   :  { %v4595_v46 = vpop.eup %4594  ;;  %v92_v47 = vsel %vm91_vm1, %v85_v36, %v90_v44 }
 0x137   :  { %v4597_v48 = vpop.eup %4596  ;;  %v97_v49 = vmul.f32 %v4595_v46, %v86_v38  ;;  %v95_v50 = vsel %vm93_vm2, %v94_v45, %v92_v47 }
 0x138   :  { %v104_v52 = vmul.f32 %v4597_v48, %v87_v40  ;;  %v125_v53 = vadd.f32 1e-06, %v95_v50  ;;  %v309_v50 = vld [vmem:[%s7156_s3 + $0xc] sm:$0xf] }
 0x139   :  { %v99_v55 = vsel %vm98_vm3, %v86_v38, %v97_v49  ;;  %v7168_v38 = vmov 3  }
 0x13a   :  { %v4599_v56 = vpop.eup %4598  ;;  %v106_v57 = vsel %vm105_vm4, %v87_v40, %v104_v52  ;;  %v102_v58 = vsel %vm100_vm5, %v101_v51, %v99_v55  ;;  %4600 = vrcp.f32 %v125_v53  ;;  %4427 = vset.pattern.permute.xlu0 %v7168_v38 }
 0x13b   :  { %v109_v59 = vsel %vm107_vm6, %v108_v54, %v106_v57  ;;  %v111_v60 = vmul.f32 %v4599_v56, %v88_v42  ;;  %v126_v61 = vadd.f32 1e-06, %v102_v58  ;;  %v460_v57 = vsel %vm7187_vm9, %v309_v50, 0 }
 0x13c   :  { %v127_v63 = vadd.f32 1e-06, %v109_v59 }
 0x13d   :  { %v113_v0 = vsel %vm112_vm7, %v88_v42, %v111_v60  ;;  %4602 = vrcp.f32 %v126_v61  ;;  %v310_v61 = vld [vmem:[%s7156_s3 + $0x10] sm:$0xf] }
 0x13e   :  { %v116_v1 = vsel %vm114_vm8, %v115_v62, %v113_v0  ;;  %4604 = vrcp.f32 %v127_v63  ;;  %v507_v0 = vsel %vm7187_vm9, %v310_v61, 0 }
 0x13f   :  { %v128_v2 = vadd.f32 1e-06, %v116_v1  ;;  %v311_v1 = vld [vmem:[%s7156_s3 + $0x14] sm:$0xf] }
 0x141   :  { %4606 = vrcp.f32 %v128_v2 }
 0x144   :  { %v4601_v3 = vpop.eup %4600 }
 0x145   :  { %v130_v4 = vmul.f32 %v4601_v3, %v4818_v17  ;;  %v306_v17 = vld [vmem:[%s7156_s3] sm:$0xf] }
 0x147   :  { %v4603_v5 = vpop.eup %4602  ;;  %v141_v10 = vadd.f32 %v139_v6, %v130_v4 }
 0x148   :  { %v4605_v7 = vpop.eup %4604  ;;  %v132_v8 = vmul.f32 %v4603_v5, %v4823_v26  ;;  %v308_v26 = vld [vmem:[%s7156_s3 + $0x8] sm:$0xf]  ;;  %v554_v5 = vsel %vm7187_vm9, %v311_v1, 0 }
 0x149   :  { %v134_v9 = vmul.f32 %v4605_v7, %v4820_v18  ;;  %v319_v18 = vsel %vm7187_vm9, %v306_v17, 0  ;;  %v413_v33 = vsel %vm7187_vm9, %v308_v26, 0  ;;  %v7176_v17 = vmov 2  }
 0x14a   :  { %v142_v11 = vadd.f32 %v139_v6, %v132_v8  ;;  %4203 = vmatpush3.bf16.xpose.msra.mxu1 %v319_v18  ;;  %v313_v8 = vld [vmem:[%s7156_s3 + $0x1c] sm:$0xf]  ;;  %v7166_v18 = vmov 4  }
 0x14b   :  { %v4607_v12 = vpop.eup %4606  ;;  %v143_v15 = vadd.f32 %v139_v6, %v134_v9  ;;  %4214 = vmatprep.subr.bf16.mxu1 %v7164_v20 }
 0x14c   :  { %v136_v13 = vmul.f32 %v4607_v12, %v4825_v27  ;;  %v145_v14 = vpack.c.bf16 %v142_v11, %v141_v10  ;;  %v648_v10 = vsel %vm7187_vm9, %v313_v8, 0 }
 0x14e   :  { %v144_v16 = vadd.f32 %v139_v6, %v136_v13  ;;  %4198 = vmatprep.mubr.msk.bf16.mxu0 %vm7186_vm0, %v145_v14  ;;  %v312_v6 = vld [vmem:[%s7156_s3 + $0x18] sm:$0xf] }
 0x14f   :  { %v601_v7 = vsel %vm7187_vm9, %v312_v6, 0 }
 0x150   :  { %v146_v19 = vpack.c.bf16 %v144_v16, %v143_v15 }
 0x152   :  { %4199 = vmatmul.mubr.msk.bf16.vlgmr.msra.gmra.mrb[0].mxu0 %vm7186_vm0, %v146_v19  ;;  %v7174_v19 = vmov 1  }
 0x153   :  { %4210 = vmatprep.mubr.msk.bf16.mxu0 %vm7188_vm10, %v7164_v20  ;;  %4209 = vmatpush3.bf16.xpose.msra.mxu0 %v366_v22  ;;  %v7178_v22 = vmov 5  }
 0x154   :  { %4220 = vmatprep.subr.bf16.mxu0 %v7164_v20 }
 0x225   :  { %v4200_v23 = vpop.f32.mrb[0].mxu0 }
 0x226   :  { %v207_v25 = vpop.f32.mrb[1].mxu0  ;;  %v216_v28 = vadd.f32 %v4200_v23, %v4018_v24  ;;  %v7170_v23 = vmov 6  }
 0x227   :  { %v4201_v27 = vpop.f32.mrb[2].mxu0  ;;  %v208_v31 = vadd.f32 %v4018_v24, %v207_v25 }
 0x228   :  { %v219_v29 = vadd.f32 %v4201_v27, %v4018_v24  ;;  %v210_v30 = vpop.f32.mrb[3].mxu0  ;;  %v7182_v27 = vmov 7  }
 0x229   :  { %v211_v32 = vadd.f32 %v4018_v24, %v210_v30 }
 0x22a   :  { %v4399_v34 = vpack.i.bf16 %v219_v29, %v216_v28  ;;  %v4866_v35 = vpack.c.bf16 %v219_v29, %v216_v28 }
 0x22b   :  { %v4868_v36 = vpack.c.bf16 %v211_v32, %v208_v31  ;;  %v4409_v37 = vpack.i.bf16 %v211_v32, %v208_v31 }
 0x22c   :  { %7212 = vst [vmem:[#allocation5_spill] sm:$0xff] %v4866_v35  ;;  %4400 = vrot.lane.b32.xlu1 %v4399_v34, %s4727_s15  ;;  %4395 = vrot.lane.b32.xlu0 %v4399_v34, %s4728_s16 }
 0x22d   :  { %4205 = vmatmul.mubr.msk.bf16.vlgmr.msra.gmra.mrb[0].mxu1 %vm7187_vm9, %v4868_v36 }
 0x22e   :  { %4215 = vmatpush3.bf16.xpose.msra.mxu1 %v413_v33  ;;  %4216 = vmatprep.mubr.msk.bf16.mxu1 %vm7188_vm10, %v7164_v20 }
 0x22f   :  { %4226 = vmatprep.subr.bf16.mxu1 %v7164_v20 }
 0x230   :  { %4405 = vrot.lane.b32.xlu0 %v4399_v34, %s4729_s17  ;;  %4410 = vrot.lane.b32.xlu1 %v4409_v37, %s4728_s16  ;;  %s4739_s16 = smov 8  }
 0x234   :  { %4415 = vrot.lane.b32.xlu1 %v4409_v37, %s4727_s15  ;;  %3172 = vrot.lane.b32.xlu0 %v4868_v36, %s4730_s18 }
 0x238   :  { %4420 = vrot.lane.b32.xlu1 %v4409_v37, %s4729_s17  ;;  %s4740_s17 = smov 16  }
 0x23c   :  { %1664 = vrot.lane.b32.xlu1 %v4866_v35, %s4724_s23 }
 0x240   :  { %1476 = vrot.lane.b32.xlu1 %v4868_v36, %s4724_s23 }
 0x29e   :  { %v4401_v40 = vpop.permute.xlu1 %4400  ;;  %v4396_v41 = vpop.permute.xlu0 %4395 }
 0x29f   :  { %v4403_v42 = vunpack.i.h.bf16 %v4401_v40  ;;  %v4402_v43 = vunpack.i.l.bf16 %v4401_v40  ;;  %v4398_v44 = vunpack.i.h.bf16 %v4396_v41  ;;  %v4397_v45 = vunpack.i.l.bf16 %v4396_v41 }
 0x2a1   :  { %v4883_v46 = vpack.c.bf16 %v4403_v42, %v4402_v43  ;;  %v4885_v47 = vpack.c.bf16 %v4398_v44, %v4397_v45 }
 0x2a2   :  { %v4406_v48 = vpop.permute.xlu0 %4405  ;;  %v4411_v49 = vpop.permute.xlu1 %4410 }
 0x2a3   :  { %7213 = vst [vmem:[#allocation6_spill] sm:$0xff] %v4883_v46  ;;  %7214 = vst [vmem:[#allocation7_spill] sm:$0xff] %v4885_v47  ;;  %v4408_v51 = vunpack.i.h.bf16 %v4406_v48  ;;  %v4407_v52 = vunpack.i.l.bf16 %v4406_v48  ;;  %v4413_v53 = vunpack.i.h.bf16 %v4411_v49  ;;  %v4412_v54 = vunpack.i.l.bf16 %v4411_v49  ;;  %1711 = vrot.lane.b32.xlu0 %v4885_v47, %s4724_s23  ;;  %1758 = vrot.lane.b32.xlu1 %v4883_v46, %s4724_s23 }
 0x2a5   :  { %v4894_v55 = vpack.c.bf16 %v4408_v51, %v4407_v52  ;;  %v4896_v56 = vpack.c.bf16 %v4413_v53, %v4412_v54 }
 0x2a6   :  { %v4416_v58 = vpop.permute.xlu1 %4415  ;;  %v3173_v21 = vpop.permute.xlu0 %3172 }
 0x2a7   :  { %7215 = vst [vmem:[#allocation8_spill] sm:$0xff] %v4894_v55  ;;  %v4418_v59 = vunpack.i.h.bf16 %v4416_v58  ;;  %v4417_v60 = vunpack.i.l.bf16 %v4416_v58  ;;  %4211 = vmatmul.mubr.msk.bf16.vlgmr.msra.gmra.mrb[4].mxu0 %vm7187_vm9, %v4896_v56  ;;  %1805 = vrot.lane.b32.xlu0 %v4894_v55, %s4724_s23 }
 0x2a8   :  { %4221 = vmatpush3.bf16.xpose.msra.mxu0 %v460_v57  ;;  %4222 = vmatprep.mubr.msk.bf16.mxu0 %vm7188_vm10, %v7164_v20 }
 0x2a9   :  { %v4908_v62 = vpack.c.bf16 %v4418_v59, %v4417_v60  ;;  %4232 = vmatprep.subr.bf16.mxu0 %v7164_v20 }
 0x2aa   :  { %v4421_v63 = vpop.permute.xlu1 %4420 }
 0x2ab   :  { %v4423_v2 = vunpack.i.h.bf16 %v4421_v63  ;;  %v4422_v3 = vunpack.i.l.bf16 %v4421_v63  ;;  %1523 = vrot.lane.b32.xlu0 %v4896_v56, %s4724_s23  ;;  %1570 = vrot.lane.b32.xlu1 %v4908_v62, %s4724_s23 }
 0x2ac   :  { %4217 = vmatmul.mubr.msk.bf16.vlgmr.msra.gmra.mrb[4].mxu1 %vm7187_vm9, %v4908_v62 }
 0x2ad   :  { %v4921_v4 = vpack.c.bf16 %v4423_v2, %v4422_v3  ;;  %4227 = vmatpush3.bf16.xpose.msra.mxu1 %v507_v0  ;;  %4228 = vmatprep.mubr.msk.bf16.mxu1 %vm7188_vm10, %v7164_v20 }
 0x2ae   :  { %4238 = vmatprep.subr.bf16.mxu1 %v7164_v20  ;;  %v4943_v9 = vpop.permute.xlu1 %1664 }
 0x2af   :  { %4223 = vmatmul.mubr.msk.bf16.vlgmr.msra.gmra.mrb[8].mxu0 %vm7187_vm9, %v4921_v4  ;;  %1617 = vrot.lane.b32.xlu0 %v4921_v4, %s4724_s23  ;;  %v1667_v33 = vsel %vm7187_vm9, %v4943_v9, 0 }
 0x2b0   :  { %3219 = vrot.lane.b32.xlu1 %v4896_v56, %s4730_s18  ;;  %4233 = vmatpush3.bf16.xpose.msra.mxu0 %v554_v5 }
 0x2b1   :  { %4234 = vmatprep.mubr.msk.bf16.mxu0 %vm7188_vm10, %v7164_v20  ;;  %4244 = vmatprep.subr.bf16.mxu0 %v7164_v20 }
 0x2b2   :  { %v1477_v11 = vpop.permute.xlu1 %1476 }
 0x2b3   :  { %v1479_v12 = vsel %vm7187_vm9, %v1477_v11, 0 }
 0x2b4   :  { %3266 = vrot.lane.b32.xlu1 %v4908_v62, %s4730_s18  ;;  %4229 = vmatmul.mubr.msk.bf16.vlgmr.msra.gmra.mrb[8].mxu1 %vm7187_vm9, %v4866_v35 }
 0x2b5   :  { %4239 = vmatpush3.bf16.xpose.msra.mxu1 %v601_v7  ;;  %4240 = vmatprep.mubr.msk.bf16.mxu1 %vm7188_vm10, %v7164_v20 }
 0x2b6   :  { %4250 = vmatprep.subr.bf16.mxu1 %v7164_v20 }
 0x2b7   :  { %4235 = vmatmul.mubr.msk.bf16.vlgmr.msra.gmra.mrb[12].mxu0 %vm7187_vm9, %v4885_v47 }
 0x2b8   :  { %3313 = vrot.lane.b32.xlu1 %v4921_v4, %s4730_s18  ;;  %4245 = vmatpush3.bf16.xpose.msra.mxu0 %v648_v10 }
 0x2b9   :  { %4246 = vmatprep.mubr.msk.bf16.mxu0 %vm7188_vm10, %v7164_v20  ;;  %4256 = vmatprep.subr.bf16.mxu0 %v7164_v20 }
 0x2bc   :  { %4241 = vmatmul.mubr.msk.bf16.vlgmr.msra.gmra.mrb[12].mxu1 %vm7187_vm9, %v4883_v46 }
 0x2bd   :  { %4251 = vmatpush3.bf16.xpose.msra.mxu1 %v1479_v12  ;;  %4252 = vmatprep.mubr.msk.bf16.mxu1 %vm7188_vm10, %v7164_v20 }
 0x2be   :  { %4262 = vmatprep.subr.bf16.mxu1 %v7164_v20 }
 0x2bf   :  { %4247 = vmatmul.mubr.msk.bf16.vlgmr.msra.gmra.mrb[16].mxu0 %vm7187_vm9, %v4894_v55 }
 0x2c0   :  { %4258 = vmatprep.mubr.msk.bf16.mxu0 %vm7188_vm10, %v7164_v20 }
 0x2c4   :  { %4253 = vmatmul.mubr.msk.bf16.vlgmr.msra.gmra.mrb[16].mxu1 %vm7187_vm9, %v4868_v36 }
 0x2c5   :  { %4264 = vmatprep.mubr.msk.bf16.mxu1 %vm7188_vm10, %v7164_v20 }
 0x300   :  { %v355_v13 = vpop.f32.mrb[0].mxu1 }
 0x301   :  { %996 = vperm.xlu0 %4427, %v355_v13   ;;  %693 = vperm.xlu1 %4424, %v355_v13   ;;  %v4206_v14 = vpop.f32.mrb[1].mxu1 }
 0x302   :  { %v4974_v15 = vpop.f32.mrb[2].mxu1 }
 0x303   :  { %v4207_v16 = vpop.f32.mrb[3].mxu1 }
 0x305   :  { %4432 = vset.pattern.permute.xlu0 %v7172_v39  ;;  %4425 = vset.pattern.permute.xlu1 %v7174_v19 }
 0x306   :  { %804 = vperm.xlu1 %4425, %v355_v13   ;;  %698 = vperm.xlu0 %4432, %v4974_v15  }
 0x30a   :  { %4426 = vset.pattern.permute.xlu1 %v7176_v17  ;;  %4434 = vset.pattern.permute.xlu0 %v7176_v17 }
 0x30b   :  { %900 = vperm.xlu1 %4426, %v355_v13   ;;  %904 = vperm.xlu0 %4434, %v4974_v15  }
 0x30f   :  { %4428 = vset.pattern.permute.xlu1 %v7166_v18  ;;  %4436 = vset.pattern.permute.xlu0 %v7166_v18 }
 0x310   :  { %1092 = vperm.xlu1 %4428, %v355_v13   ;;  %1096 = vperm.xlu0 %4436, %v4974_v15  }
 0x314   :  { %4429 = vset.pattern.permute.xlu1 %v7178_v22  ;;  %4438 = vset.pattern.permute.xlu0 %v7170_v23 }
 0x315   :  { %v1712_v24 = vpop.permute.xlu0 %1711  ;;  %1188 = vperm.xlu1 %4429, %v355_v13   ;;  %1288 = vperm.xlu0 %4438, %v4974_v15   ;;  %v1759_v25 = vpop.permute.xlu1 %1758 }
 0x316   :  { %v1714_v36 = vsel %vm7187_vm9, %v1712_v24, 0  ;;  %v1761_v37 = vsel %vm7187_vm9, %v1759_v25, 0 }
 0x319   :  { %v1806_v26 = vpop.permute.xlu0 %1805  ;;  %4430 = vset.pattern.permute.xlu1 %v7170_v23  ;;  %4439 = vset.pattern.permute.xlu0 %v7182_v27 }
 0x31a   :  { %1284 = vperm.xlu1 %4430, %v355_v13   ;;  %1384 = vperm.xlu0 %4439, %v4974_v15   ;;  %v1808_v40 = vsel %vm7187_vm9, %v1806_v26, 0 }
 0x31d   :  { %v1524_v28 = vpop.permute.xlu0 %1523  ;;  %v1571_v29 = vpop.permute.xlu1 %1570 }
 0x31e   :  { %v1526_v30 = vsel %vm7187_vm9, %v1524_v28, 0  ;;  %v1573_v31 = vsel %vm7187_vm9, %v1571_v29, 0  ;;  %4431 = vset.pattern.permute.xlu1 %v7182_v27  ;;  %4440 = vset.pattern.permute.xlu0 %v7172_v39 }
 0x31f   :  { %4257 = vmatpush3.bf16.xpose.msra.mxu0 %v1526_v30  ;;  %4263 = vmatpush3.bf16.xpose.msra.mxu1 %v1573_v31 }
 0x320   :  { %1380 = vperm.xlu1 %4431, %v355_v13   ;;  %4268 = vmatprep.subr.bf16.mxu0 %v7164_v20 }
 0x321   :  { %4274 = vmatprep.subr.bf16.mxu1 %v7164_v20  ;;  %v1618_v32 = vpop.permute.xlu0 %1617 }
 0x322   :  { %v1620_v34 = vsel %vm7187_vm9, %v1618_v32, 0  ;;  %v3220_v41 = vpop.permute.xlu1 %3219 }
 0x324   :  { %4433 = vset.pattern.permute.xlu1 %v7174_v19 }
 0x325   :  { %808 = vperm.xlu1 %4433, %v4974_v15  }
 0x326   :  { %4259 = vmatmul.mubr.msk.bf16.vlgmr.msra.gmra.mrb[20].mxu0 %vm7187_vm9, %v4896_v56  ;;  %4265 = vmatmul.mubr.msk.bf16.vlgmr.msra.gmra.mrb[20].mxu1 %vm7187_vm9, %v4908_v62  ;;  %v5103_v13 = vpop.permute.xlu1 %3266 }
 0x327   :  { %4269 = vmatpush3.bf16.xpose.msra.mxu0 %v1620_v34  ;;  %4275 = vmatpush3.bf16.xpose.msra.mxu1 %v1667_v33  ;;  %7217 = vst [vmem:[#allocation10_spill] sm:$0xff] %v5103_v13  ;;  %v7231_v13 = vmov 0  }
 0x328   :  { %4270 = vmatprep.mubr.msk.bf16.mxu0 %vm7188_vm10, %v7164_v20  ;;  %4276 = vmatprep.mubr.msk.bf16.mxu1 %vm7188_vm10, %v7164_v20 }
 0x329   :  { %4435 = vset.pattern.permute.xlu1 %v7168_v38  ;;  %4280 = vmatprep.subr.bf16.mxu0 %v7164_v20 }
 0x32a   :  { %1000 = vperm.xlu1 %4435, %v4974_v15   ;;  %4286 = vmatprep.subr.bf16.mxu1 %v7164_v20  ;;  %v5111_v14 = vpop.permute.xlu1 %3313 }
 0x32b   :  { %7218 = vst [vmem:[#allocation11_spill] sm:$0xff] %v5111_v14 }
 0x32e   :  { %4437 = vset.pattern.permute.xlu1 %v7178_v22  ;;  %4271 = vmatmul.mubr.msk.bf16.vlgmr.msra.gmra.mrb[24].mxu0 %vm7187_vm9, %v4921_v4 }
 0x32f   :  { %4277 = vmatmul.mubr.msk.bf16.vlgmr.msra.gmra.mrb[24].mxu1 %vm7187_vm9, %v4866_v35  ;;  %1192 = vperm.xlu1 %4437, %v4974_v15  }
 0x330   :  { %4281 = vmatpush3.bf16.xpose.msra.mxu0 %v1714_v36  ;;  %4287 = vmatpush3.bf16.xpose.msra.mxu1 %v1761_v37 }
 0x331   :  { %4282 = vmatprep.mubr.msk.bf16.mxu0 %vm7188_vm10, %v7164_v20  ;;  %4288 = vmatprep.mubr.msk.bf16.mxu1 %vm7188_vm10, %v7164_v20 }
 0x332   :  { %4292 = vmatprep.subr.bf16.mxu0 %v7164_v20  ;;  %4298 = vmatprep.subr.bf16.mxu1 %v7164_v20 }
 0x333   :  { %4442 = vset.pattern.permute.xlu1 %v7176_v17 }
 0x337   :  { %4283 = vmatmul.mubr.msk.bf16.vlgmr.msra.gmra.mrb[28].mxu0 %vm7187_vm9, %v4885_v47  ;;  %4289 = vmatmul.mubr.msk.bf16.vlgmr.msra.gmra.mrb[28].mxu1 %vm7187_vm9, %v4883_v46  ;;  %v5302_v47 = vld [vmem:[%s7154_s1] sm:$0xff] }
 0x338   :  { %4293 = vmatpush3.bf16.xpose.msra.mxu0 %v1808_v40  ;;  %4299 = vmatpush3.bf16.msra.mxu1 %v3173_v21  ;;  %vm7197_vm11 = vcmp.eq.s32.totalorder %v5302_v47, 1  ;;  %vm7198_vm12 = vcmp.eq.s32.totalorder %v5302_v47, 0  ;;  %vm7196_vm13 = vcmp.eq.s32.totalorder %v5302_v47, 2  ;;  %vm7195_vm14 = vcmp.eq.s32.totalorder %v5302_v47, 3 }
 0x339   :  { %4294 = vmatprep.mubr.msk.bf16.mxu0 %vm7188_vm10, %v7164_v20  ;;  %4304 = vmatprep.subr.bf16.mxu0 %v7164_v20  ;;  %vm7194_vm15 = vcmp.eq.s32.totalorder %v5302_v47, 4  ;;  %vm7193_vm1 = vcmp.eq.s32.totalorder %v5302_v47, 5  ;;  %vm7192_vm3 = vcmp.eq.s32.totalorder %v5302_v47, 6  ;;  %vm7191_vm6 = vcmp.eq.s32.totalorder %v5302_v47, 7 }
 0x33a   :  { %4300 = vmatprep.mubr.msk.bf16.mxu1 %vm7188_vm10, %v7164_v20  ;;  %4310 = vmatprep.subr.bf16.mxu1 %v7164_v20 }
 0x33f   :  { %4295 = vmatmul.mubr.msk.bf16.vlgmr.msra.gmra.mrb[32].mxu0 %vm7187_vm9, %v4894_v55 }
 0x340   :  { %4305 = vmatpush3.bf16.msra.mxu0 %v3220_v41  ;;  %4306 = vmatprep.mubr.msk.bf16.mxu0 %vm7188_vm10, %v7164_v20 }
 0x341   :  { %4316 = vmatprep.subr.bf16.mxu0 %v7164_v20 }
 0x37a   :  { %v402_v42 = vpop.f32.mrb[4].mxu0 }
 0x37b   :  { %v4212_v43 = vpop.f32.mrb[5].mxu0  ;;  %908 = vperm.xlu1 %4442, %v402_v42   ;;  %703 = vperm.xlu0 %4440, %v402_v42  }
 0x37c   :  { %v5045_v44 = vpop.f32.mrb[6].mxu0 }
 0x37d   :  { %v4213_v45 = vpop.f32.mrb[7].mxu0 }
 0x37f   :  { %v449_v48 = vpop.f32.mrb[4].mxu1  ;;  %4443 = vset.pattern.permute.xlu1 %v7168_v38  ;;  %4441 = vset.pattern.permute.xlu0 %v7174_v19 }
 0x380   :  { %v4218_v49 = vpop.f32.mrb[5].mxu1  ;;  %1004 = vperm.xlu1 %4443, %v402_v42   ;;  %812 = vperm.xlu0 %4441, %v402_v42   ;;  %v5115_v15 = vpop.permute.xlu1 %693 }
 0x381   :  { %v5049_v50 = vpop.f32.mrb[6].mxu1  ;;  %v5171_v30 = vpop.permute.xlu0 %996 }
 0x382   :  { %v4219_v51 = vpop.f32.mrb[7].mxu1  ;;  %v5051_v52 = vpop.f32.mrb[8].mxu0 }
 0x383   :  { %v4224_v53 = vpop.f32.mrb[9].mxu0 }
 0x384   :  { %v5053_v54 = vpop.f32.mrb[10].mxu0  ;;  %4444 = vset.pattern.permute.xlu1 %v7166_v18  ;;  %4445 = vset.pattern.permute.xlu0 %v7172_v39 }
 0x385   :  { %v4225_v56 = vpop.f32.mrb[11].mxu0  ;;  %1100 = vperm.xlu1 %4444, %v402_v42   ;;  %713 = vperm.xlu0 %4445, %v449_v48   ;;  %v5123_v16 = vpop.permute.xlu1 %804 }
 0x386   :  { %v5179_v32 = vpop.permute.xlu0 %698 }
 0x387   :  { %v5057_v57 = vpop.f32.mrb[8].mxu1 }
 0x388   :  { %v4230_v58 = vpop.f32.mrb[9].mxu1 }
 0x389   :  { %v5059_v59 = vpop.f32.mrb[10].mxu1  ;;  %4446 = vset.pattern.permute.xlu1 %v7174_v19  ;;  %4448 = vset.pattern.permute.xlu0 %v7176_v17 }
 0x38a   :  { %v4231_v60 = vpop.f32.mrb[11].mxu1  ;;  %v5063_v61 = vpop.f32.mrb[12].mxu0  ;;  %820 = vperm.xlu1 %4446, %v449_v48   ;;  %916 = vperm.xlu0 %4448, %v449_v48  }
 0x38b   :  { %v4236_v62 = vpop.f32.mrb[13].mxu0  ;;  %v5131_v21 = vpop.permute.xlu1 %900 }
 0x38c   :  { %v5065_v63 = vpop.f32.mrb[14].mxu0  ;;  %v5193_v41 = vpop.permute.xlu0 %904 }
 0x38d   :  { %v4237_v0 = vpop.f32.mrb[15].mxu0 }
 0x38e   :  { %4447 = vset.pattern.permute.xlu1 %v7178_v22  ;;  %4449 = vset.pattern.permute.xlu0 %v7170_v23 }
 0x38f   :  { %v5069_v1 = vpop.f32.mrb[12].mxu1  ;;  %1196 = vperm.xlu1 %4447, %v402_v42   ;;  %1292 = vperm.xlu0 %4449, %v402_v42   ;;  %v5137_v24 = vpop.permute.xlu1 %1092 }
 0x390   :  { %v4242_v2 = vpop.f32.mrb[13].mxu1 }
 0x391   :  { %v5071_v3 = vpop.f32.mrb[14].mxu1 }
 0x392   :  { %v4243_v4 = vpop.f32.mrb[15].mxu1  ;;  %v5073_v5 = vpop.f32.mrb[16].mxu0 }
 0x393   :  { %v4248_v6 = vpop.f32.mrb[17].mxu0  ;;  %4454 = vset.pattern.permute.xlu1 %v7170_v23  ;;  %4450 = vset.pattern.permute.xlu0 %v7168_v38 }
 0x394   :  { %v5077_v7 = vpop.f32.mrb[18].mxu0  ;;  %1300 = vperm.xlu1 %4454, %v449_v48   ;;  %1012 = vperm.xlu0 %4450, %v449_v48   ;;  %v5143_v25 = vpop.permute.xlu1 %1188 }
 0x395   :  { %v4249_v8 = vpop.f32.mrb[19].mxu0 }
 0x397   :  { %v5079_v9 = vpop.f32.mrb[16].mxu1 }
 0x398   :  { %v4254_v10 = vpop.f32.mrb[17].mxu1  ;;  %4455 = vset.pattern.permute.xlu1 %v7182_v27  ;;  %4451 = vset.pattern.permute.xlu0 %v7182_v27 }
 0x399   :  { %v5083_v11 = vpop.f32.mrb[18].mxu1  ;;  %1396 = vperm.xlu1 %4455, %v449_v48   ;;  %1388 = vperm.xlu0 %4451, %v402_v42   ;;  %v5149_v26 = vpop.permute.xlu1 %1284 }
 0x39a   :  { %7216 = vst [vmem:[#allocation9_spill] sm:$0xff] %v5083_v11  ;;  %v4255_v12 = vpop.f32.mrb[19].mxu1 }
 0x39d   :  { %4456 = vset.pattern.permute.xlu1 %v7172_v39  ;;  %4452 = vset.pattern.permute.xlu0 %v7166_v18 }
 0x39e   :  { %708 = vperm.xlu1 %4456, %v5045_v44   ;;  %1108 = vperm.xlu0 %4452, %v449_v48  }
 0x39f   :  { %v5157_v28 = vpop.permute.xlu1 %1380 }
 0x3a2   :  { %4457 = vset.pattern.permute.xlu1 %v7174_v19  ;;  %4453 = vset.pattern.permute.xlu0 %v7178_v22 }
 0x3a3   :  { %816 = vperm.xlu1 %4457, %v5045_v44   ;;  %1204 = vperm.xlu0 %4453, %v449_v48  }
 0x3a4   :  { %v5165_v29 = vpop.permute.xlu1 %808 }
 0x3a7   :  { %4458 = vset.pattern.permute.xlu1 %v7176_v17  ;;  %4459 = vset.pattern.permute.xlu0 %v7168_v38 }
 0x3a8   :  { %912 = vperm.xlu1 %4458, %v5045_v44   ;;  %1008 = vperm.xlu0 %4459, %v5045_v44  }
 0x3a9   :  { %v5173_v31 = vpop.permute.xlu1 %1000 }
 0x3ac   :  { %4460 = vset.pattern.permute.xlu1 %v7166_v18  ;;  %4462 = vset.pattern.permute.xlu0 %v7174_v19 }
 0x3ad   :  { %1104 = vperm.xlu1 %4460, %v5045_v44   ;;  %824 = vperm.xlu0 %4462, %v5049_v50  }
 0x3ae   :  { %v5181_v33 = vpop.permute.xlu1 %1192 }
 0x3b1   :  { %4461 = vset.pattern.permute.xlu1 %v7172_v39  ;;  %4472 = vset.pattern.permute.xlu0 %v7172_v39 }
 0x3b2   :  { %723 = vperm.xlu0 %4472, %v5051_v52   ;;  %718 = vperm.xlu1 %4461, %v5049_v50  }
 0x3b6   :  { %4479 = vset.pattern.permute.xlu0 %v7178_v22  ;;  %4463 = vset.pattern.permute.xlu1 %v7178_v22 }
 0x3b7   :  { %1212 = vperm.xlu0 %4479, %v5051_v52   ;;  %1200 = vperm.xlu1 %4463, %v5045_v44  }
 0x3bb   :  { %4481 = vset.pattern.permute.xlu0 %v7170_v23  ;;  %4464 = vset.pattern.permute.xlu1 %v7176_v17 }
 0x3bc   :  { %1308 = vperm.xlu0 %4481, %v5051_v52   ;;  %920 = vperm.xlu1 %4464, %v5049_v50  }
 0x3c0   :  { %4483 = vset.pattern.permute.xlu0 %v7182_v27  ;;  %4465 = vset.pattern.permute.xlu1 %v7170_v23 }
 0x3c1   :  { %1404 = vperm.xlu0 %4483, %v5051_v52   ;;  %1296 = vperm.xlu1 %4465, %v5045_v44  }
 0x3c5   :  { %4489 = vset.pattern.permute.xlu0 %v7174_v19  ;;  %4466 = vset.pattern.permute.xlu1 %v7168_v38 }
 0x3c6   :  { %832 = vperm.xlu0 %4489, %v5053_v54   ;;  %1016 = vperm.xlu1 %4466, %v5049_v50  }
 0x3ca   :  { %4492 = vset.pattern.permute.xlu0 %v7166_v18  ;;  %4467 = vset.pattern.permute.xlu1 %v7182_v27 }
 0x3cb   :  { %1120 = vperm.xlu0 %4492, %v5053_v54   ;;  %1392 = vperm.xlu1 %4467, %v5045_v44  }
 0x3cf   :  { %4493 = vset.pattern.permute.xlu0 %v7172_v39  ;;  %4468 = vset.pattern.permute.xlu1 %v7166_v18 }
 0x3d0   :  { %1112 = vperm.xlu1 %4468, %v5049_v50   ;;  %738 = vperm.xlu0 %4493, %v5059_v59  }
 0x3d4   :  { %4469 = vset.pattern.permute.xlu1 %v7178_v22  ;;  %4496 = vset.pattern.permute.xlu0 %v7176_v17 }
 0x3d5   :  { %1208 = vperm.xlu1 %4469, %v5049_v50   ;;  %936 = vperm.xlu0 %4496, %v5059_v59  }
 0x3d9   :  { %4470 = vset.pattern.permute.xlu1 %v7170_v23  ;;  %4498 = vset.pattern.permute.xlu0 %v7168_v38 }
 0x3da   :  { %1304 = vperm.xlu1 %4470, %v5049_v50   ;;  %1032 = vperm.xlu0 %4498, %v5059_v59  }
 0x3de   :  { %4471 = vset.pattern.permute.xlu1 %v7182_v27  ;;  %4500 = vset.pattern.permute.xlu0 %v7166_v18 }
 0x3df   :  { %1400 = vperm.xlu1 %4471, %v5049_v50   ;;  %1128 = vperm.xlu0 %4500, %v5059_v59   ;;  %v5205_v50 = vpop.permute.xlu0 %1096 }
 0x3e3   :  { %4473 = vset.pattern.permute.xlu1 %v7174_v19  ;;  %4502 = vset.pattern.permute.xlu0 %v7170_v23  ;;  %v5225_v4 = vpop.permute.xlu0 %1288 }
 0x3e4   :  { %828 = vperm.xlu1 %4473, %v5051_v52   ;;  %1320 = vperm.xlu0 %4502, %v5059_v59   ;;  %7222 = vst [vmem:[#allocation15_spill] sm:$0xff] %v5225_v4 }
 0x3e8   :  { %4474 = vset.pattern.permute.xlu1 %v7176_v17  ;;  %4503 = vset.pattern.permute.xlu0 %v7182_v27 }
 0x3e9   :  { %924 = vperm.xlu1 %4474, %v5051_v52   ;;  %1416 = vperm.xlu0 %4503, %v5059_v59  }
 0x3ed   :  { %4475 = vset.pattern.permute.xlu1 %v7168_v38  ;;  %4506 = vset.pattern.permute.xlu0 %v7176_v17 }
 0x3ee   :  { %1020 = vperm.xlu1 %4475, %v5051_v52   ;;  %940 = vperm.xlu0 %4506, %v5063_v61  }
 0x3f2   :  { %4476 = vset.pattern.permute.xlu1 %v7166_v18  ;;  %4507 = vset.pattern.permute.xlu0 %v7168_v38 }
 0x3f3   :  { %1116 = vperm.xlu1 %4476, %v5051_v52   ;;  %1036 = vperm.xlu0 %4507, %v5063_v61  }
 0x3f7   :  { %4477 = vset.pattern.permute.xlu1 %v7172_v39  ;;  %4509 = vset.pattern.permute.xlu0 %v7172_v39 }
 0x3f8   :  { %733 = vperm.xlu1 %4477, %v5057_v57   ;;  %753 = vperm.xlu0 %4509, %v5069_v1  }
 0x3f9   :  { %v5187_v34 = vpop.f32.mrb[20].mxu0  ;;  %v5189_v36 = vpop.f32.mrb[20].mxu1 }
 0x3fa   :  { %v4260_v37 = vpop.f32.mrb[21].mxu0  ;;  %v5191_v40 = vpop.permute.xlu1 %908 }
 0x3fb   :  { %v4266_v42 = vpop.f32.mrb[21].mxu1  ;;  %v5195_v43 = vpop.f32.mrb[22].mxu0 }
 0x3fc   :  { %v5197_v44 = vpop.f32.mrb[22].mxu1  ;;  %4478 = vset.pattern.permute.xlu1 %v7174_v19  ;;  %4512 = vset.pattern.permute.xlu0 %v7176_v17  ;;  %v4261_v45 = vpop.f32.mrb[23].mxu0 }
 0x3fd   :  { %7219 = vst [vmem:[#allocation12_spill] sm:$0xff] %v5197_v44  ;;  %v4267_v48 = vpop.f32.mrb[23].mxu1  ;;  %836 = vperm.xlu1 %4478, %v5057_v57   ;;  %948 = vperm.xlu0 %4512, %v5069_v1   ;;  %v963_v44 = vsel %vm7196_vm13, %v5131_v21, 0.0 }
 0x3ff   :  { %v5203_v49 = vpop.permute.xlu1 %1004 }
 0x401   :  { %v5207_v51 = vpop.f32.mrb[24].mxu0  ;;  %4480 = vset.pattern.permute.xlu1 %v7176_v17  ;;  %4513 = vset.pattern.permute.xlu0 %v7170_v23 }
 0x402   :  { %v5211_v52 = vpop.f32.mrb[24].mxu1  ;;  %v4272_v53 = vpop.f32.mrb[25].mxu0  ;;  %932 = vperm.xlu1 %4480, %v5057_v57   ;;  %1324 = vperm.xlu0 %4513, %v5063_v61  }
 0x403   :  { %v4278_v56 = vpop.f32.mrb[25].mxu1  ;;  %v5215_v58 = vpop.f32.mrb[26].mxu0 }
 0x404   :  { %7220 = vst [vmem:[#allocation13_spill] sm:$0xff] %v5215_v58  ;;  %v5217_v60 = vpop.f32.mrb[26].mxu1  ;;  %v4273_v62 = vpop.f32.mrb[27].mxu0  ;;  %v771_v58 = vsel %vm7198_vm12, %v5115_v15, 0.0  ;;  %v5344_v15 = vld [vmem:[%s7154_s1 + $0x8] sm:$0xff] }
 0x405   :  { %7221 = vst [vmem:[#allocation14_spill] sm:$0xff] %v5217_v60  ;;  %v5219_v0 = vpop.permute.xlu1 %1100  ;;  %v4279_v2 = vpop.f32.mrb[27].mxu1  ;;  %vm7209_vm2 = vcmp.eq.s32.totalorder %v5344_v15, 0  ;;  %vm7203_vm4 = vcmp.eq.s32.totalorder %v5344_v15, 2  ;;  %vm7205_vm5 = vcmp.eq.s32.totalorder %v5344_v15, 1  ;;  %vm7204_vm7 = vcmp.eq.s32.totalorder %v5344_v15, 3 }
 0x406   :  { %4482 = vset.pattern.permute.xlu1 %v7168_v38  ;;  %4514 = vset.pattern.permute.xlu0 %v7168_v38  ;;  %v5243_v62 = vpop.permute.xlu0 %1384  ;;  %vm7206_vm8 = vcmp.eq.s32.totalorder %v5344_v15, 4  ;;  %vm7208_vm0 = vcmp.eq.s32.totalorder %v5344_v15, 5  ;;  %vm7190_vm9 = vcmp.eq.s32.totalorder %v5344_v15, 6  ;;  %vm7207_vm10 = vcmp.eq.s32.totalorder %v5344_v15, 7 }
 0x407   :  { %1028 = vperm.xlu1 %4482, %v5057_v57   ;;  %1044 = vperm.xlu0 %4514, %v5069_v1   ;;  %7226 = vst [vmem:[#allocation19_spill] sm:$0xff] %v5243_v62 }
 0x409   :  { %v5227_v6 = vpop.permute.xlu1 %820 }
 0x40a   :  { %v5229_v8 = vpop.f32.mrb[28].mxu0  ;;  %v5231_v10 = vpop.f32.mrb[28].mxu1 }
 0x40b   :  { %7223 = vst [vmem:[#allocation16_spill] sm:$0xff] %v5231_v10  ;;  %v4284_v12 = vpop.f32.mrb[29].mxu0  ;;  %v4290_v37 = vpop.f32.mrb[29].mxu1  ;;  %4484 = vset.pattern.permute.xlu1 %v7166_v18  ;;  %4515 = vset.pattern.permute.xlu0 %v7182_v27 }
 0x40c   :  { %v5235_v42 = vpop.f32.mrb[30].mxu0  ;;  %v5237_v45 = vpop.f32.mrb[30].mxu1  ;;  %1124 = vperm.xlu1 %4484, %v5057_v57   ;;  %1420 = vperm.xlu0 %4515, %v5063_v61  }
 0x40d   :  { %7224 = vst [vmem:[#allocation17_spill] sm:$0xff] %v5235_v42  ;;  %7225 = vst [vmem:[#allocation18_spill] sm:$0xff] %v5237_v45  ;;  %v4285_v48 = vpop.f32.mrb[31].mxu0  ;;  %v4291_v53 = vpop.f32.mrb[31].mxu1  ;;  %v7235_v45 = vmov 4   ;;  %v867_v42 = vsel %vm7197_vm11, %v5123_v16, 0.0 }
 0x40e   :  { %v5241_v56 = vpop.permute.xlu1 %1196  ;;  %v704_v20 = vpop.permute.xlu0 %703  ;;  %v883_v16 = vadd.f32 %v867_v42, %v771_v58 }
 0x40f   :  { %v773_v11 = vsel %vm7198_vm12, %v704_v20, 0.0  ;;  %v965_v20 = vsel %vm7196_vm13, %v5191_v40, 0.0 }
 0x410   :  { %4485 = vset.pattern.permute.xlu1 %v7178_v22  ;;  %4516 = vset.pattern.permute.xlu0 %v7166_v18 }
 0x411   :  { %1220 = vperm.xlu1 %4485, %v5057_v57   ;;  %1140 = vperm.xlu0 %4516, %v5069_v1  }
 0x412   :  { %v5249_v2 = vpop.f32.mrb[32].mxu0  ;;  %v813_v38 = vpop.permute.xlu0 %812 }
 0x413   :  { %7227 = vst [vmem:[#allocation20_spill] sm:$0xff] %v5249_v2  ;;  %v4296_v12 = vpop.f32.mrb[33].mxu0  ;;  %v5251_v37 = vpop.permute.xlu1 %1300  ;;  %v7234_v2 = vmov 6   ;;  %v869_v60 = vsel %vm7197_vm11, %v813_v38, 0.0  ;;  %v7236_v38 = vmov 7  }
 0x414   :  { %v5253_v48 = vpop.f32.mrb[34].mxu0  ;;  %v885_v10 = vadd.f32 %v869_v60, %v773_v11  ;;  %v871_v11 = vsel %vm7197_vm11, %v5227_v6, 0.0  ;;  %v1155_v6 = vsel %vm7194_vm15, %v5137_v24, 0.0  ;;  %v1157_v24 = vsel %vm7194_vm15, %v5219_v0, 0.0 }
 0x415   :  { %7228 = vst [vmem:[#allocation21_spill] sm:$0xff] %v5253_v48  ;;  %v4297_v53 = vpop.f32.mrb[35].mxu0  ;;  %4486 = vset.pattern.permute.xlu1 %v7170_v23  ;;  %4517 = vset.pattern.permute.xlu0 %v7170_v23 }
 0x416   :  { %1316 = vperm.xlu1 %4486, %v5057_v57   ;;  %1332 = vperm.xlu0 %4517, %v5069_v1   ;;  %v714_v53 = vpop.permute.xlu0 %713  ;;  %v981_v21 = vadd.f32 %v965_v20, %v885_v10  ;;  %v1347_v20 = vsel %vm7192_vm3, %v5149_v26, 0.0 }
 0x417   :  { %v775_v40 = vsel %vm7198_vm12, %v714_v53, 0.0 }
 0x418   :  { %v5259_v18 = vpop.permute.xlu1 %1396  ;;  %v887_v60 = vadd.f32 %v871_v11, %v775_v40 }
 0x41a   :  { %4487 = vset.pattern.permute.xlu1 %v7182_v27  ;;  %4519 = vset.pattern.permute.xlu0 %v7172_v39 }
 0x41b   :  { %1412 = vperm.xlu1 %4487, %v5057_v57   ;;  %748 = vperm.xlu0 %4519, %v5065_v63   ;;  %v5277_v57 = vpop.permute.xlu0 %916 }
 0x41d   :  { %v5265_v12 = vpop.permute.xlu1 %708 }
 0x41f   :  { %4488 = vset.pattern.permute.xlu1 %v7172_v39  ;;  %4525 = vset.pattern.permute.xlu0 %v7174_v19  ;;  %v7229_v19 = vmov 3   ;;  %v5285_v14 = vpop.permute.xlu0 %1292 }
 0x420   :  { %728 = vperm.xlu1 %4488, %v5053_v54   ;;  %856 = vperm.xlu0 %4525, %v5071_v3  }
 0x422   :  { %v5271_v23 = vpop.permute.xlu1 %816 }
 0x423   :  { %v1013_v46 = vpop.permute.xlu0 %1012  ;;  %v870_v53 = vsel %vm7205_vm5, %v5271_v23, 0.0 }
 0x424   :  { %4490 = vset.pattern.permute.xlu1 %v7176_v17  ;;  %4532 = vset.pattern.permute.xlu0 %v7178_v22  ;;  %v7230_v22 = vmov 1  }
 0x425   :  { %928 = vperm.xlu1 %4490, %v5053_v54   ;;  %1240 = vperm.xlu0 %4532, %v5071_v3  }
 0x427   :  { %v5279_v39 = vpop.permute.xlu1 %912  ;;  %v5309_v48 = vpop.permute.xlu0 %1388 }
 0x428   :  { %v966_v11 = vsel %vm7203_vm4, %v5279_v39, 0.0 }
 0x429   :  { %4491 = vset.pattern.permute.xlu1 %v7229_v19  ;;  %4534 = vset.pattern.permute.xlu0 %v7182_v27  ;;  %v7233_v27 = vmov 5  }
 0x42a   :  { %1024 = vperm.xlu1 %4491, %v5053_v54   ;;  %1432 = vperm.xlu0 %4534, %v5071_v3  }
 0x42b   :  { %v1109_v4 = vpop.permute.xlu0 %1108 }
 0x42c   :  { %v5287_v17 = vpop.permute.xlu1 %1104  ;;  %v1159_v23 = vsel %vm7194_vm15, %v1109_v4, 0.0 }
 0x42e   :  { %4494 = vset.pattern.permute.xlu1 %v7230_v22  ;;  %4535 = vset.pattern.permute.xlu0 %v7231_v13 }
 0x42f   :  { %840 = vperm.xlu1 %4494, %v5059_v59   ;;  %763 = vperm.xlu0 %4535, %v5073_v5   ;;  %v1205_v42 = vpop.permute.xlu0 %1204 }
 0x431   :  { %v5293_v55 = vpop.permute.xlu1 %718 }
 0x432   :  { %7232 = vst [vmem:[#allocation22_spill] sm:$0xff] %v5293_v55  ;;  %v979_v55 = vadd.f32 %v963_v44, %v883_v16 }
 0x433   :  { %4495 = vset.pattern.permute.xlu1 %v7233_v27  ;;  %4544 = vset.pattern.permute.xlu0 %v7230_v22  ;;  %v1009_v39 = vpop.permute.xlu0 %1008 }
 0x434   :  { %1216 = vperm.xlu1 %4495, %v5053_v54   ;;  %864 = vperm.xlu0 %4544, %v5077_v7  }
 0x436   :  { %v5305_v35 = vpop.permute.xlu1 %1200 }
 0x438   :  { %4497 = vset.pattern.permute.xlu1 %v7234_v2  ;;  %4547 = vset.pattern.permute.xlu0 %v7235_v45 }
 0x439   :  { %1312 = vperm.xlu1 %4497, %v5053_v54   ;;  %1152 = vperm.xlu0 %4547, %v5077_v7  }
 0x43b   :  { %v5328_v62 = vpop.permute.xlu1 %920 }
 0x43d   :  { %4499 = vset.pattern.permute.xlu1 %v7236_v38  ;;  %4549 = vset.pattern.permute.xlu0 %v7234_v2 }
 0x43e   :  { %1408 = vperm.xlu1 %4499, %v5053_v54   ;;  %1344 = vperm.xlu0 %4549, %v5077_v7   ;;  %v1059_v54 = vsel %vm7195_vm14, %v5171_v30, 0.0  ;;  %v1061_v30 = vsel %vm7195_vm14, %v5203_v49, 0.0  ;;  %v967_v49 = vsel %vm7196_vm13, %v5277_v57, 0.0  ;;  %v1253_v57 = vsel %vm7193_vm1, %v5241_v56, 0.0 }
 0x43f   :  { %v1075_v58 = vadd.f32 %v1059_v54, %v979_v55  ;;  %v1251_v55 = vsel %vm7193_vm1, %v5143_v25, 0.0  ;;  %v1077_v10 = vadd.f32 %v1061_v30, %v981_v21  ;;  %v983_v0 = vadd.f32 %v967_v49, %v887_v60 }
 0x440   :  { %v5347_v44 = vpop.permute.xlu1 %1296  ;;  %v1443_v56 = vsel %vm7191_vm6, %v5157_v28, 0.0  ;;  %v1445_v28 = vsel %vm7191_vm6, %v5309_v48, 0.0 }
 0x441   :  { %v1171_v16 = vadd.f32 %v1155_v6, %v1075_v58  ;;  %v1173_v21 = vadd.f32 %v1157_v24, %v1077_v10  ;;  %v1349_v10 = vsel %vm7192_vm3, %v5285_v14, 0.0  ;;  %v1158_v14 = vsel %vm7206_vm8, %v5287_v17, 0.0 }
 0x442   :  { %4501 = vset.pattern.permute.xlu1 %v7233_v27  ;;  %4581 = vset.pattern.permute.xlu0 %v7236_v38  ;;  %v1447_v17 = vsel %vm7191_vm6, %v5259_v18, 0.0 }
 0x443   :  { %1224 = vperm.xlu1 %4501, %v5059_v59   ;;  %v1063_v59 = vsel %vm7195_vm14, %v1013_v46, 0.0  ;;  %v774_v46 = vsel %vm7209_vm2, %v5265_v12, 0.0  ;;  %v1267_v26 = vadd.f32 %v1251_v55, %v1171_v16  ;;  %v1255_v12 = vsel %vm7193_vm1, %v1205_v42, 0.0 }
 0x444   :  { %v1079_v54 = vadd.f32 %v1063_v59, %v983_v0  ;;  %v886_v40 = vadd.f32 %v870_v53, %v774_v46  ;;  %v1269_v58 = vadd.f32 %v1253_v57, %v1173_v21  ;;  %v1062_v42 = vsel %vm7204_vm7, %v1009_v39, 0.0 }
 0x445   :  { %v5382_v25 = vpop.permute.xlu1 %1016  ;;  %v1363_v4 = vadd.f32 %v1347_v20, %v1267_v26  ;;  %v1351_v53 = vsel %vm7192_vm3, %v5251_v37, 0.0  ;;  %v1254_v57 = vsel %vm7208_vm0, %v5305_v35, 0.0 }
 0x446   :  { %v1175_v60 = vadd.f32 %v1159_v23, %v1079_v54  ;;  %v982_v6 = vadd.f32 %v966_v11, %v886_v40  ;;  %v1365_v24 = vadd.f32 %v1349_v10, %v1269_v58  ;;  %v1867_v54 = vld [vmem:[%s7155_s2] sm:$0xff]  ;;  %v1870_v10 = vld [vmem:[%s7155_s2 + $0x18] sm:$0xff] }
 0x447   :  { %4504 = vset.pattern.permute.xlu1 %v7231_v13  ;;  %v1459_v49 = vadd.f32 %v1443_v56, %v1363_v4  ;;  %v1869_v4 = vld [vmem:[%s7155_s2 + $0x10] sm:$0xff] }
 0x448   :  { %743 = vperm.xlu1 %4504, %v5063_v61   ;;  %v1271_v55 = vadd.f32 %v1255_v12, %v1175_v60  ;;  %v1078_v59 = vadd.f32 %v1062_v42, %v982_v6  ;;  %v1461_v20 = vadd.f32 %v1445_v28, %v1365_v24 }
 0x449   :  { %v1516_v48 = vadd.f32 %v5079_v9, %v1459_v49  ;;  %v1350_v9 = vsel %vm7190_vm9, %v5347_v44, 0.0  ;;  %vm1899_vm9 = vcmask 130048  }
 0x44a   :  { %v1393_v30 = vpop.permute.xlu1 %1392  ;;  %v1367_v0 = vadd.f32 %v1351_v53, %v1271_v55  ;;  %v1174_v37 = vadd.f32 %v1158_v14, %v1078_v59  ;;  %v1563_v35 = vadd.f32 %v5187_v34, %v1461_v20 }
 0x44b   :  { %v1851_v46 = vmul.f32 0.35355338, %v1516_v48  ;;  %v1446_v21 = vsel %vm7207_vm10, %v1393_v30, 0.0  ;;  %v5469_v30 = vpop.permute.xlu0 %824 }
 0x44c   :  { %4505 = vset.pattern.permute.xlu1 %v7230_v22  ;;  %v1463_v23 = vadd.f32 %v1447_v17, %v1367_v0  ;;  %v1270_v11 = vadd.f32 %v1254_v57, %v1174_v37  ;;  %v1853_v18 = vmul.f32 0.35355338, %v1563_v35  ;;  %v7237_v17 = vmov 2  }
 0x44d   :  { %844 = vperm.xlu1 %4505, %v5063_v61   ;;  %v5451_v56 = vadd.f32 %v1867_v54, %v1851_v46 }
 0x44e   :  { %v1366_v40 = vadd.f32 %v1350_v9, %v1270_v11  ;;  %v1610_v34 = vadd.f32 %v5189_v36, %v1463_v23  ;;  %v5464_v6 = vadd.f32 %v1869_v4, %v1853_v18  ;;  %v1871_v36 = vld [vmem:[%s7155_s2 + $0x20] sm:$0xff] }
 0x44f   :  { %v5424_v16 = vpop.permute.xlu1 %1112  ;;  %v1900_v60 = vsel %vm1899_vm9, %v5451_v56, -inf  ;;  %v724_v42 = vpop.permute.xlu0 %723 }
 0x450   :  { %v1462_v44 = vadd.f32 %v1446_v21, %v1366_v40  ;;  %v1855_v39 = vmul.f32 0.35355338, %v1610_v34  ;;  %v777_v0 = vsel %vm7198_vm12, %v724_v42, 0.0 }
 0x451   :  { %4508 = vset.pattern.permute.xlu1 %v7235_v45 }
 0x452   :  { %1132 = vperm.xlu1 %4508, %v5063_v61   ;;  %v1566_v58 = vadd.f32 %v5195_v43, %v1462_v44  ;;  %v5476_v43 = vadd.f32 %v1871_v36, %v1855_v39 }
 0x453   :  { %v1213_v48 = vpop.permute.xlu0 %1212 }
 0x454   :  { %v5442_v26 = vpop.permute.xlu1 %1208  ;;  %v1854_v55 = vmul.f32 0.35355338, %v1566_v58  ;;  %v1912_v24 = vsel %vm1899_vm9, %v5476_v43, -inf  ;;  %v1257_v40 = vsel %vm7193_vm1, %v1213_v48, 0.0  ;;  %v5534_v48 = vld [vmem:[%s7154_s1 + $0x10] sm:$0xff] }
 0x455   :  { %vm7210_vm1 = vcmp.eq.s32.totalorder %v5534_v48, 2  ;;  %vm7202_vm12 = vcmp.eq.s32.totalorder %v5534_v48, 7 }
 0x456   :  { %4510 = vset.pattern.permute.xlu1 %v7230_v22  ;;  %v5484_v59 = vadd.f32 %v1870_v10, %v1854_v55 }
 0x457   :  { %852 = vperm.xlu1 %4510, %v5069_v1   ;;  %v1309_v46 = vpop.permute.xlu0 %1308 }
 0x458   :  { %v1909_v14 = vsel %vm1899_vm9, %v5484_v59, -inf  ;;  %v1353_v34 = vsel %vm7192_vm3, %v1309_v46, 0.0  ;;  %vm276_vm3 = vcmp.eq.s32.totalorder %v5534_v48, 0 }
 0x459   :  { %v5454_v12 = vpop.permute.xlu1 %1304 }
 0x45b   :  { %4511 = vset.pattern.permute.xlu1 %v7233_v27  ;;  %v1405_v18 = vpop.permute.xlu0 %1404 }
 0x45c   :  { %1228 = vperm.xlu1 %4511, %v5063_v61   ;;  %v1906_v61 = vsel %vm1899_vm9, %v5464_v6, -inf }
 0x45d   :  { %1901 = vmax.xlane.f32.xlu0 %v1900_v60  ;;  %v1449_v60 = vsel %vm7191_vm6, %v1405_v18, 0.0  ;;  %vm280_vm6 = vcmp.eq.s32.totalorder %v5534_v48, 1 }
 0x45e   :  { %v5471_v49 = vpop.permute.xlu1 %1400 }
 0x460   :  { %1236 = vperm.xlu1 %4511, %v5069_v1  }
 0x461   :  { %1907 = vmax.xlane.f32.xlu0 %v1906_v61  ;;  %v1873_v61 = vld [vmem:[%s7155_s2 + $0x30] sm:$0xff] }
 0x463   :  { %v829_v28 = vpop.permute.xlu1 %828 }
 0x464   :  { %4518 = vset.pattern.permute.xlu1 %v7236_v38  ;;  %v873_v20 = vsel %vm7197_vm11, %v829_v28, 0.0  ;;  %v5519_v28 = vpop.permute.xlu0 %832  ;;  %vm300_vm11 = vcmp.eq.s32.totalorder %v5534_v48, 6 }
 0x465   :  { %1428 = vperm.xlu1 %4518, %v5069_v1   ;;  %1913 = vmax.xlane.f32.xlu0 %v1912_v24  ;;  %v889_v37 = vadd.f32 %v873_v20, %v777_v0 }
 0x468   :  { %v925_v53 = vpop.permute.xlu1 %924 }
 0x469   :  { %4520 = vset.pattern.permute.xlu1 %v7230_v22  ;;  %1910 = vmax.xlane.f32.xlu0 %v1909_v14  ;;  %v969_v1 = vsel %vm7196_vm13, %v925_v53, 0.0  ;;  %vm7201_vm13 = vcmp.eq.s32.totalorder %v5534_v48, 5 }
 0x46a   :  { %848 = vperm.xlu1 %4520, %v5065_v63   ;;  %v985_v35 = vadd.f32 %v969_v1, %v889_v37 }
 0x46d   :  { %v1021_v57 = vpop.permute.xlu1 %1020 }
 0x46e   :  { %4521 = vset.pattern.permute.xlu1 %v7237_v17  ;;  %v1065_v9 = vsel %vm7195_vm14, %v1021_v57, 0.0  ;;  %vm7199_vm14 = vcmp.eq.s32.totalorder %v5534_v48, 4 }
 0x46f   :  { %944 = vperm.xlu1 %4521, %v5065_v63   ;;  %v1081_v23 = vadd.f32 %v1065_v9, %v985_v35 }
 0x472   :  { %v1117_v11 = vpop.permute.xlu1 %1116 }
 0x473   :  { %v1161_v21 = vsel %vm7194_vm15, %v1117_v11, 0.0  ;;  %4522 = vset.pattern.permute.xlu1 %v7229_v19  ;;  %vm7200_vm15 = vcmp.eq.s32.totalorder %v5534_v48, 3 }
 0x474   :  { %v1177_v54 = vadd.f32 %v1161_v21, %v1081_v23  ;;  %1040 = vperm.xlu1 %4522, %v5065_v63  }
 0x476   :  { %v1273_v44 = vadd.f32 %v1257_v40, %v1177_v54 }
 0x477   :  { %v734_v4 = vpop.permute.xlu1 %733 }
 0x478   :  { %v1369_v58 = vadd.f32 %v1353_v34, %v1273_v44  ;;  %4523 = vset.pattern.permute.xlu1 %v7235_v45  ;;  %v779_v57 = vsel %vm276_vm3, %v734_v4, 0.0 }
 0x479   :  { %1136 = vperm.xlu1 %4523, %v5065_v63  }
 0x47a   :  { %v1465_v39 = vadd.f32 %v1449_v60, %v1369_v58 }
 0x47c   :  { %v837_v36 = vpop.permute.xlu1 %836  ;;  %v1657_v55 = vadd.f32 %v5207_v51, %v1465_v39  ;;  %v5527_v51 = vpop.permute.xlu0 %1120 }
 0x47d   :  { %4524 = vset.pattern.permute.xlu1 %v7231_v13  ;;  %v875_v1 = vsel %vm280_vm6, %v837_v36, 0.0 }
 0x47e   :  { %758 = vperm.xlu1 %4524, %v5071_v3   ;;  %v1857_v10 = vmul.f32 0.35355338, %v1657_v55  ;;  %v891_v9 = vadd.f32 %v875_v1, %v779_v57 }
 0x480   :  { %v5521_v42 = vadd.f32 %v1873_v61, %v1857_v10  ;;  %v5537_v20 = vpop.permute.xlu0 %738 }
 0x481   :  { %v933_v24 = vpop.permute.xlu1 %932 }
 0x482   :  { %4526 = vset.pattern.permute.xlu1 %v7233_v27  ;;  %v1918_v53 = vsel %vm1899_vm9, %v5521_v42, -inf  ;;  %v971_v37 = vsel %vm7210_vm1, %v933_v24, 0.0 }
 0x483   :  { %1232 = vperm.xlu1 %4526, %v5065_v63   ;;  %1919 = vmax.xlane.f32.xlu0 %v1918_v53  ;;  %v987_v11 = vadd.f32 %v971_v37, %v891_v9 }
 0x484   :  { %v5551_v35 = vpop.permute.xlu0 %936 }
 0x486   :  { %v1029_v14 = vpop.permute.xlu1 %1028 }
 0x487   :  { %4527 = vset.pattern.permute.xlu1 %v7237_v17  ;;  %v1067_v23 = vsel %vm7200_vm15, %v1029_v14, 0.0 }
 0x488   :  { %952 = vperm.xlu1 %4527, %v5071_v3   ;;  %v1083_v54 = vadd.f32 %v1067_v23, %v987_v11  ;;  %v5564_v34 = vpop.permute.xlu0 %1032 }
 0x48b   :  { %v1125_v0 = vpop.permute.xlu1 %1124 }
 0x48c   :  { %4528 = vset.pattern.permute.xlu1 %v7234_v2  ;;  %v1163_v21 = vsel %vm7199_vm14, %v1125_v0, 0.0  ;;  %v5574_v61 = vpop.permute.xlu0 %1128 }
 0x48d   :  { %1328 = vperm.xlu1 %4528, %v5065_v63   ;;  %v1179_v44 = vadd.f32 %v1163_v21, %v1083_v54 }
 0x490   :  { %v1221_v46 = vpop.permute.xlu1 %1220  ;;  %v5586_v0 = vpop.permute.xlu0 %1320 }
 0x491   :  { %4529 = vset.pattern.permute.xlu1 %v7229_v19  ;;  %v1259_v40 = vsel %vm7201_vm13, %v1221_v46, 0.0 }
 0x492   :  { %1048 = vperm.xlu1 %4529, %v5071_v3   ;;  %v1275_v58 = vadd.f32 %v1259_v40, %v1179_v44 }
 0x494   :  { %v5594_v57 = vpop.permute.xlu0 %1416 }
 0x495   :  { %v1317_v18 = vpop.permute.xlu1 %1316 }
 0x496   :  { %4530 = vset.pattern.permute.xlu1 %v7236_v38  ;;  %v1355_v4 = vsel %vm300_vm11, %v1317_v18, 0.0 }
 0x497   :  { %1424 = vperm.xlu1 %4530, %v5065_v63   ;;  %v1371_v60 = vadd.f32 %v1355_v4, %v1275_v58  ;;  %v1875_v63 = vld [vmem:[%s7155_s2 + $0x40] sm:$0xff] }
 0x498   :  { %v941_v9 = vpop.permute.xlu0 %940 }
 0x49a   :  { %v1413_v39 = vpop.permute.xlu1 %1412 }
 0x49b   :  { %v1451_v36 = vsel %vm7202_vm12, %v1413_v39, 0.0  ;;  %4531 = vset.pattern.permute.xlu1 %v7235_v45  ;;  %v973_v39 = vsel %vm7210_vm1, %v941_v9, 0.0 }
 0x49c   :  { %v1467_v55 = vadd.f32 %v1451_v36, %v1371_v60  ;;  %1144 = vperm.xlu1 %4531, %v5071_v3  }
 0x49e   :  { %v1704_v10 = vadd.f32 %v5211_v52, %v1467_v55 }
 0x49f   :  { %v5577_v24 = vpop.permute.xlu1 %728 }
 0x4a0   :  { %v1859_v53 = vmul.f32 0.35355338, %v1704_v10  ;;  %4533 = vset.pattern.permute.xlu1 %v7234_v2 }
 0x4a1   :  { %1336 = vperm.xlu1 %4533, %v5071_v3  }
 0x4a2   :  { %v5584_v14 = vadd.f32 %v1875_v63, %v1859_v53 }
 0x4a4   :  { %v5588_v1 = vpop.permute.xlu1 %928  ;;  %v1924_v52 = vsel %vm1899_vm9, %v5584_v14, -inf }
 0x4a5   :  { %4536 = vset.pattern.permute.xlu1 %v7230_v22  ;;  %1925 = vmax.xlane.f32.xlu0 %v1924_v52  ;;  %v1037_v22 = vpop.permute.xlu0 %1036 }
 0x4a6   :  { %860 = vperm.xlu1 %4536, %v5073_v5   ;;  %v1069_v63 = vsel %vm7200_vm15, %v1037_v22, 0.0 }
 0x4a9   :  { %v5596_v37 = vpop.permute.xlu1 %1024  ;;  %v754_v11 = vpop.permute.xlu0 %753 }
 0x4aa   :  { %4537 = vset.pattern.permute.xlu1 %v7237_v17 }
 0x4ab   :  { %956 = vperm.xlu1 %4537, %v5073_v5  }
 0x4ad   :  { %v949_v54 = vpop.permute.xlu0 %948 }
 0x4ae   :  { %v5600_v3 = vpop.permute.xlu1 %840  ;;  %v975_v22 = vsel %vm7210_vm1, %v949_v54, 0.0 }
 0x4af   :  { %4538 = vset.pattern.permute.xlu1 %v7229_v19 }
 0x4b0   :  { %1052 = vperm.xlu1 %4538, %v5073_v5  }
 0x4b3   :  { %v5604_v46 = vpop.permute.xlu1 %1216 }
 0x4b4   :  { %4539 = vset.pattern.permute.xlu1 %v7235_v45  ;;  %v1325_v45 = vpop.permute.xlu0 %1324 }
 0x4b5   :  { %1148 = vperm.xlu1 %4539, %v5073_v5  }
 0x4b8   :  { %v5608_v23 = vpop.permute.xlu1 %1312  ;;  %v1045_v4 = vpop.permute.xlu0 %1044 }
 0x4b9   :  { %4540 = vset.pattern.permute.xlu1 %v7233_v27 }
 0x4ba   :  { %1244 = vperm.xlu1 %4540, %v5073_v5  }
 0x4bc   :  { %v1421_v36 = vpop.permute.xlu0 %1420 }
 0x4bd   :  { %v5612_v21 = vpop.permute.xlu1 %1408 }
 0x4be   :  { %4541 = vset.pattern.permute.xlu1 %v7234_v2 }
 0x4bf   :  { %1340 = vperm.xlu1 %4541, %v5073_v5  }
 0x4c2   :  { %v5616_v40 = vpop.permute.xlu1 %1224 }
 0x4c3   :  { %4542 = vset.pattern.permute.xlu1 %v7236_v38 }
 0x4c4   :  { %1436 = vperm.xlu1 %4542, %v5073_v5  }
 0x4c7   :  { %v744_v18 = vpop.permute.xlu1 %743 }
 0x4c8   :  { %4543 = vset.pattern.permute.xlu1 %v7231_v13  ;;  %v781_v58 = vsel %vm276_vm3, %v744_v18, 0.0  ;;  %v868_v13 = vsel %vm7205_vm5, %v5165_v29, 0.0 }
 0x4c9   :  { %768 = vperm.xlu1 %4543, %v5077_v7  }
 0x4cc   :  { %v845_v44 = vpop.permute.xlu1 %844 }
 0x4cd   :  { %v877_v2 = vsel %vm280_vm6, %v845_v44, 0.0  ;;  %4545 = vset.pattern.permute.xlu1 %v7237_v17  ;;  %v772_v17 = vsel %vm7209_vm2, %v5179_v32, 0.0  ;;  %v964_v32 = vsel %vm7203_vm4, %v5193_v41, 0.0 }
 0x4ce   :  { %960 = vperm.xlu1 %4545, %v5077_v7   ;;  %v893_v60 = vadd.f32 %v877_v2, %v781_v58  ;;  %v884_v10 = vadd.f32 %v868_v13, %v772_v17  ;;  %v1071_v58 = vsel %vm7200_vm15, %v1045_v4, 0.0  ;;  %v5669_v4 = vld [vmem:[%s7154_s1 + $0x18] sm:$0xff] }
 0x4cf   :  { %vm281_vm15 = vcmp.eq.s32.totalorder %v5669_v4, 1 }
 0x4d0   :  { %v989_v55 = vadd.f32 %v973_v39, %v893_v60  ;;  %v980_v44 = vadd.f32 %v964_v32, %v884_v10 }
 0x4d1   :  { %v1133_v5 = vpop.permute.xlu1 %1132 }
 0x4d2   :  { %4546 = vset.pattern.permute.xlu1 %v7229_v19  ;;  %v783_v19 = vsel %vm276_vm3, %v754_v11, 0.0  ;;  %v1085_v52 = vadd.f32 %v1069_v63, %v989_v55  ;;  %v1165_v9 = vsel %vm7199_vm14, %v1133_v5, 0.0  ;;  %v1141_v11 = vpop.permute.xlu0 %1140 }
 0x4d3   :  { %1056 = vperm.xlu1 %4546, %v5077_v7   ;;  %v1167_v54 = vsel %vm7199_vm14, %v1141_v11, 0.0  ;;  %vm277_vm14 = vcmp.eq.s32.totalorder %v5669_v4, 0 }
 0x4d4   :  { %v1181_v60 = vadd.f32 %v1165_v9, %v1085_v52 }
 0x4d6   :  { %v853_v53 = vpop.permute.xlu1 %852  ;;  %v1333_v10 = vpop.permute.xlu0 %1332 }
 0x4d7   :  { %v879_v29 = vsel %vm280_vm6, %v853_v53, 0.0  ;;  %4548 = vset.pattern.permute.xlu1 %v7233_v27  ;;  %v1060_v27 = vsel %vm7204_vm7, %v5173_v31, 0.0  ;;  %v1357_v31 = vsel %vm300_vm11, %v1325_v45, 0.0  ;;  %v1453_v53 = vsel %vm7202_vm12, %v1421_v36, 0.0 }
 0x4d8   :  { %v895_v18 = vadd.f32 %v879_v29, %v783_v19  ;;  %1248 = vperm.xlu1 %4548, %v5077_v7   ;;  %v1076_v55 = vadd.f32 %v1060_v27, %v980_v44  ;;  %v1359_v9 = vsel %vm300_vm11, %v1333_v10, 0.0  ;;  %v1252_v36 = vsel %vm7208_vm0, %v5181_v33, 0.0  ;;  %v7240_v27 = vld [vmem:[#allocation22_spill] sm:$0xff] }
 0x4d9   :  { %v776_v33 = vsel %vm7209_vm2, %v7240_v27, 0.0 }
 0x4da   :  { %v991_v2 = vadd.f32 %v975_v22, %v895_v18  ;;  %v876_v18 = vsel %vm281_vm15, %v5600_v3, 0.0  ;;  %v7238_v22 = vld [vmem:[#allocation15_spill] sm:$0xff]  ;;  %v780_v3 = vsel %vm277_vm14, %v5537_v20, 0.0  ;;  %v778_v20 = vsel %vm7209_vm2, %v5577_v24, 0.0 }
 0x4db   :  { %v1229_v5 = vpop.permute.xlu1 %1228  ;;  %v970_v24 = vsel %vm7203_vm4, %v5588_v1, 0.0  ;;  %v1066_v1 = vsel %vm7204_vm7, %v5596_v37, 0.0  ;;  %vm7252_vm2 = vcmp.eq.s32.totalorder %v5534_v48, 5 }
 0x4dc   :  { %v1261_v39 = vsel %vm7201_vm13, %v1229_v5, 0.0  ;;  %4550 = vset.pattern.permute.xlu1 %v7236_v38  ;;  %v1087_v41 = vadd.f32 %v1071_v58, %v991_v2  ;;  %v1877_v2 = vld [vmem:[%s7155_s2 + $0x50] sm:$0xff]  ;;  %v892_v5 = vadd.f32 %v876_v18, %v780_v3 }
 0x4dd   :  { %v1277_v13 = vadd.f32 %v1261_v39, %v1181_v60  ;;  %1440 = vperm.xlu1 %4550, %v5077_v7   ;;  %v1156_v7 = vsel %vm7206_vm8, %v5205_v50, 0.0 }
 0x4de   :  { %v1183_v17 = vadd.f32 %v1167_v54, %v1087_v41  ;;  %v1172_v29 = vadd.f32 %v1156_v7, %v1076_v55  ;;  %v872_v41 = vsel %vm7205_vm5, %v5469_v30, 0.0  ;;  %v968_v54 = vsel %vm7203_vm4, %v5328_v62, 0.0 }
 0x4df   :  { %v1373_v63 = vadd.f32 %v1357_v31, %v1277_v13  ;;  %v1237_v38 = vpop.permute.xlu1 %1236  ;;  %v888_v55 = vadd.f32 %v872_v41, %v776_v33  ;;  %v874_v31 = vsel %vm7205_vm5, %v5519_v28, 0.0  ;;  %v1064_v30 = vsel %vm7204_vm7, %v5382_v25, 0.0 }
 0x4e0   :  { %v1263_v19 = vsel %vm7201_vm13, %v1237_v38, 0.0  ;;  %vm7239_vm13 = vcmp.eq.s32.totalorder %v5344_v15, 6  ;;  %v1268_v60 = vadd.f32 %v1252_v36, %v1172_v29  ;;  %v1879_v38 = vld [vmem:[%s7155_s2 + $0x60] sm:$0xff]  ;;  %v7242_v36 = vld [vmem:[#allocation19_spill] sm:$0xff]  ;;  %vm293_vm4 = vcmp.eq.s32.totalorder %v5669_v4, 4 }
 0x4e1   :  { %v1469_v45 = vadd.f32 %v1453_v53, %v1373_v63  ;;  %v1279_v52 = vadd.f32 %v1263_v19, %v1183_v17  ;;  %v1348_v11 = vsel %vm7239_vm13, %v7238_v22, 0.0  ;;  %vm285_vm13 = vcmp.eq.s32.totalorder %v5669_v4, 2  ;;  %v7241_v17 = vld [vmem:[#allocation16_spill] sm:$0xff] }
 0x4e2   :  { %v972_v62 = vsel %vm285_vm13, %v5551_v35, 0.0  ;;  %v984_v53 = vadd.f32 %v968_v54, %v888_v55  ;;  %v890_v19 = vadd.f32 %v874_v31, %v778_v20  ;;  %v1160_v35 = vsel %vm7206_vm8, %v5424_v16, 0.0 }
 0x4e3   :  { %v1375_v32 = vadd.f32 %v1359_v9, %v1279_v52  ;;  %v1751_v50 = vadd.f32 %v5229_v8, %v1469_v45  ;;  %v988_v25 = vadd.f32 %v972_v62, %v892_v5  ;;  %v1364_v45 = vadd.f32 %v1348_v11, %v1268_v60 }
 0x4e4   :  { %v1429_v44 = vpop.permute.xlu1 %1428  ;;  %v1080_v52 = vadd.f32 %v1064_v30, %v984_v53  ;;  %v986_v29 = vadd.f32 %v970_v24, %v890_v19  ;;  %v1444_v18 = vsel %vm7207_vm10, %v7242_v36, 0.0  ;;  %vm7243_vm7 = vcmp.eq.s32.totalorder %v5344_v15, 6  ;;  %v1868_v24 = vld [vmem:[%s7155_s2 + $0x8] sm:$0xff] }
 0x4e5   :  { %v1455_v8 = vsel %vm7202_vm12, %v1429_v44, 0.0  ;;  %v1861_v58 = vmul.f32 0.35355338, %v1751_v50  ;;  %vm289_vm12 = vcmp.eq.s32.totalorder %v5669_v4, 3  ;;  %v1352_v27 = vsel %vm7243_vm7, %v5454_v12, 0.0 }
 0x4e6   :  { %v1471_v39 = vadd.f32 %v1455_v8, %v1375_v32  ;;  %v1256_v32 = vsel %vm7208_vm0, %v5442_v26, 0.0  ;;  %v1068_v16 = vsel %vm289_vm12, %v5564_v34, 0.0  ;;  %v1176_v50 = vadd.f32 %v1160_v35, %v1080_v52  ;;  %v7247_v52 = vld [vmem:[#allocation14_spill] sm:$0xff] }
 0x4e7   :  { %v5713_v13 = vadd.f32 %v1877_v2, %v1861_v58  ;;  %v1082_v37 = vadd.f32 %v1066_v1, %v986_v29  ;;  %v1084_v22 = vadd.f32 %v1068_v16, %v988_v25  ;;  %v1460_v2 = vadd.f32 %v1444_v18, %v1364_v45 }
 0x4e8   :  { %v1798_v10 = vadd.f32 %v7241_v17, %v1471_v39  ;;  %v1162_v26 = vsel %vm7206_vm8, %v5527_v51, 0.0  ;;  %v1272_v34 = vadd.f32 %v1256_v32, %v1176_v50  ;;  %vm297_vm5 = vcmp.eq.s32.totalorder %v5669_v4, 5  ;;  %v7244_v39 = vld [vmem:[#allocation9_spill] sm:$0xff]  ;;  %v7245_v17 = vld [vmem:[#allocation12_spill] sm:$0xff]  ;;  %v1876_v50 = vld [vmem:[%s7155_s2 + $0x48] sm:$0xff] }
 0x4e9   :  { %v5729_v63 = vpop.permute.xlu1 %848  ;;  %v1930_v28 = vsel %vm1899_vm9, %v5713_v13, -inf  ;;  %v1448_v33 = vsel %vm7207_vm10, %v5471_v49, 0.0  ;;  %v1164_v3 = vsel %vm293_vm4, %v5574_v61, 0.0  ;;  %v1258_v12 = vsel %vm7208_vm0, %v5604_v46, 0.0 }
 0x4ea   :  { %v1863_v7 = vmul.f32 0.35355338, %v1798_v10  ;;  %1931 = vmax.xlane.f32.xlu0 %v1930_v28  ;;  %v1260_v8 = vsel %vm297_vm5, %v5616_v40, 0.0  ;;  %v1368_v51 = vadd.f32 %v1352_v27, %v1272_v34  ;;  %v1178_v58 = vadd.f32 %v1162_v26, %v1082_v37 }
 0x4eb   :  { %v1180_v60 = vadd.f32 %v1164_v3, %v1084_v22  ;;  %v1354_v5 = vsel %vm7243_vm7, %v5608_v23, 0.0  ;;  %v1519_v41 = vadd.f32 %v7244_v39, %v1460_v2  ;;  %vm301_vm8 = vcmp.eq.s32.totalorder %v5669_v4, 6  ;;  %v749_v22 = vpop.permute.xlu0 %748 }
 0x4ec   :  { %v5742_v9 = vadd.f32 %v1879_v38, %v1863_v7  ;;  %v1464_v54 = vadd.f32 %v1448_v33, %v1368_v51  ;;  %v1274_v61 = vadd.f32 %v1258_v12, %v1178_v58  ;;  %v1450_v46 = vsel %vm7207_vm10, %v5612_v21, 0.0  ;;  %v7246_v38 = vld [vmem:[#allocation13_spill] sm:$0xff]  ;;  %v1872_v7 = vld [vmem:[%s7155_s2 + $0x28] sm:$0xff] }
 0x4ed   :  { %v1276_v20 = vadd.f32 %v1260_v8, %v1180_v60  ;;  %v1356_v55 = vsel %vm301_vm8, %v5586_v0, 0.0  ;;  %v1852_v31 = vmul.f32 0.35355338, %v1519_v41  ;;  %vm7211_vm7 = vcmp.eq.s32.totalorder %v5669_v4, 7 }
 0x4ee   :  { %v945_v11 = vpop.permute.xlu1 %944  ;;  %v1936_v44 = vsel %vm1899_vm9, %v5742_v9, -inf  ;;  %v1370_v40 = vadd.f32 %v1354_v5, %v1274_v61  ;;  %v1613_v23 = vadd.f32 %v7245_v17, %v1464_v54  ;;  %v1452_v21 = vsel %vm7211_vm7, %v5594_v57, 0.0  ;;  %v1874_v57 = vld [vmem:[%s7155_s2 + $0x38] sm:$0xff] }
 0x4ef   :  { %1937 = vmax.xlane.f32.xlu0 %v1936_v44  ;;  %v1372_v30 = vadd.f32 %v1356_v55, %v1276_v20  ;;  %v5795_v19 = vadd.f32 %v1868_v24, %v1852_v31  ;;  %v878_v27 = vsel %vm281_vm15, %v5729_v63, 0.0  ;;  %v782_v26 = vsel %vm277_vm14, %v749_v22, 0.0  ;;  %v7249_v22 = vld [vmem:[#allocation18_spill] sm:$0xff] }
 0x4f0   :  { %v1466_v10 = vadd.f32 %v1450_v46, %v1370_v40  ;;  %v1856_v28 = vmul.f32 0.35355338, %v1613_v23  ;;  %v974_v34 = vsel %vm285_vm13, %v945_v11, 0.0  ;;  %v894_v33 = vadd.f32 %v878_v27, %v782_v26  ;;  %v857_v11 = vpop.permute.xlu0 %856  ;;  %v1880_v27 = vld [vmem:[%s7155_s2 + $0x68] sm:$0xff] }
 0x4f1   :  { %v1468_v0 = vadd.f32 %v1452_v21, %v1372_v30  ;;  %v1903_v35 = vsel %vm1899_vm9, %v5795_v19, -inf  ;;  %vm7250_vm10 = vcmp.eq.s32.totalorder %v5534_v48, 3  ;;  %vm7251_vm0 = vcmp.eq.s32.totalorder %v5534_v48, 4 }
 0x4f2   :  { %v1660_v53 = vadd.f32 %v7246_v38, %v1466_v10  ;;  %v5802_v1 = vadd.f32 %v1872_v7, %v1856_v28  ;;  %v990_v51 = vadd.f32 %v974_v34, %v894_v33  ;;  %v1878_v38 = vld [vmem:[%s7155_s2 + $0x58] sm:$0xff] }
 0x4f3   :  { %v1041_v49 = vpop.permute.xlu1 %1040  ;;  %v1707_v29 = vadd.f32 %v7247_v52, %v1468_v0 }
 0x4f4   :  { %v1858_v45 = vmul.f32 0.35355338, %v1660_v53  ;;  %v1915_v18 = vsel %vm1899_vm9, %v5802_v1, -inf  ;;  %v1070_v8 = vsel %vm289_vm12, %v1041_v49, 0.0  ;;  %v880_v49 = vsel %vm281_vm15, %v857_v11, 0.0  ;;  %v1241_v30 = vpop.permute.xlu0 %1240 }
 0x4f5   :  { %v1860_v16 = vmul.f32 0.35355338, %v1707_v29  ;;  %v1086_v58 = vadd.f32 %v1070_v8, %v990_v51  ;;  %v1264_v7 = vsel %vm297_vm5, %v1241_v30, 0.0  ;;  %v7254_v30 = vld [vmem:[#allocation20_spill] sm:$0xff] }
 0x4f6   :  { %v5810_v32 = vadd.f32 %v1874_v57, %v1858_v45 }
 0x4f7   :  { %v5817_v2 = vadd.f32 %v1876_v50, %v1860_v16 }
 0x4f8   :  { %v1137_v62 = vpop.permute.xlu1 %1136  ;;  %v1921_v44 = vsel %vm1899_vm9, %v5810_v32, -inf  ;;  %v1433_v52 = vpop.permute.xlu0 %1432 }
 0x4f9   :  { %v1927_v12 = vsel %vm1899_vm9, %v5817_v2, -inf  ;;  %v1166_v63 = vsel %vm293_vm4, %v1137_v62, 0.0  ;;  %v7248_v62 = vld [vmem:[#allocation17_spill] sm:$0xff]  ;;  %v1456_v16 = vsel %vm7211_vm7, %v1433_v52, 0.0 }
 0x4fa   :  { %v1182_v39 = vadd.f32 %v1166_v63, %v1086_v58 }
 0x4fc   :  { %v764_v51 = vpop.permute.xlu0 %763 }
 0x4fd   :  { %v759_v25 = vpop.permute.xlu1 %758  ;;  %v785_v58 = vsel %vm276_vm3, %v764_v51, 0.0 }
 0x4fe   :  { %v784_v54 = vsel %vm277_vm14, %v759_v25, 0.0 }
 0x4ff   :  { %v896_v55 = vadd.f32 %v880_v49, %v784_v54 }
 0x501   :  { %1904 = vmax.xlane.f32.xlu1 %v1903_v35 }
 0x502   :  { %v1233_v36 = vpop.permute.xlu1 %1232 }
 0x503   :  { %v1262_v60 = vsel %vm297_vm5, %v1233_v36, 0.0 }
 0x504   :  { %v1278_v61 = vadd.f32 %v1262_v60, %v1182_v39 }
 0x505   :  { %1916 = vmax.xlane.f32.xlu1 %v1915_v18 }
 0x507   :  { %v953_v37 = vpop.permute.xlu1 %952 }
 0x508   :  { %v976_v20 = vsel %vm285_vm13, %v953_v37, 0.0 }
 0x509   :  { %1922 = vmax.xlane.f32.xlu1 %v1921_v44  ;;  %v992_v10 = vadd.f32 %v976_v20, %v896_v55 }
 0x50c   :  { %v1329_v3 = vpop.permute.xlu1 %1328 }
 0x50d   :  { %1928 = vmax.xlane.f32.xlu1 %v1927_v12  ;;  %v1358_v41 = vsel %vm301_vm8, %v1329_v3, 0.0 }
 0x50e   :  { %v1374_v46 = vadd.f32 %v1358_v41, %v1278_v61 }
 0x511   :  { %v1049_v5 = vpop.permute.xlu1 %1048 }
 0x512   :  { %v1072_v17 = vsel %vm289_vm12, %v1049_v5, 0.0 }
 0x513   :  { %v1088_v21 = vadd.f32 %v1072_v17, %v992_v10 }
 0x516   :  { %v1425_v40 = vpop.permute.xlu1 %1424 }
 0x517   :  { %v1454_v31 = vsel %vm7211_vm7, %v1425_v40, 0.0 }
 0x518   :  { %v1470_v23 = vadd.f32 %v1454_v31, %v1374_v46 }
 0x51a   :  { %v1754_v24 = vadd.f32 %v7248_v62, %v1470_v23 }
 0x51b   :  { %v1145_v28 = vpop.permute.xlu1 %1144 }
 0x51c   :  { %v1862_v53 = vmul.f32 0.35355338, %v1754_v24  ;;  %v1168_v0 = vsel %vm293_vm4, %v1145_v28, 0.0 }
 0x51d   :  { %v1184_v25 = vadd.f32 %v1168_v0, %v1088_v21  ;;  %v1881_v21 = vld [vmem:[%s7155_s2 + $0x70] sm:$0xff] }
 0x51e   :  { %v5854_v45 = vadd.f32 %v1878_v38, %v1862_v53  ;;  %v865_v38 = vpop.permute.xlu0 %864 }
 0x51f   :  { %v1280_v35 = vadd.f32 %v1264_v7, %v1184_v25 }
 0x520   :  { %v1337_v29 = vpop.permute.xlu1 %1336  ;;  %v1933_v57 = vsel %vm1899_vm9, %v5854_v45, -inf }
 0x521   :  { %v1360_v36 = vsel %vm301_vm8, %v1337_v29, 0.0  ;;  %1934 = vmax.xlane.f32.xlu1 %v1933_v57 }
 0x522   :  { %v1376_v18 = vadd.f32 %v1360_v36, %v1280_v35  ;;  %v882_v35 = vsel %vm281_vm15, %v865_v38, 0.0  ;;  %v1153_v57 = vpop.permute.xlu0 %1152 }
 0x524   :  { %v1472_v50 = vadd.f32 %v1456_v16, %v1376_v18 }
 0x525   :  { %v861_v37 = vpop.permute.xlu1 %860 }
 0x526   :  { %v1801_v44 = vadd.f32 %v7249_v22, %v1472_v50  ;;  %v881_v63 = vsel %vm280_vm6, %v861_v37, 0.0  ;;  %v1170_v37 = vsel %vm293_vm4, %v1153_v57, 0.0 }
 0x527   :  { %v897_v5 = vadd.f32 %v881_v63, %v785_v58 }
 0x528   :  { %v1864_v26 = vmul.f32 0.35355338, %v1801_v44  ;;  %v1345_v44 = vpop.permute.xlu0 %1344 }
 0x52a   :  { %v957_v34 = vpop.permute.xlu1 %956  ;;  %v5866_v33 = vadd.f32 %v1880_v27, %v1864_v26 }
 0x52b   :  { %v977_v60 = vsel %vm7210_vm1, %v957_v34, 0.0  ;;  %vm7253_vm1 = vcmp.eq.s32.totalorder %v5534_v48, 7 }
 0x52c   :  { %v1939_v3 = vsel %vm1899_vm9, %v5866_v33, -inf  ;;  %v993_v41 = vadd.f32 %v977_v60, %v897_v5  ;;  %v1902_v63 = vpop.xlane.xlu0 %1901  ;;  %v7255_v60 = vld [vmem:[#allocation21_spill] sm:$0xff] }
 0x52d   :  { %1940 = vmax.xlane.f32.xlu1 %v1939_v3  ;;  %v1362_v3 = vsel %vm301_vm8, %v1345_v44, 0.0 }
 0x52f   :  { %v1053_v12 = vpop.permute.xlu1 %1052 }
 0x530   :  { %v1073_v11 = vsel %vm7250_vm10, %v1053_v12, 0.0  ;;  %vm7261_vm10 = vcmp.eq.s32.totalorder %v5302_v47, 1 }
 0x531   :  { %v1089_v61 = vadd.f32 %v1073_v11, %v993_v41  ;;  %v1908_v41 = vpop.xlane.xlu0 %1907 }
 0x534   :  { %v1149_v8 = vpop.permute.xlu1 %1148 }
 0x535   :  { %v1169_v54 = vsel %vm7251_vm0, %v1149_v8, 0.0  ;;  %vm7260_vm0 = vcmp.eq.s32.totalorder %v5302_v47, 0 }
 0x536   :  { %v1185_v46 = vadd.f32 %v1169_v54, %v1089_v61  ;;  %v7256_v54 = vld [vmem:[#allocation5_spill] sm:$0xff] }
 0x539   :  { %v1245_v39 = vpop.permute.xlu1 %1244 }
 0x53a   :  { %v1265_v49 = vsel %vm7252_vm2, %v1245_v39, 0.0  ;;  %v1882_v39 = vld [vmem:[%s7155_s2 + $0x78] sm:$0xff]  ;;  %vm7263_vm2 = vmmov %vm7260_vm0 }
 0x53b   :  { %v1281_v55 = vadd.f32 %v1265_v49, %v1185_v46  ;;  %v1948_v46 = vsub.f32 %v5451_v56, %v1902_v63 }
 0x53e   :  { %v1341_v20 = vpop.permute.xlu1 %1340 }
 0x53f   :  { %v1361_v40 = vsel %vm300_vm11, %v1341_v20, 0.0  ;;  %v1914_v20 = vpop.xlane.xlu0 %1913 }
 0x540   :  { %v1377_v31 = vadd.f32 %v1361_v40, %v1281_v55  ;;  %v1964_v55 = vmul.f32 1.442695, %v1948_v46 }
 0x542   :  { %4608 = vpow2.f32 %v1964_v55 }
 0x543   :  { %v1437_v17 = vpop.permute.xlu1 %1436  ;;  %v1911_v40 = vpop.xlane.xlu0 %1910 }
 0x544   :  { %v1457_v23 = vsel %vm7253_vm1, %v1437_v17, 0.0  ;;  %vm7262_vm1 = vcmp.eq.s32.totalorder %v5302_v47, 2 }
 0x545   :  { %v1473_v10 = vadd.f32 %v1457_v23, %v1377_v31  ;;  %v1950_v31 = vsub.f32 %v5464_v6, %v1908_v41 }
 0x547   :  { %v1845_v62 = vadd.f32 %v7254_v30, %v1473_v10  ;;  %v1920_v17 = vpop.xlane.xlu0 %1919  ;;  %v1968_v23 = vmul.f32 1.442695, %v1950_v31  ;;  %v1952_v10 = vsub.f32 %v5476_v43, %v1914_v20 }
 0x548   :  { %v769_v24 = vpop.permute.xlu1 %768 }
 0x549   :  { %v1865_v28 = vmul.f32 0.35355338, %v1845_v62  ;;  %v786_v0 = vsel %vm277_vm14, %v769_v24, 0.0  ;;  %v7257_v62 = vld [vmem:[#allocation7_spill] sm:$0xff]  ;;  %4610 = vpow2.f32 %v1968_v23  ;;  %v1972_v24 = vmul.f32 1.442695, %v1952_v10 }
 0x54a   :  { %v898_v29 = vadd.f32 %v882_v35, %v786_v0 }
 0x54b   :  { %v5890_v53 = vadd.f32 %v1881_v21, %v1865_v28  ;;  %v1926_v30 = vpop.xlane.xlu0 %1925  ;;  %v1954_v21 = vsub.f32 %v5521_v42, %v1920_v17  ;;  %4612 = vpow2.f32 %v1972_v24 }
 0x54c   :  { %v1956_v38 = vsub.f32 %v5584_v14, %v1926_v30  ;;  %v5927_v0 = vpop.eup %4608 }
 0x54d   :  { %v961_v25 = vpop.permute.xlu1 %960  ;;  %v1942_v7 = vsel %vm1899_vm9, %v5890_v53, -inf  ;;  %v1976_v56 = vmul.f32 1.442695, %v1954_v21 }
 0x54e   :  { %1943 = vmax.xlane.f32.xlu0 %v1942_v7  ;;  %v978_v52 = vsel %vm285_vm13, %v961_v25, 0.0  ;;  %v1980_v6 = vmul.f32 1.442695, %v1956_v38  ;;  %v1996_v7 = vsel %vm1899_vm9, %v5927_v0, 0.0 }
 0x54f   :  { %v994_v36 = vadd.f32 %v978_v52, %v898_v29  ;;  %4614 = vpow2.f32 %v1976_v56 }
 0x550   :  { %4616 = vpow2.f32 %v1980_v6 }
 0x552   :  { %v1057_v18 = vpop.permute.xlu1 %1056 }
 0x553   :  { %v1074_v16 = vsel %vm289_vm12, %v1057_v18, 0.0  ;;  %v5932_v35 = vpop.eup %4610  ;;  %v1951_v18 = vsub.f32 %v5484_v59, %v1911_v40 }
 0x554   :  { %v1090_v50 = vadd.f32 %v1074_v16, %v994_v36  ;;  %v2002_v14 = vsel %vm1899_vm9, %v5932_v35, 0.0 }
 0x555   :  { %v5937_v29 = vpop.eup %4612 }
 0x556   :  { %v1186_v22 = vadd.f32 %v1170_v37, %v1090_v50 }
 0x557   :  { %v1249_v27 = vpop.permute.xlu1 %1248 }
 0x558   :  { %v1266_v26 = vsel %vm297_vm5, %v1249_v27, 0.0 }
 0x559   :  { %v1282_v34 = vadd.f32 %v1266_v26, %v1186_v22  ;;  %v5941_v36 = vpop.eup %4614  ;;  %v1970_v22 = vmul.f32 1.442695, %v1951_v18  ;;  %v7259_v18 = vld [vmem:[#allocation8_spill] sm:$0xff] }
 0x55a   :  { %v5946_v50 = vpop.eup %4616 }
 0x55b   :  { %v1378_v12 = vadd.f32 %v1362_v3, %v1282_v34  ;;  %v2020_v26 = vsel %vm1899_vm9, %v5946_v50, 0.0 }
 0x55c   :  { %v1441_v8 = vpop.permute.xlu1 %1440 }
 0x55d   :  { %v1458_v51 = vsel %vm7211_vm7, %v1441_v8, 0.0 }
 0x55e   :  { %v1474_v58 = vadd.f32 %v1458_v51, %v1378_v12 }
 0x560   :  { %v1848_v5 = vadd.f32 %v7255_v60, %v1474_v58 }
 0x562   :  { %v1866_v11 = vmul.f32 0.35355338, %v1848_v5 }
 0x564   :  { %3360 = vrot.lane.b32.xlu0 %v7256_v54, %s4730_s18  ;;  %v5916_v61 = vadd.f32 %v1882_v39, %v1866_v11 }
 0x566   :  { %v1945_v49 = vsel %vm1899_vm9, %v5916_v61, -inf }
 0x567   :  { %1946 = vmax.xlane.f32.xlu1 %v1945_v49 }
 0x577   :  { %v1932_v28 = vpop.xlane.xlu0 %1931 }
 0x578   :  { %3407 = vrot.lane.b32.xlu1 %v7257_v62, %s4730_s18  ;;  %v1958_v25 = vsub.f32 %v5713_v13, %v1932_v28  ;;  %v2008_v13 = vsel %vm1899_vm9, %v5937_v29, 0.0 }
 0x57a   :  { %v1984_v42 = vmul.f32 1.442695, %v1958_v25 }
 0x57c   :  { %v1938_v43 = vpop.xlane.xlu0 %1937  ;;  %4618 = vpow2.f32 %v1984_v42  ;;  %v7258_v42 = vld [vmem:[#allocation6_spill] sm:$0xff] }
 0x57d   :  { %v1960_v52 = vsub.f32 %v5742_v9, %v1938_v43  ;;  %v2014_v9 = vsel %vm1899_vm9, %v5941_v36, 0.0 }
 0x57f   :  { %v1988_v57 = vmul.f32 1.442695, %v1960_v52 }
 0x581   :  { %4620 = vpow2.f32 %v1988_v57 }
 0x583   :  { %1997 = vadd.xlane.f32.xlu0 %v1996_v7 }
 0x586   :  { %v5951_v34 = vpop.eup %4618 }
 0x587   :  { %2003 = vadd.xlane.f32.xlu0 %v2002_v14  ;;  %v2026_v8 = vsel %vm1899_vm9, %v5951_v34, 0.0 }
 0x58b   :  { %2009 = vadd.xlane.f32.xlu0 %v2008_v13 }
 0x58e   :  { %v1905_v16 = vpop.xlane.xlu1 %1904 }
 0x58f   :  { %v1949_v37 = vsub.f32 %v5795_v19, %v1905_v16  ;;  %2015 = vadd.xlane.f32.xlu0 %v2014_v9  ;;  %v5956_v19 = vpop.eup %4620 }
 0x590   :  { %v2032_v60 = vsel %vm1899_vm9, %v5956_v19, 0.0 }
 0x591   :  { %v1966_v44 = vmul.f32 1.442695, %v1949_v37 }
 0x592   :  { %v1917_v27 = vpop.xlane.xlu1 %1916 }
 0x593   :  { %4622 = vpow2.f32 %v1966_v44  ;;  %v1953_v59 = vsub.f32 %v5802_v1, %v1917_v27  ;;  %2021 = vadd.xlane.f32.xlu0 %v2020_v26 }
 0x594   :  { %4624 = vpow2.f32 %v1970_v22 }
 0x595   :  { %v1974_v3 = vmul.f32 1.442695, %v1953_v59 }
 0x596   :  { %v1923_v12 = vpop.xlane.xlu1 %1922 }
 0x597   :  { %v1955_v51 = vsub.f32 %v5810_v32, %v1923_v12  ;;  %2027 = vadd.xlane.f32.xlu0 %v2026_v8  ;;  %4626 = vpow2.f32 %v1974_v3 }
 0x599   :  { %v1978_v63 = vmul.f32 1.442695, %v1955_v51 }
 0x59a   :  { %v1929_v58 = vpop.xlane.xlu1 %1928 }
 0x59b   :  { %v1957_v1 = vsub.f32 %v5817_v2, %v1929_v58  ;;  %2033 = vadd.xlane.f32.xlu0 %v2032_v60  ;;  %4628 = vpow2.f32 %v1978_v63 }
 0x59d   :  { %v5962_v5 = vpop.eup %4622  ;;  %v1982_v39 = vmul.f32 1.442695, %v1957_v1 }
 0x59e   :  { %v1999_v11 = vsel %vm1899_vm9, %v5962_v5, 0.0  ;;  %v5966_v41 = vpop.eup %4624 }
 0x59f   :  { %2000 = vadd.xlane.f32.xlu1 %v1999_v11  ;;  %4630 = vpow2.f32 %v1982_v39  ;;  %v2005_v32 = vsel %vm1899_vm9, %v5966_v41, 0.0 }
 0x5a1   :  { %v5970_v54 = vpop.eup %4626 }
 0x5a2   :  { %v2011_v2 = vsel %vm1899_vm9, %v5970_v54, 0.0 }
 0x5a3   :  { %2006 = vadd.xlane.f32.xlu1 %v2005_v32 }
 0x5a5   :  { %v5974_v49 = vpop.eup %4628 }
 0x5a6   :  { %v2017_v20 = vsel %vm1899_vm9, %v5974_v49, 0.0 }
 0x5a7   :  { %2012 = vadd.xlane.f32.xlu1 %v2011_v2 }
 0x5a9   :  { %v5978_v46 = vpop.eup %4630 }
 0x5aa   :  { %v2023_v55 = vsel %vm1899_vm9, %v5978_v46, 0.0 }
 0x5ab   :  { %2018 = vadd.xlane.f32.xlu1 %v2017_v20 }
 0x5ae   :  { %v1935_v40 = vpop.xlane.xlu1 %1934 }
 0x5af   :  { %v1959_v31 = vsub.f32 %v5854_v45, %v1935_v40  ;;  %2024 = vadd.xlane.f32.xlu1 %v2023_v55 }
 0x5b1   :  { %v1986_v17 = vmul.f32 1.442695, %v1959_v31 }
 0x5b3   :  { %4632 = vpow2.f32 %v1986_v17 }
 0x5ba   :  { %v1941_v23 = vpop.xlane.xlu1 %1940 }
 0x5bb   :  { %v1961_v10 = vsub.f32 %v5866_v33, %v1941_v23 }
 0x5bd   :  { %v5984_v30 = vpop.eup %4632  ;;  %v1990_v62 = vmul.f32 1.442695, %v1961_v10 }
 0x5be   :  { %v2029_v24 = vsel %vm1899_vm9, %v5984_v30, 0.0 }
 0x5bf   :  { %4634 = vpow2.f32 %v1990_v62  ;;  %2030 = vadd.xlane.f32.xlu1 %v2029_v24 }
 0x5c9   :  { %v5988_v21 = vpop.eup %4634 }
 0x5ca   :  { %v2035_v28 = vsel %vm1899_vm9, %v5988_v21, 0.0 }
 0x5cb   :  { %2036 = vadd.xlane.f32.xlu1 %v2035_v28 }
 0x5db   :  { %v1944_v45 = vpop.xlane.xlu0 %1943 }
 0x5dc   :  { %v1962_v56 = vsub.f32 %v5890_v53, %v1944_v45 }
 0x5de   :  { %v1992_v38 = vmul.f32 1.442695, %v1962_v56 }
 0x5df   :  { %v6004_v14 = vpop.permute.xlu0 %3360 }
 0x5e0   :  { %4636 = vpow2.f32 %v1992_v38 }
 0x5ea   :  { %v5993_v33 = vpop.eup %4636 }
 0x5eb   :  { %v2038_v6 = vsel %vm1899_vm9, %v5993_v33, 0.0 }
 0x5ec   :  { %2039 = vadd.xlane.f32.xlu0 %v2038_v6 }
 0x5f4   :  { %v1947_v25 = vpop.xlane.xlu1 %1946 }
 0x5f5   :  { %v1963_v43 = vsub.f32 %v5916_v61, %v1947_v25  ;;  %v7270_v25 = vld [vmem:[#allocation10_spill] sm:$0xff] }
 0x5f7   :  { %v1994_v7 = vmul.f32 1.442695, %v1963_v43 }
 0x5f8   :  { %v6025_v3 = vpop.permute.xlu1 %3407 }
 0x5f9   :  { %4638 = vpow2.f32 %v1994_v7  ;;  %v7272_v7 = vmov 0.0  }
 0x602   :  { %3454 = vrot.lane.b32.xlu0 %v7258_v42, %s4730_s18 }
 0x603   :  { %v6000_v52 = vpop.eup %4638 }
 0x604   :  { %v2041_v53 = vsel %vm1899_vm9, %v6000_v52, 0.0 }
 0x605   :  { %2042 = vadd.xlane.f32.xlu1 %v2041_v53 }
 0x610   :  { %v1998_v57 = vpop.xlane.xlu0 %1997 }
 0x611   :  { %4640 = vrcp.f32 %v1998_v57 }
 0x614   :  { %v2004_v13 = vpop.xlane.xlu0 %2003 }
 0x615   :  { %4642 = vrcp.f32 %v2004_v13 }
 0x616   :  { %3501 = vrot.lane.b32.xlu1 %v7259_v18, %s4730_s18 }
 0x618   :  { %v2010_v9 = vpop.xlane.xlu0 %2009 }
 0x619   :  { %4644 = vrcp.f32 %v2010_v9  ;;  %v7275_v9 = vld [vmem:[#allocation11_spill] sm:$0xff] }
 0x61b   :  { %v4641_v61 = vpop.eup %4640 }
 0x61c   :  { %v6009_v16 = vmul.f32 %v4641_v61, %v5927_v0  ;;  %v2016_v32 = vpop.xlane.xlu0 %2015 }
 0x61e   :  { %v2076_v37 = vsel %vm7260_vm0, %v6009_v16, 0.0  ;;  %v2212_v44 = vsel %vm7261_vm10, %v6009_v16, 0.0  ;;  %v2348_v0 = vsel %vm7262_vm1, %v6009_v16, 0.0  ;;  %vm7264_vm0 = vmmov %vm7261_vm10 }
 0x61f   :  { %v2092_v22 = vsel %vm1899_vm9, %v2076_v37, 0.0  ;;  %v4643_v27 = vpop.eup %4642  ;;  %v2228_v26 = vsel %vm1899_vm9, %v2212_v44, 0.0  ;;  %v2364_v12 = vsel %vm1899_vm9, %v2348_v0, 0.0  ;;  %vm7265_vm10 = vmmov %vm7263_vm2 }
 0x620   :  { %v6020_v59 = vmul.f32 %v4643_v27, %v5932_v35  ;;  %vm7266_vm1 = vmmov %vm7264_vm0  ;;  %v2022_v55 = vpop.xlane.xlu0 %2021 }
 0x621   :  { %2093 = vadd.xlane.f32.xlu0 %v2092_v22 }
 0x622   :  { %v2078_v8 = vsel %vm7263_vm2, %v6020_v59, 0.0  ;;  %v2214_v60 = vsel %vm7264_vm0, %v6020_v59, 0.0  ;;  %vm7267_vm2 = vcmp.eq.s32.totalorder %v5302_v47, 2  ;;  %vm7268_vm0 = vcmp.eq.s32.totalorder %v5344_v15, 0 }
 0x623   :  { %v4645_v51 = vpop.eup %4644  ;;  %v2098_v58 = vsel %vm1899_vm9, %v2078_v8, 0.0  ;;  %v2234_v39 = vsel %vm1899_vm9, %v2214_v60, 0.0  ;;  %v2350_v10 = vsel %vm7267_vm2, %v6020_v59, 0.0 }
 0x624   :  { %v6033_v35 = vmul.f32 %v4645_v51, %v5937_v29  ;;  %v2370_v38 = vsel %vm1899_vm9, %v2350_v10, 0.0 }
 0x625   :  { %2229 = vadd.xlane.f32.xlu0 %v2228_v26 }
 0x626   :  { %v2080_v11 = vsel %vm7265_vm10, %v6033_v35, 0.0  ;;  %v2216_v20 = vsel %vm7266_vm1, %v6033_v35, 0.0  ;;  %vm7269_vm10 = vcmp.eq.s32.totalorder %v5344_v15, 1  ;;  %vm7271_vm1 = vmmov %vm7267_vm2  ;;  %vm7273_vm2 = vmmov 0  }
 0x627   :  { %v2104_v29 = vsel %vm1899_vm9, %v2080_v11, 0.0  ;;  %v2240_v23 = vsel %vm1899_vm9, %v2216_v20, 0.0  ;;  %v2352_v43 = vsel %vm7271_vm1, %v6033_v35, 0.0  ;;  %vm7277_vm1 = vcmp.eq.s32.totalorder %v5344_v15, 0 }
 0x628   :  { %v2376_v13 = vsel %vm1899_vm9, %v2352_v43, 0.0 }
 0x629   :  { %2365 = vadd.xlane.f32.xlu0 %v2364_v12 }
 0x62c   :  { %v2001_v63 = vpop.xlane.xlu1 %2000 }
 0x62d   :  { %4646 = vrcp.f32 %v2001_v63  ;;  %2099 = vadd.xlane.f32.xlu0 %v2098_v58 }
 0x630   :  { %v2007_v1 = vpop.xlane.xlu1 %2006 }
 0x631   :  { %4648 = vrcp.f32 %v2007_v1  ;;  %2235 = vadd.xlane.f32.xlu0 %v2234_v39 }
 0x634   :  { %v2013_v2 = vpop.xlane.xlu1 %2012 }
 0x635   :  { %4650 = vrcp.f32 %v2013_v2  ;;  %2105 = vadd.xlane.f32.xlu0 %v2104_v29 }
 0x636   :  { %4652 = vrcp.f32 %v2016_v32 }
 0x637   :  { %v4647_v40 = vpop.eup %4646 }
 0x638   :  { %v6047_v31 = vmul.f32 %v4647_v40, %v5962_v5  ;;  %v2019_v17 = vpop.xlane.xlu1 %2018 }
 0x639   :  { %4654 = vrcp.f32 %v2019_v17  ;;  %2241 = vadd.xlane.f32.xlu0 %v2240_v23 }
 0x63a   :  { %v3164_v62 = vpack.c.bf16 %v6047_v31, %v6009_v16  ;;  %v2077_v24 = vsel %vm7268_vm0, %v6047_v31, 0.0  ;;  %4656 = vrcp.f32 %v2022_v55  ;;  %v2213_v6 = vsel %vm7269_vm10, %v6047_v31, 0.0 }
 0x63b   :  { %v4649_v28 = vpop.eup %4648  ;;  %v2095_v5 = vsel %vm1899_vm9, %v2077_v24, 0.0  ;;  %v2231_v53 = vsel %vm1899_vm9, %v2213_v6, 0.0  ;;  %vm7274_vm0 = vcmp.eq.s32.totalorder %v5344_v15, 2  ;;  %vm7276_vm10 = vcmp.eq.s32.totalorder %v5302_v47, 3 }
 0x63c   :  { %v6060_v45 = vmul.f32 %v4649_v28, %v5966_v41  ;;  %4301 = vmatmul.mubr.msk.bf16.vlgmr.msra.gmra.mrb[32].mxu1 %vm1899_vm9, %v3164_v62  ;;  %2096 = vadd.xlane.f32.xlu1 %v2095_v5  ;;  %v2025_v56 = vpop.xlane.xlu1 %2024  ;;  %v2349_v18 = vsel %vm7274_vm0, %v6047_v31, 0.0  ;;  %v2486_v37 = vsel %vm7276_vm10, %v6020_v59, 0.0  ;;  %vm7278_vm0 = vmmov %vm7276_vm10 }
 0x63d   :  { %4311 = vmatpush3.bf16.msra.mxu1 %v7270_v25  ;;  %4658 = vrcp.f32 %v2025_v56  ;;  %2371 = vadd.xlane.f32.xlu0 %v2370_v38  ;;  %v2367_v44 = vsel %vm1899_vm9, %v2349_v18, 0.0  ;;  %v2506_v0 = vsel %vm1899_vm9, %v2486_v37, 0.0  ;;  %vm7279_vm10 = vmmov %vm7277_vm1 }
 0x63e   :  { %v3165_v41 = vpack.c.bf16 %v6060_v45, %v6020_v59  ;;  %4312 = vmatprep.mubr.msk.bf16.mxu1 %vm7273_vm2, %v7272_v7  ;;  %4322 = vmatprep.subr.bf16.mxu1 %v7272_v7  ;;  %v2079_v12 = vsel %vm7277_vm1, %v6060_v45, 0.0  ;;  %vm7280_vm1 = vcmp.eq.s32.totalorder %v5302_v47, 4 }
 0x63f   :  { %v4651_v42 = vpop.eup %4650  ;;  %v2101_v63 = vsel %vm1899_vm9, %v2079_v12, 0.0 }
 0x640   :  { %v6078_v57 = vmul.f32 %v4651_v42, %v5970_v54  ;;  %2232 = vadd.xlane.f32.xlu1 %v2231_v53  ;;  %4307 = vmatmul.mubr.msk.bf16.vlgmr.msra.gmra.mrb[36].mxu0 %vm1899_vm9, %v3165_v41  ;;  %v4653_v61 = vpop.eup %4652 }
 0x641   :  { %4317 = vmatpush3.bf16.msra.mxu0 %v7275_v9  ;;  %2377 = vadd.xlane.f32.xlu0 %v2376_v13  ;;  %v6096_v27 = vmul.f32 %v4653_v61, %v5941_v36  ;;  %v2488_v36 = vsel %vm7278_vm0, %v6033_v35, 0.0  ;;  %vm7281_vm0 = vcmp.eq.s32.totalorder %v5344_v15, 1 }
 0x642   :  { %v3166_v54 = vpack.c.bf16 %v6078_v57, %v6033_v35  ;;  %4318 = vmatprep.mubr.msk.bf16.mxu0 %vm7273_vm2, %v7272_v7  ;;  %4328 = vmatprep.subr.bf16.mxu0 %v7272_v7  ;;  %v2512_v1 = vsel %vm1899_vm9, %v2488_v36, 0.0  ;;  %v2081_v39 = vsel %vm7279_vm10, %v6078_v57, 0.0  ;;  %v2217_v2 = vsel %vm7281_vm0, %v6078_v57, 0.0  ;;  %vm7282_vm10 = vmmov %vm7280_vm1 }
 0x643   :  { %v4655_v22 = vpop.eup %4654  ;;  %v2107_v11 = vsel %vm1899_vm9, %v2081_v39, 0.0  ;;  %v2624_v29 = vsel %vm7282_vm10, %v6033_v35, 0.0  ;;  %v2243_v20 = vsel %vm1899_vm9, %v2217_v2, 0.0  ;;  %vm7284_vm0 = vcmp.eq.s32.totalorder %v5302_v47, 5 }
 0x644   :  { %v6099_v26 = vmul.f32 %v4655_v22, %v5974_v49  ;;  %2368 = vadd.xlane.f32.xlu1 %v2367_v44  ;;  %4313 = vmatmul.mubr.msk.bf16.vlgmr.msra.gmra.mrb[36].mxu1 %vm1899_vm9, %v3166_v54  ;;  %v4657_v8 = vpop.eup %4656  ;;  %v2648_v40 = vsel %vm1899_vm9, %v2624_v29, 0.0  ;;  %v2758_v17 = vsel %vm7284_vm0, %v6020_v59, 0.0  ;;  %vm7286_vm7 = vmmov %vm7284_vm0 }
 0x645   :  { %4323 = vmatpush3.bf16.msra.mxu1 %v6004_v14  ;;  %2507 = vadd.xlane.f32.xlu0 %v2506_v0  ;;  %v6117_v58 = vmul.f32 %v4657_v8, %v5946_v50  ;;  %v2028_v14 = vpop.xlane.xlu0 %2027  ;;  %v2622_v50 = vsel %vm7280_vm1, %v6020_v59, 0.0  ;;  %vm7283_vm1 = vcmp.eq.s32.totalorder %v5344_v15, 2  ;;  %v2778_v10 = vsel %vm1899_vm9, %v2758_v17, 0.0 }
 0x646   :  { %v3167_v49 = vpack.c.bf16 %v6099_v26, %v6096_v27  ;;  %4324 = vmatprep.mubr.msk.bf16.mxu1 %vm7273_vm2, %v7272_v7  ;;  %4334 = vmatprep.subr.bf16.mxu1 %v7272_v7  ;;  %4660 = vrcp.f32 %v2028_v14  ;;  %v2642_v32 = vsel %vm1899_vm9, %v2622_v50, 0.0  ;;  %v2351_v55 = vsel %vm7283_vm1, %v6060_v45, 0.0  ;;  %vm7285_vm10 = vmmov %vm7283_vm1 }
 0x647   :  { %v4659_v51 = vpop.eup %4658  ;;  %v2373_v23 = vsel %vm1899_vm9, %v2351_v55, 0.0  ;;  %v2353_v62 = vsel %vm7285_vm10, %v6078_v57, 0.0  ;;  %v2760_v28 = vsel %vm7286_vm7, %v6033_v35, 0.0  ;;  %vm7287_vm1 = vcmp.eq.s32.totalorder %v5344_v15, 3 }
 0x648   :  { %v6120_v60 = vmul.f32 %v4659_v51, %v5978_v46  ;;  %2102 = vadd.xlane.f32.xlu1 %v2101_v63  ;;  %4319 = vmatmul.mubr.msk.bf16.vlgmr.msra.gmra.mrb[40].mxu0 %vm1899_vm9, %v3167_v49  ;;  %v2379_v56 = vsel %vm1899_vm9, %v2353_v62, 0.0  ;;  %v2784_v25 = vsel %vm1899_vm9, %v2760_v28, 0.0  ;;  %v2487_v43 = vsel %vm7287_vm1, %v6060_v45, 0.0  ;;  %vm7289_vm0 = vmmov %vm7287_vm1 }
 0x649   :  { %4329 = vmatpush3.bf16.msra.mxu0 %v6025_v3  ;;  %2513 = vadd.xlane.f32.xlu0 %v2512_v1  ;;  %vm7288_vm7 = vcmp.eq.s32.totalorder %v5302_v47, 6  ;;  %v2489_v53 = vsel %vm7289_vm0, %v6078_v57, 0.0  ;;  %vm7291_vm1 = vcmp.eq.s32.totalorder %v5344_v15, 4  ;;  %v2034_v63 = vpop.xlane.xlu0 %2033 }
 0x64a   :  { %v3168_v46 = vpack.c.bf16 %v6120_v60, %v6117_v58  ;;  %4330 = vmatprep.mubr.msk.bf16.mxu0 %vm7273_vm2, %v7272_v7  ;;  %4340 = vmatprep.subr.bf16.mxu0 %v7272_v7  ;;  %v2894_v41 = vsel %vm7288_vm7, %v6020_v59, 0.0  ;;  %vm7290_vm10 = vmmov %vm7288_vm7  ;;  %v2515_v18 = vsel %vm1899_vm9, %v2489_v53, 0.0  ;;  %v2623_v9 = vsel %vm7291_vm1, %v6060_v45, 0.0 }
 0x64b   :  { %v2896_v13 = vsel %vm7290_vm10, %v6033_v35, 0.0  ;;  %vm7292_vm7 = vcmp.eq.s32.totalorder %v5302_v47, 7  ;;  %v2645_v54 = vsel %vm1899_vm9, %v2623_v9, 0.0  ;;  %vm7295_vm10 = vcmp.eq.s32.totalorder %v5344_v15, 5 }
 0x64c   :  { %2108 = vadd.xlane.f32.xlu1 %v2107_v11  ;;  %4325 = vmatmul.mubr.msk.bf16.vlgmr.msra.gmra.mrb[40].mxu1 %vm1899_vm9, %v3168_v46  ;;  %v2031_v3 = vpop.xlane.xlu1 %2030  ;;  %v2920_v61 = vsel %vm1899_vm9, %v2896_v13, 0.0  ;;  %v3030_v37 = vsel %vm7292_vm7, %v6020_v59, 0.0  ;;  %vm7294_vm0 = vmmov %vm7292_vm7  ;;  %v2759_v59 = vsel %vm7295_vm10, %v6060_v45, 0.0 }
 0x64d   :  { %4662 = vrcp.f32 %v2031_v3  ;;  %2643 = vadd.xlane.f32.xlu0 %v2642_v32  ;;  %4336 = vmatprep.mubr.msk.bf16.mxu1 %vm7273_vm2, %v7272_v7  ;;  %v3050_v22 = vsel %vm1899_vm9, %v3030_v37, 0.0  ;;  %v3032_v44 = vsel %vm7294_vm0, %v6033_v35, 0.0  ;;  %v2781_v49 = vsel %vm1899_vm9, %v2759_v59, 0.0  ;;  %vm7297_vm7 = vmmov %vm7295_vm10 }
 0x64e   :  { %v3056_v12 = vsel %vm1899_vm9, %v3032_v44, 0.0  ;;  %v2761_v51 = vsel %vm7297_vm7, %v6078_v57, 0.0  ;;  %vm7299_vm0 = vcmp.eq.s32.totalorder %v5344_v15, 6  ;;  %vm7300_vm10 = vcmp.eq.s32.totalorder %v5302_v47, 1 }
 0x64f   :  { %v2787_v1 = vsel %vm1899_vm9, %v2761_v51, 0.0  ;;  %v2895_v50 = vsel %vm7299_vm0, %v6060_v45, 0.0  ;;  %v2218_v46 = vsel %vm7300_vm10, %v6096_v27, 0.0  ;;  %vm7302_vm7 = vcmp.eq.s32.totalorder %v5302_v47, 2 }
 0x650   :  { %2244 = vadd.xlane.f32.xlu1 %v2243_v20  ;;  %v4661_v24 = vpop.eup %4660  ;;  %v2917_v11 = vsel %vm1899_vm9, %v2895_v50, 0.0  ;;  %v2246_v3 = vsel %vm1899_vm9, %v2218_v46, 0.0  ;;  %v2354_v2 = vsel %vm7302_vm7, %v6096_v27, 0.0  ;;  %vm7307_vm7 = vcmp.eq.s32.totalorder %v5344_v15, 0 }
 0x651   :  { %2649 = vadd.xlane.f32.xlu0 %v2648_v40  ;;  %v6165_v38 = vmul.f32 %v4661_v24, %v5951_v34  ;;  %v2509_v34 = vsel %vm1899_vm9, %v2487_v43, 0.0  ;;  %v2382_v40 = vsel %vm1899_vm9, %v2354_v2, 0.0 }
 0x654   :  { %2374 = vadd.xlane.f32.xlu1 %v2373_v23 }
 0x655   :  { %2779 = vadd.xlane.f32.xlu0 %v2778_v10 }
 0x657   :  { %v4663_v5 = vpop.eup %4662 }
 0x658   :  { %v6168_v6 = vmul.f32 %v4663_v5, %v5984_v30  ;;  %2380 = vadd.xlane.f32.xlu1 %v2379_v56  ;;  %v2914_v30 = vsel %vm1899_vm9, %v2894_v41, 0.0  ;;  %v2037_v36 = vpop.xlane.xlu1 %2036 }
 0x659   :  { %2785 = vadd.xlane.f32.xlu0 %v2784_v25  ;;  %4664 = vrcp.f32 %v2037_v36 }
 0x65a   :  { %v3169_v42 = vpack.c.bf16 %v6168_v6, %v6165_v38  ;;  %4666 = vrcp.f32 %v2034_v63 }
 0x65c   :  { %2510 = vadd.xlane.f32.xlu1 %v2509_v34  ;;  %4331 = vmatmul.mubr.msk.bf16.vlgmr.msra.gmra.mrb[44].mxu0 %vm1899_vm9, %v3169_v42 }
 0x65d   :  { %2915 = vadd.xlane.f32.xlu0 %v2914_v30  ;;  %4342 = vmatprep.mubr.msk.bf16.mxu0 %vm7273_vm2, %v7272_v7  ;;  %vm7293_vm2 = vmmov %vm7291_vm1  ;;  %vm7296_vm1 = vcmp.eq.s32.totalorder %v5344_v15, 1 }
 0x65e   :  { %v2625_v7 = vsel %vm7293_vm2, %v6078_v57, 0.0  ;;  %v2215_v8 = vsel %vm7296_vm1, %v6060_v45, 0.0  ;;  %vm7298_vm2 = vcmp.eq.s32.totalorder %v5302_v47, 0  ;;  %vm7301_vm1 = vmmov %vm7299_vm0  ;;  %vm7304_vm0 = vcmp.eq.s32.totalorder %v5302_v47, 3 }
 0x65f   :  { %v2651_v0 = vsel %vm1899_vm9, %v2625_v7, 0.0  ;;  %v2237_v35 = vsel %vm1899_vm9, %v2215_v8, 0.0  ;;  %v2082_v14 = vsel %vm7298_vm2, %v6096_v27, 0.0  ;;  %v2897_v32 = vsel %vm7301_vm1, %v6078_v57, 0.0 }
 0x660   :  { %2516 = vadd.xlane.f32.xlu1 %v2515_v18  ;;  %v2110_v39 = vsel %vm1899_vm9, %v2082_v14, 0.0  ;;  %v2923_v29 = vsel %vm1899_vm9, %v2897_v32, 0.0  ;;  %vm7303_vm2 = vcmp.eq.s32.totalorder %v5344_v15, 7  ;;  %v2490_v23 = vsel %vm7304_vm0, %v6096_v27, 0.0 }
 0x661   :  { %2921 = vadd.xlane.f32.xlu0 %v2920_v61  ;;  %v3031_v55 = vsel %vm7303_vm2, %v6060_v45, 0.0  ;;  %v2518_v28 = vsel %vm1899_vm9, %v2490_v23, 0.0  ;;  %vm7305_vm10 = vmmov %vm7303_vm2  ;;  %vm7306_vm1 = vcmp.eq.s32.totalorder %v5302_v47, 4  ;;  %vm7308_vm2 = vcmp.eq.s32.totalorder %v5302_v47, 5 }
 0x662   :  { %v3053_v24 = vsel %vm1899_vm9, %v3031_v55, 0.0  ;;  %v3033_v5 = vsel %vm7305_vm10, %v6078_v57, 0.0  ;;  %v2626_v25 = vsel %vm7306_vm1, %v6096_v27, 0.0  ;;  %v2762_v57 = vsel %vm7308_vm2, %v6096_v27, 0.0 }
 0x663   :  { %v4665_v20 = vpop.eup %4664  ;;  %v2654_v41 = vsel %vm1899_vm9, %v2626_v25, 0.0  ;;  %v2790_v34 = vsel %vm1899_vm9, %v2762_v57, 0.0  ;;  %vm7309_vm0 = vcmp.eq.s32.totalorder %v5344_v15, 1  ;;  %vm7310_vm10 = vcmp.eq.s32.totalorder %v5302_v47, 6 }
 0x664   :  { %2646 = vadd.xlane.f32.xlu1 %v2645_v54  ;;  %v4667_v10 = vpop.eup %4666  ;;  %v6247_v62 = vmul.f32 %v4665_v20, %v5988_v21  ;;  %v3059_v21 = vsel %vm1899_vm9, %v3033_v5, 0.0  ;;  %v2219_v30 = vsel %vm7309_vm0, %v6099_v26, 0.0  ;;  %v2898_v53 = vsel %vm7310_vm10, %v6096_v27, 0.0 }
 0x665   :  { %3051 = vadd.xlane.f32.xlu0 %v3050_v22  ;;  %v6255_v45 = vmul.f32 %v4667_v10, %v5956_v19  ;;  %v2083_v19 = vsel %vm7307_vm7, %v6099_v26, 0.0  ;;  %v2249_v13 = vsel %vm1899_vm9, %v2219_v30, 0.0  ;;  %v2926_v18 = vsel %vm1899_vm9, %v2898_v53, 0.0  ;;  %v6378_v53 = vld [vmem:[%s7157_s4 + $0x1] ss:$0 sm:$0xff] }
 0x666   :  { %v2113_v42 = vsel %vm1899_vm9, %v2083_v19, 0.0  ;;  %vm7311_vm1 = vcmp.eq.s32.totalorder %v5344_v15, 2  ;;  %vm7312_vm7 = vcmp.eq.s32.totalorder %v5302_v47, 7  ;;  %vm7313_vm2 = vcmp.eq.s32.totalorder %v5344_v15, 3 }
 0x667   :  { %v3170_v43 = vpack.c.bf16 %v6247_v62, %v6255_v45  ;;  %v2355_v61 = vsel %vm7311_vm1, %v6099_v26, 0.0  ;;  %v3034_v9 = vsel %vm7312_vm7, %v6096_v27, 0.0  ;;  %v2491_v22 = vsel %vm7313_vm2, %v6099_v26, 0.0 }
 0x668   :  { %2652 = vadd.xlane.f32.xlu1 %v2651_v0  ;;  %v2385_v37 = vsel %vm1899_vm9, %v2355_v61, 0.0  ;;  %v3062_v54 = vsel %vm1899_vm9, %v3034_v9, 0.0  ;;  %v2084_v7 = vsel %vm276_vm3, %v6117_v58, 0.0  ;;  %v2521_v44 = vsel %vm1899_vm9, %v2491_v22, 0.0 }
 0x669   :  { %3057 = vadd.xlane.f32.xlu0 %v3056_v12  ;;  %v2116_v0 = vsel %vm1899_vm9, %v2084_v7, 0.0  ;;  %vm7314_vm0 = vcmp.eq.s32.totalorder %v5344_v15, 4  ;;  %v2220_v12 = vsel %vm280_vm6, %v6117_v58, 0.0  ;;  %vm7315_vm10 = vcmp.eq.s32.totalorder %v5344_v15, 5  ;;  %v6393_v7 = vld [vmem:[%s7157_s4 + $0x2] ss:$0 sm:$0xff] }
 0x66a   :  { %v2627_v27 = vsel %vm7314_vm0, %v6099_v26, 0.0  ;;  %v2252_v36 = vsel %vm1899_vm9, %v2220_v12, 0.0  ;;  %vm7316_vm1 = vcmp.eq.s32.totalorder %v5344_v15, 6  ;;  %vm7317_vm7 = vcmp.eq.s32.totalorder %v5344_v15, 7 }
 0x66b   :  { %v2657_v8 = vsel %vm1899_vm9, %v2627_v27, 0.0  ;;  %v2088_v2 = vsel %vm276_vm3, %v6255_v45, 0.0  ;;  %v2221_v10 = vsel %vm281_vm15, %v6120_v60, 0.0  ;;  %vm7318_vm2 = vcmp.eq.s32.totalorder %v5534_v48, 2 }
 0x66c   :  { %2782 = vadd.xlane.f32.xlu1 %v2781_v49  ;;  %v2763_v49 = vsel %vm7315_vm10, %v6099_v26, 0.0  ;;  %v2128_v55 = vsel %vm1899_vm9, %v2088_v2, 0.0  ;;  %vm7319_vm0 = vmmov %vm7318_vm2  ;;  %vm7320_vm10 = vcmp.eq.s32.totalorder %v5534_v48, 3 }
 0x66d   :  { %2238 = vadd.xlane.f32.xlu0 %v2237_v35  ;;  %v2086_v35 = vsel %vm276_vm3, %v6165_v38, 0.0  ;;  %v2793_v63 = vsel %vm1899_vm9, %v2763_v49, 0.0  ;;  %v2360_v25 = vsel %vm7319_vm0, %v6255_v45, 0.0  ;;  %v2494_v19 = vsel %vm7320_vm10, %v6165_v38, 0.0 }
 0x66e   :  { %v2122_v14 = vsel %vm1899_vm9, %v2086_v35, 0.0  ;;  %v2530_v30 = vsel %vm1899_vm9, %v2494_v19, 0.0  ;;  %v2359_v49 = vsel %vm285_vm13, %v6168_v6, 0.0  ;;  %vm7324_vm0 = vcmp.eq.s32.totalorder %v5534_v48, 5 }
 0x670   :  { %2788 = vadd.xlane.f32.xlu1 %v2787_v1  ;;  %v2899_v1 = vsel %vm7316_vm1, %v6099_v26, 0.0  ;;  %vm7321_vm1 = vmmov %vm7320_vm10 }
 0x671   :  { %2111 = vadd.xlane.f32.xlu0 %v2110_v39  ;;  %v2222_v39 = vsel %vm280_vm6, %v6165_v38, 0.0  ;;  %v2929_v46 = vsel %vm1899_vm9, %v2899_v1, 0.0  ;;  %v6416_v1 = vld [vmem:[%s7157_s4 + $0x8] ss:$0 sm:$0xff]  ;;  %vm7325_vm10 = vmmov %vm7324_vm0 }
 0x674   :  { %2918 = vadd.xlane.f32.xlu1 %v2917_v11  ;;  %v2258_v11 = vsel %vm1899_vm9, %v2222_v39, 0.0 }
 0x675   :  { %2247 = vadd.xlane.f32.xlu0 %v2246_v3  ;;  %v3035_v3 = vsel %vm7317_vm7, %v6099_v26, 0.0  ;;  %vm7322_vm7 = vcmp.eq.s32.totalorder %v5534_v48, 4 }
 0x676   :  { %v2630_v27 = vsel %vm7322_vm7, %v6165_v38, 0.0 }
 0x678   :  { %2924 = vadd.xlane.f32.xlu1 %v2923_v29 }
 0x679   :  { %v2040_v17 = vpop.xlane.xlu0 %2039  ;;  %2383 = vadd.xlane.f32.xlu0 %v2382_v40  ;;  %v3065_v40 = vsel %vm1899_vm9, %v3035_v3, 0.0 }
 0x67a   :  { %4668 = vrcp.f32 %v2040_v17  ;;  %v2085_v17 = vsel %vm277_vm14, %v6120_v60, 0.0 }
 0x67c   :  { %3054 = vadd.xlane.f32.xlu1 %v3053_v24  ;;  %v2358_v24 = vsel %vm7318_vm2, %v6165_v38, 0.0  ;;  %vm7323_vm2 = vmmov %vm7322_vm7 }
 0x67d   :  { %v3455_v56 = vpop.permute.xlu0 %3454  ;;  %2519 = vadd.xlane.f32.xlu0 %v2518_v28  ;;  %v2255_v28 = vsel %vm1899_vm9, %v2221_v10, 0.0  ;;  %v2394_v5 = vsel %vm1899_vm9, %v2358_v24, 0.0  ;;  %v6444_v10 = vld [vmem:[%s7157_s4 + $0x10] ss:$0 sm:$0xff] }
 0x67e   :  { %4335 = vmatpush3.bf16.msra.mxu1 %v3455_v56  ;;  %v2087_v56 = vsel %vm277_vm14, %v6168_v6, 0.0 }
 0x680   :  { %3060 = vadd.xlane.f32.xlu1 %v3059_v21  ;;  %v2125_v21 = vsel %vm1899_vm9, %v2087_v56, 0.0  ;;  %v2902_v56 = vsel %vm300_vm11, %v6165_v38, 0.0 }
 0x681   :  { %2655 = vadd.xlane.f32.xlu0 %v2654_v41  ;;  %4337 = vmatmul.mubr.msk.bf16.vlgmr.msra.gmra.mrb[44].mxu1 %vm1899_vm9, %v3170_v43  ;;  %v2400_v43 = vsel %vm1899_vm9, %v2360_v25, 0.0  ;;  %v2223_v41 = vsel %vm281_vm15, %v6168_v6, 0.0  ;;  %v2938_v19 = vsel %vm1899_vm9, %v2902_v56, 0.0  ;;  %v2903_v56 = vsel %vm301_vm8, %v6168_v6, 0.0 }
 0x684   :  { %2114 = vadd.xlane.f32.xlu1 %v2113_v42  ;;  %v4669_v50 = vpop.eup %4668  ;;  %v2261_v42 = vsel %vm1899_vm9, %v2223_v41, 0.0 }
 0x685   :  { %2791 = vadd.xlane.f32.xlu0 %v2790_v34  ;;  %v6328_v29 = vmul.f32 %v4669_v50, %v5993_v33  ;;  %v2224_v33 = vsel %vm280_vm6, %v6255_v45, 0.0  ;;  %v6372_v34 = vld [vmem:[%s7157_s4] ss:$0 sm:$0xff]  ;;  %v6422_v50 = vld [vmem:[%s7157_s4 + $0x9] ss:$0 sm:$0xff] }
 0x686   :  { %v2264_v23 = vsel %vm1899_vm9, %v2224_v33, 0.0  ;;  %v2768_v33 = vsel %vm7325_vm10, %v6255_v45, 0.0  ;;  %vm7332_vm10 = vcmp.eq.s32.totalorder %v5534_v48, 4 }
 0x687   :  { %v2808_v24 = vsel %vm1899_vm9, %v2768_v33, 0.0  ;;  %v2090_v33 = vsel %vm276_vm3, %v6328_v29, 0.0  ;;  %vm7328_vm3 = vcmp.eq.s32.totalorder %v5534_v48, 2 }
 0x688   :  { %2250 = vadd.xlane.f32.xlu1 %v2249_v13  ;;  %v2089_v13 = vsel %vm277_vm14, %v6247_v62, 0.0 }
 0x689   :  { %2927 = vadd.xlane.f32.xlu0 %v2926_v18  ;;  %v2496_v18 = vsel %vm7321_vm1, %v6255_v45, 0.0  ;;  %vm7326_vm1 = vcmp.eq.s32.totalorder %v5534_v48, 7 }
 0x68a   :  { %v2536_v22 = vsel %vm1899_vm9, %v2496_v18, 0.0  ;;  %v2904_v18 = vsel %vm300_vm11, %v6255_v45, 0.0  ;;  %vm7327_vm7 = vmmov %vm7326_vm1 }
 0x68c   :  { %2386 = vadd.xlane.f32.xlu1 %v2385_v37 }
 0x68d   :  { %3063 = vadd.xlane.f32.xlu0 %v3062_v54  ;;  %v2131_v54 = vsel %vm1899_vm9, %v2089_v13, 0.0 }
 0x690   :  { %2522 = vadd.xlane.f32.xlu1 %v2521_v44  ;;  %v2225_v44 = vsel %vm281_vm15, %v6247_v62, 0.0 }
 0x691   :  { %2117 = vadd.xlane.f32.xlu0 %v2116_v0 }
 0x692   :  { %v2043_v59 = vpop.xlane.xlu1 %2042 }
 0x693   :  { %4670 = vrcp.f32 %v2043_v59 }
 0x694   :  { %2658 = vadd.xlane.f32.xlu1 %v2657_v8  ;;  %v2267_v8 = vsel %vm1899_vm9, %v2225_v44, 0.0  ;;  %v2633_v44 = vsel %vm293_vm4, %v6247_v62, 0.0 }
 0x695   :  { %2253 = vadd.xlane.f32.xlu0 %v2252_v36  ;;  %v2666_v36 = vsel %vm1899_vm9, %v2630_v27, 0.0 }
 0x696   :  { %v3502_v51 = vpop.permute.xlu1 %3501 }
 0x697   :  { %4341 = vmatpush3.bf16.msra.mxu0 %v3502_v51  ;;  %v2632_v51 = vsel %vm7323_vm2, %v6255_v45, 0.0  ;;  %vm7330_vm2 = vcmp.eq.s32.totalorder %v5534_v48, 3 }
 0x698   :  { %2794 = vadd.xlane.f32.xlu1 %v2793_v63  ;;  %v2672_v39 = vsel %vm1899_vm9, %v2632_v51, 0.0  ;;  %v2675_v51 = vsel %vm1899_vm9, %v2633_v44, 0.0 }
 0x699   :  { %2123 = vadd.xlane.f32.xlu0 %v2122_v14  ;;  %v2397_v14 = vsel %vm1899_vm9, %v2359_v49, 0.0 }
 0x69c   :  { %2930 = vadd.xlane.f32.xlu1 %v2929_v46  ;;  %v2361_v46 = vsel %vm285_vm13, %v6247_v62, 0.0 }
 0x69d   :  { %v4671_v32 = vpop.eup %4670  ;;  %2259 = vadd.xlane.f32.xlu0 %v2258_v11  ;;  %v2766_v11 = vsel %vm7324_vm0, %v6165_v38, 0.0 }
 0x69e   :  { %v6331_v20 = vmul.f32 %v4671_v32, %v6000_v52  ;;  %v2119_v52 = vsel %vm1899_vm9, %v2085_v17, 0.0 }
 0x6a0   :  { %3066 = vadd.xlane.f32.xlu1 %v3065_v40  ;;  %v3171_v26 = vpack.c.bf16 %v6331_v20, %v6328_v29  ;;  %v2403_v40 = vsel %vm1899_vm9, %v2361_v46, 0.0  ;;  %v3040_v46 = vsel %vm7327_vm7, %v6255_v45, 0.0  ;;  %v2769_v45 = vsel %vm297_vm5, %v6247_v62, 0.0 }
 0x6a1   :  { %2129 = vadd.xlane.f32.xlu0 %v2128_v55  ;;  %v2802_v55 = vsel %vm1899_vm9, %v2766_v11, 0.0  ;;  %vm7334_vm7 = vcmp.eq.s32.totalorder %v5344_v15, 3 }
 0x6a2   :  { %4343 = vmatmul.mubr.msk.bf16.vlgmr.msra.gmra.mrb[48].mxu0 %vm1899_vm9, %v3171_v26  ;;  %v2495_v26 = vsel %vm289_vm12, %v6168_v6, 0.0 }
 0x6a4   :  { %2120 = vadd.xlane.f32.xlu1 %v2119_v52 }
 0x6a5   :  { %2265 = vadd.xlane.f32.xlu0 %v2264_v23  ;;  %v2533_v23 = vsel %vm1899_vm9, %v2495_v26, 0.0  ;;  %v6512_v26 = vld [vmem:[%s7157_s4 + $0x13] ss:$0 sm:$0xff] }
 0x6a8   :  { %2256 = vadd.xlane.f32.xlu1 %v2255_v28  ;;  %v6450_v28 = vld [vmem:[%s7157_s4 + $0x11] ss:$0 sm:$0xff] }
 0x6a9   :  { %2395 = vadd.xlane.f32.xlu0 %v2394_v5  ;;  %v2497_v5 = vsel %vm289_vm12, %v6247_v62, 0.0 }
 0x6aa   :  { %v2539_v41 = vsel %vm1899_vm9, %v2497_v5, 0.0  ;;  %v2134_v5 = vsel %vm1899_vm9, %v2090_v33, 0.0 }
 0x6ac   :  { %2126 = vadd.xlane.f32.xlu1 %v2125_v21 }
 0x6ad   :  { %2401 = vadd.xlane.f32.xlu0 %v2400_v43 }
 0x6ae   :  { %v2094_v57 = vpop.xlane.xlu0 %2093 }
 0x6af   :  { %v2180_v9 = vmul.f32 %v6372_v34, %v2094_v57  ;;  %v6465_v57 = vld [vmem:[%s7157_s4 + $0xa] ss:$0 sm:$0xff] }
 0x6b0   :  { %2262 = vadd.xlane.f32.xlu1 %v2261_v42  ;;  %v2631_v42 = vsel %vm293_vm4, %v6168_v6, 0.0 }
 0x6b1   :  { %2531 = vadd.xlane.f32.xlu0 %v2530_v30 }
 0x6b2   :  { %v2230_v61 = vpop.xlane.xlu0 %2229 }
 0x6b3   :  { %v2316_v37 = vmul.f32 %v6378_v53, %v2230_v61 }
 0x6b4   :  { %2132 = vadd.xlane.f32.xlu1 %v2131_v54  ;;  %v2944_v54 = vsel %vm1899_vm9, %v2904_v18, 0.0 }
 0x6b5   :  { %v2332_v0 = vadd.f32 %v2316_v37, %v2180_v9  ;;  %2537 = vadd.xlane.f32.xlu0 %v2536_v22  ;;  %v2669_v37 = vsel %vm1899_vm9, %v2631_v42, 0.0  ;;  %v6479_v22 = vld [vmem:[%s7157_s4 + $0x12] ss:$0 sm:$0xff] }
 0x6b6   :  { %v2366_v12 = vpop.xlane.xlu0 %2365 }
 0x6b7   :  { %v2452_v59 = vmul.f32 %v6393_v7, %v2366_v12  ;;  %v3038_v12 = vsel %vm7326_vm1, %v6165_v38, 0.0  ;;  %v2767_v38 = vsel %vm297_vm5, %v6168_v6, 0.0  ;;  %vm7333_vm1 = vcmp.eq.s32.totalorder %v5534_v48, 5 }
 0x6b8   :  { %2268 = vadd.xlane.f32.xlu1 %v2267_v8 }
 0x6b9   :  { %v6407_v35 = vadd.f32 %v2452_v59, %v2332_v0  ;;  %2667 = vadd.xlane.f32.xlu0 %v2666_v36 }
 0x6ba   :  { %v2100_v63 = vpop.xlane.xlu0 %2099 }
 0x6bb   :  { %v2182_v32 = vmul.f32 %v6416_v1, %v2100_v63 }
 0x6bc   :  { %2398 = vadd.xlane.f32.xlu1 %v2397_v14  ;;  %v3074_v14 = vsel %vm1899_vm9, %v3038_v12, 0.0 }
 0x6bd   :  { %2673 = vadd.xlane.f32.xlu0 %v2672_v39  ;;  %v6495_v39 = vld [vmem:[%s7157_s4 + $0xb] ss:$0 sm:$0xff] }
 0x6be   :  { %v2236_v3 = vpop.xlane.xlu0 %2235 }
 0x6bf   :  { %v2318_v2 = vmul.f32 %v6422_v50, %v2236_v3 }
 0x6c0   :  { %2404 = vadd.xlane.f32.xlu1 %v2403_v40 }
 0x6c1   :  { %v2334_v17 = vadd.f32 %v2318_v2, %v2182_v32  ;;  %2803 = vadd.xlane.f32.xlu0 %v2802_v55  ;;  %v2805_v2 = vsel %vm1899_vm9, %v2767_v38, 0.0  ;;  %v3080_v55 = vsel %vm1899_vm9, %v3040_v46, 0.0 }
 0x6c2   :  { %v2106_v52 = vpop.xlane.xlu0 %2105 }
 0x6c3   :  { %v2184_v21 = vmul.f32 %v6444_v10, %v2106_v52 }
 0x6c4   :  { %2534 = vadd.xlane.f32.xlu1 %v2533_v23 }
 0x6c5   :  { %2809 = vadd.xlane.f32.xlu0 %v2808_v24  ;;  %v2811_v24 = vsel %vm1899_vm9, %v2769_v45, 0.0  ;;  %v2485_v45 = vsel %vm7334_vm7, %v6047_v31, 0.0  ;;  %vm7345_vm7 = vcmp.eq.s32.totalorder %v5344_v15, 4 }
 0x6c6   :  { %v2242_v25 = vpop.xlane.xlu0 %2241 }
 0x6c7   :  { %v2320_v43 = vmul.f32 %v6450_v28, %v2242_v25 }
 0x6c8   :  { %2540 = vadd.xlane.f32.xlu1 %v2539_v41 }
 0x6c9   :  { %v2336_v30 = vadd.f32 %v2320_v43, %v2184_v21  ;;  %2939 = vadd.xlane.f32.xlu0 %v2938_v19  ;;  %v2097_v13 = vpop.xlane.xlu1 %2096  ;;  %v2226_v43 = vsel %vm280_vm6, %v6328_v29, 0.0  ;;  %v2941_v19 = vsel %vm1899_vm9, %v2903_v56, 0.0  ;;  %vm7329_vm6 = vcmp.eq.s32.totalorder %v5669_v4, 7 }
 0x6ca   :  { %v2372_v61 = vpop.xlane.xlu0 %2371  ;;  %v2181_v59 = vmul.f32 %v6372_v34, %v2097_v13  ;;  %v2270_v42 = vsel %vm1899_vm9, %v2226_v43, 0.0  ;;  %v2905_v13 = vsel %vm301_vm8, %v6247_v62, 0.0  ;;  %vm7331_vm0 = vmmov %vm7329_vm6 }
 0x6cb   :  { %v2454_v9 = vmul.f32 %v6465_v57, %v2372_v61  ;;  %v2362_v61 = vsel %vm7328_vm3, %v6328_v29, 0.0  ;;  %vm7335_vm3 = vcmp.eq.s32.totalorder %v5534_v48, 7 }
 0x6cc   :  { %2670 = vadd.xlane.f32.xlu1 %v2669_v37  ;;  %v2406_v12 = vsel %vm1899_vm9, %v2362_v61, 0.0 }
 0x6cd   :  { %v2470_v0 = vadd.f32 %v2454_v9, %v2334_v17  ;;  %2945 = vadd.xlane.f32.xlu0 %v2944_v54  ;;  %v2233_v27 = vpop.xlane.xlu1 %2232 }
 0x6ce   :  { %v2317_v8 = vmul.f32 %v6378_v53, %v2233_v27  ;;  %v2378_v36 = vpop.xlane.xlu0 %2377 }
 0x6cf   :  { %v2456_v49 = vmul.f32 %v6479_v22, %v2378_v36 }
 0x6d0   :  { %v2333_v63 = vadd.f32 %v2317_v8, %v2181_v59  ;;  %2676 = vadd.xlane.f32.xlu1 %v2675_v51  ;;  %v3039_v59 = vsel %vm7329_vm6, %v6168_v6, 0.0  ;;  %v3041_v6 = vsel %vm7331_vm0, %v6247_v62, 0.0  ;;  %v2357_v62 = vsel %vm285_vm13, %v6120_v60, 0.0  ;;  %vm7342_vm0 = vmmov %vm7333_vm1 }
 0x6d1   :  { %v2472_v34 = vadd.f32 %v2456_v49, %v2336_v30  ;;  %3075 = vadd.xlane.f32.xlu0 %v3074_v14  ;;  %v2369_v53 = vpop.xlane.xlu1 %2368  ;;  %v4073_v30 = vld [vmem:[%s7157_s4 + $0x14] ss:$0 sm:$0xff]  ;;  %v3077_v49 = vsel %vm1899_vm9, %v3039_v59, 0.0  ;;  %v2634_v14 = vsel %vm7332_vm10, %v6328_v29, 0.0  ;;  %vm7336_vm6 = vcmp.eq.s32.totalorder %v5534_v48, 2 }
 0x6d2   :  { %v2453_v11 = vmul.f32 %v6393_v7, %v2369_v53  ;;  %v2508_v3 = vpop.xlane.xlu0 %2507  ;;  %v3083_v53 = vsel %vm1899_vm9, %v3041_v6, 0.0  ;;  %v4066_v48 = vld [vmem:[%s7157_s4 + $0x1b] ss:$0 sm:$0xff] }
 0x6d3   :  { %v2590_v32 = vmul.f32 %v6495_v39, %v2508_v3 }
 0x6d4   :  { %v6506_v40 = vadd.f32 %v2453_v11, %v2333_v63  ;;  %2806 = vadd.xlane.f32.xlu1 %v2805_v2  ;;  %v2678_v11 = vsel %vm1899_vm9, %v2634_v14, 0.0 }
 0x6d5   :  { %v6517_v7 = vadd.f32 %v2590_v32, %v2470_v0  ;;  %3081 = vadd.xlane.f32.xlu0 %v3080_v55  ;;  %v6519_v17 = vpop.xlane.xlu1 %2102  ;;  %v2947_v0 = vsel %vm1899_vm9, %v2905_v13, 0.0  ;;  %v2770_v32 = vsel %vm7333_vm1, %v6328_v29, 0.0  ;;  %vm7344_vm1 = vcmp.eq.s32.totalorder %v5669_v4, 7 }
 0x6d6   :  { %v2514_v52 = vpop.xlane.xlu0 %2513  ;;  %v2814_v55 = vsel %vm1899_vm9, %v2770_v32, 0.0 }
 0x6d7   :  { %v2592_v23 = vmul.f32 %v6512_v26, %v2514_v52  ;;  %v2906_v52 = vsel %vm300_vm11, %v6328_v29, 0.0 }
 0x6d8   :  { %2812 = vadd.xlane.f32.xlu1 %v2811_v24 }
 0x6d9   :  { %v2608_v25 = vadd.f32 %v2592_v23, %v2472_v34  ;;  %2135 = vadd.xlane.f32.xlu0 %v2134_v5  ;;  %v2109_v21 = vpop.xlane.xlu1 %2108  ;;  %v2503_v5 = vsel %vm1899_vm9, %v2485_v45, 0.0 }
 0x6da   :  { %v6533_v41 = vpop.xlane.xlu0 %2643  ;;  %v2185_v9 = vmul.f32 %v6444_v10, %v2109_v21  ;;  %v2498_v10 = vsel %vm7330_vm2, %v6328_v29, 0.0  ;;  %v2493_v21 = vsel %vm289_vm12, %v6120_v60, 0.0 }
 0x6db   :  { %v2542_v51 = vsel %vm1899_vm9, %v2498_v10, 0.0  ;;  %v2183_v10 = vmul.f32 %v6416_v1, %v6519_v17 }
 0x6dc   :  { %2942 = vadd.xlane.f32.xlu1 %v2941_v19  ;;  %v3042_v19 = vsel %vm7335_vm3, %v6328_v29, 0.0 }
 0x6dd   :  { %2271 = vadd.xlane.f32.xlu0 %v2270_v42  ;;  %v2245_v18 = vpop.xlane.xlu1 %2244  ;;  %v3086_v13 = vsel %vm1899_vm9, %v3042_v19, 0.0 }
 0x6de   :  { %v2321_v37 = vmul.f32 %v6450_v28, %v2245_v18  ;;  %v2650_v54 = vpop.xlane.xlu0 %2649  ;;  %v2091_v18 = vsel %vm277_vm14, %v6331_v20, 0.0  ;;  %vm7337_vm14 = vcmp.eq.s32.totalorder %v5302_v47, 3 }
 0x6df   :  { %v2728_v44 = vmul.f32 %v4073_v30, %v2650_v54  ;;  %v2137_v29 = vsel %vm1899_vm9, %v2091_v18, 0.0  ;;  %v2484_v59 = vsel %vm7337_vm14, %v6009_v16, 0.0  ;;  %v2771_v18 = vsel %vm297_vm5, %v6331_v20, 0.0 }
 0x6e0   :  { %v2337_v27 = vadd.f32 %v2321_v37, %v2185_v9  ;;  %2948 = vadd.xlane.f32.xlu1 %v2947_v0  ;;  %v2356_v9 = vsel %vm7336_vm6, %v6117_v58, 0.0  ;;  %v2500_v6 = vsel %vm1899_vm9, %v2484_v59, 0.0  ;;  %vm7350_vm6 = vmmov %vm7344_vm1  ;;  %vm3576_vm14 = vcmask 195584  }
 0x6e1   :  { %v6553_v8 = vadd.f32 %v2728_v44, %v2608_v25  ;;  %2407 = vadd.xlane.f32.xlu0 %v2406_v12  ;;  %v6555_v36 = vpop.xlane.xlu1 %2374  ;;  %v2950_v25 = vsel %vm1899_vm9, %v2906_v52, 0.0  ;;  %v2388_v0 = vsel %vm1899_vm9, %v2356_v9, 0.0  ;;  %v4072_v52 = vld [vmem:[%s7157_s4 + $0xc] ss:$0 sm:$0xff] }
 0x6e2   :  { %v6560_v28 = vpop.xlane.xlu0 %2779  ;;  %v2455_v14 = vmul.f32 %v6465_v57, %v6555_v36  ;;  %v2499_v57 = vsel %vm289_vm12, %v6331_v20, 0.0  ;;  %vm7340_vm12 = vmmov %vm7332_vm10  ;;  %v2726_v19 = vmul.f32 %v4072_v52, %v6533_v41  ;;  %v4081_v41 = vld [vmem:[%s7157_s4 + $0x15] ss:$0 sm:$0xff]  ;;  %vm7343_vm10 = vcmp.eq.s32.totalorder %v5302_v47, 6 }
 0x6e4   :  { %3078 = vadd.xlane.f32.xlu1 %v3077_v49 }
 0x6e5   :  { %2543 = vadd.xlane.f32.xlu0 %v2542_v51  ;;  %v2381_v63 = vpop.xlane.xlu1 %2380 }
 0x6e6   :  { %v2457_v38 = vmul.f32 %v6479_v22, %v2381_v63  ;;  %v6571_v34 = vpop.xlane.xlu0 %2785  ;;  %v2391_v22 = vsel %vm1899_vm9, %v2357_v62, 0.0  ;;  %v2363_v63 = vsel %vm285_vm13, %v6331_v20, 0.0  ;;  %vm7339_vm13 = vcmp.eq.s32.totalorder %v5302_v47, 4 }
 0x6e7   :  { %v2620_v62 = vsel %vm7339_vm13, %v6009_v16, 0.0 }
 0x6e8   :  { %v2473_v46 = vadd.f32 %v2457_v38, %v2337_v27  ;;  %3084 = vadd.xlane.f32.xlu1 %v3083_v53  ;;  %v2227_v27 = vsel %vm281_vm15, %v6331_v20, 0.0  ;;  %vm7338_vm15 = vmmov %vm7330_vm2  ;;  %v2636_v45 = vsel %vm1899_vm9, %v2620_v62, 0.0  ;;  %vm7341_vm2 = vcmp.eq.s32.totalorder %v5302_v47, 5 }
 0x6e9   :  { %2679 = vadd.xlane.f32.xlu0 %v2678_v11  ;;  %v2511_v3 = vpop.xlane.xlu1 %2510  ;;  %v2273_v51 = vsel %vm1899_vm9, %v2227_v27, 0.0  ;;  %v2492_v1 = vsel %vm7338_vm15, %v6117_v58, 0.0  ;;  %v2817_v27 = vsel %vm1899_vm9, %v2771_v18, 0.0  ;;  %v2900_v18 = vsel %vm300_vm11, %v6117_v58, 0.0 }
 0x6ea   :  { %v6581_v2 = vpop.xlane.xlu0 %2915  ;;  %v2524_v11 = vsel %vm1899_vm9, %v2492_v1, 0.0  ;;  %vm7346_vm11 = vcmp.eq.s32.totalorder %v5302_v47, 7  ;;  %vm7351_vm15 = vcmask 64512  }
 0x6eb   :  { %vm7352_vm13 = vmmov %vm7351_vm15 }
 0x6ec   :  { %2392 = vadd.xlane.f32.xlu1 %v2391_v22  ;;  %v2545_v22 = vsel %vm1899_vm9, %v2499_v57, 0.0 }
 0x6ed   :  { %2815 = vadd.xlane.f32.xlu0 %v2814_v55  ;;  %v2517_v33 = vpop.xlane.xlu1 %2516  ;;  %v2591_v55 = vmul.f32 %v6495_v39, %v2511_v3  ;;  %v4080_v39 = vld [vmem:[%s7157_s4 + $0xd] ss:$0 sm:$0xff] }
 0x6ee   :  { %v2593_v23 = vmul.f32 %v6512_v26, %v2517_v33  ;;  %v6592_v24 = vpop.xlane.xlu0 %2921  ;;  %v2527_v26 = vsel %vm1899_vm9, %v2493_v21, 0.0  ;;  %v2635_v33 = vsel %vm293_vm4, %v6331_v20, 0.0  ;;  %v2756_v21 = vsel %vm7341_vm2, %v6009_v16, 0.0  ;;  %vm7354_vm2 = vmmov %vm7352_vm13 }
 0x6ef   :  { %v2681_v3 = vsel %vm1899_vm9, %v2635_v33, 0.0  ;;  %v2772_v59 = vsel %vm1899_vm9, %v2756_v21, 0.0 }
 0x6f0   :  { %v2609_v56 = vadd.f32 %v2593_v23, %v2473_v46  ;;  %2504 = vadd.xlane.f32.xlu1 %v2503_v5  ;;  %v2409_v46 = vsel %vm1899_vm9, %v2363_v63, 0.0  ;;  %v2628_v5 = vsel %vm7340_vm12, %v6117_v58, 0.0  ;;  %v2864_v63 = vmul.f32 %v4081_v41, %v6571_v34 }
 0x6f1   :  { %2951 = vadd.xlane.f32.xlu0 %v2950_v25  ;;  %v2647_v43 = vpop.xlane.xlu1 %2646  ;;  %vm7353_vm12 = vcmask 261120  }
 0x6f2   :  { %v6602_v42 = vpop.xlane.xlu0 %3051  ;;  %v2880_v33 = vadd.f32 %v2864_v63, %v6553_v8  ;;  %v2621_v8 = vsel %vm7345_vm7, %v6047_v31, 0.0 }
 0x6f4   :  { %2528 = vadd.xlane.f32.xlu1 %v2527_v26  ;;  %v2727_v26 = vmul.f32 %v4072_v52, %v2647_v43 }
 0x6f5   :  { %3087 = vadd.xlane.f32.xlu0 %v3086_v13  ;;  %v2653_v61 = vpop.xlane.xlu1 %2652  ;;  %v2660_v13 = vsel %vm1899_vm9, %v2628_v5, 0.0 }
 0x6f6   :  { %v2729_v37 = vmul.f32 %v4073_v30, %v2653_v61  ;;  %v6612_v54 = vpop.xlane.xlu0 %3057  ;;  %v4088_v61 = vld [vmem:[%s7157_s4 + $0xe] ss:$0 sm:$0xff] }
 0x6f8   :  { %v6615_v44 = vadd.f32 %v2729_v37, %v2609_v56  ;;  %2138 = vadd.xlane.f32.xlu1 %v2137_v29  ;;  %v2862_v37 = vmul.f32 %v4080_v39, %v6560_v28  ;;  %v2742_v28 = vadd.f32 %v2726_v19, %v6517_v7 }
 0x6f9   :  { %2389 = vadd.xlane.f32.xlu0 %v2388_v0  ;;  %v2783_v12 = vpop.xlane.xlu1 %2782  ;;  %v4096_v0 = vld [vmem:[%s7157_s4 + $0xf] ss:$0 sm:$0xff] }
 0x6fa   :  { %v2239_v30 = vpop.xlane.xlu0 %2238  ;;  %v3134_v1 = vmul.f32 %v4096_v0, %v6602_v42  ;;  %v3043_v42 = vsel %vm7344_vm1, %v6331_v20, 0.0 }
 0x6fb   :  { %v2319_v49 = vmul.f32 %v6422_v50, %v2239_v30  ;;  %v2764_v30 = vsel %vm7342_vm0, %v6117_v58, 0.0  ;;  %vm7355_vm0 = vmmov %vm7354_vm2 }
 0x6fc   :  { %2274 = vadd.xlane.f32.xlu1 %v2273_v51  ;;  %v2863_v51 = vmul.f32 %v4080_v39, %v2783_v12  ;;  %v2796_v57 = vsel %vm1899_vm9, %v2764_v30, 0.0 }
 0x6fd   :  { %v2335_v38 = vadd.f32 %v2319_v49, %v2183_v10  ;;  %2501 = vadd.xlane.f32.xlu0 %v2500_v6  ;;  %v6634_v53 = vpop.xlane.xlu1 %2788  ;;  %v2998_v10 = vmul.f32 %v4088_v61, %v6581_v2  ;;  %v4089_v49 = vld [vmem:[%s7157_s4 + $0x16] ss:$0 sm:$0xff]  ;;  %v2907_v6 = vsel %vm301_vm8, %v6331_v20, 0.0  ;;  %v2892_v2 = vsel %vm7343_vm10, %v6009_v16, 0.0  ;;  %vm7356_vm10 = vmmov %vm7353_vm12 }
 0x6fe   :  { %v6639_v50 = vpop.xlane.xlu0 %2111  ;;  %v3000_v12 = vmul.f32 %v4089_v49, %v6592_v24  ;;  %v2953_v34 = vsel %vm1899_vm9, %v2907_v6, 0.0 }
 0x6ff   :  { %v2471_v17 = vadd.f32 %v2455_v14, %v2335_v38  ;;  %v2878_v38 = vadd.f32 %v2862_v37, %v2742_v28 }
 0x700   :  { %2410 = vadd.xlane.f32.xlu1 %v2409_v46  ;;  %v4097_v46 = vld [vmem:[%s7157_s4 + $0x17] ss:$0 sm:$0xff]  ;;  %v3016_v19 = vadd.f32 %v3000_v12, %v2880_v33  ;;  %v4058_v33 = vld [vmem:[%s7157_s4 + $0x1a] ss:$0 sm:$0xff] }
 0x701   :  { %2525 = vadd.xlane.f32.xlu0 %v2524_v11  ;;  %v2919_v36 = vpop.xlane.xlu1 %2918  ;;  %v2607_v56 = vadd.f32 %v2591_v55, %v2471_v17  ;;  %v3014_v62 = vadd.f32 %v2998_v10, %v2878_v38  ;;  %v3136_v39 = vmul.f32 %v4097_v46, %v6612_v54  ;;  %v2629_v38 = vsel %vm293_vm4, %v6120_v60, 0.0 }
 0x702   :  { %v6649_v32 = vpop.xlane.xlu0 %2247  ;;  %v2999_v55 = vmul.f32 %v4088_v61, %v2919_v36  ;;  %vm7347_vm4 = vcmp.eq.s32.totalorder %v5344_v15, 5 }
 0x703   :  { %v2743_v43 = vadd.f32 %v2727_v26, %v2607_v56  ;;  %v2908_v56 = vsel %vm1899_vm9, %v2892_v2, 0.0  ;;  %v3150_v36 = vadd.f32 %v3134_v1, %v3014_v62  ;;  %v3152_v28 = vadd.f32 %v3136_v39, %v3016_v19 }
 0x704   :  { %2546 = vadd.xlane.f32.xlu1 %v2545_v22  ;;  %v2865_v22 = vmul.f32 %v4081_v41, %v6634_v53  ;;  %v3028_v2 = vsel %vm7346_vm11, %v6009_v16, 0.0  ;;  %v2663_v62 = vsel %vm1899_vm9, %v2629_v38, 0.0  ;;  %v2757_v16 = vsel %vm7347_vm4, %v6047_v31, 0.0 }
 0x705   :  { %2637 = vadd.xlane.f32.xlu0 %v2636_v45  ;;  %v2925_v23 = vpop.xlane.xlu1 %2924  ;;  %v2879_v7 = vadd.f32 %v2863_v51, %v2743_v43  ;;  %v3044_v47 = vsel %vm1899_vm9, %v3028_v2, 0.0 }
 0x706   :  { %v6663_v25 = vpop.xlane.xlu0 %2383  ;;  %v3001_v20 = vmul.f32 %v4089_v49, %v2925_v23  ;;  %v2881_v54 = vadd.f32 %v2865_v22, %v6615_v44  ;;  %v2639_v49 = vsel %vm1899_vm9, %v2621_v8, 0.0  ;;  %v2932_v44 = vsel %vm1899_vm9, %v2900_v18, 0.0 }
 0x708   :  { %2682 = vadd.xlane.f32.xlu1 %v2681_v3  ;;  %v3015_v3 = vadd.f32 %v2999_v55, %v2879_v7 }
 0x709   :  { %2661 = vadd.xlane.f32.xlu0 %v2660_v13  ;;  %v3055_v9 = vpop.xlane.xlu1 %3054  ;;  %v3089_v13 = vsel %vm1899_vm9, %v3043_v42, 0.0 }
 0x70a   :  { %v6684_v29 = vpop.xlane.xlu0 %2519  ;;  %v3135_v45 = vmul.f32 %v4096_v0, %v3055_v9  ;;  %v3017_v0 = vadd.f32 %v3001_v20, %v2881_v54  ;;  %v6801_v54 = vld [vmem:[%s7157_s4 + $0x21] ss:$0 sm:$0xff] }
 0x70c   :  { %2818 = vadd.xlane.f32.xlu1 %v2817_v27  ;;  %v3151_v37 = vadd.f32 %v3135_v45, %v3015_v3  ;;  %v3036_v45 = vsel %vm7335_vm3, %v6117_v58, 0.0 }
 0x70d   :  { %2773 = vadd.xlane.f32.xlu0 %v2772_v59  ;;  %v3061_v14 = vpop.xlane.xlu1 %3060  ;;  %v3068_v19 = vsel %vm1899_vm9, %v3036_v45, 0.0 }
 0x70e   :  { %v6704_v17 = vpop.xlane.xlu0 %2655  ;;  %v3137_v61 = vmul.f32 %v4097_v46, %v3061_v14 }
 0x70f   :  { %v6713_v11 = vpop.f32.mrb[32].mxu1 }
 0x710   :  { %2954 = vadd.xlane.f32.xlu1 %v2953_v34  ;;  %v4302_v24 = vpop.f32.mrb[33].mxu1  ;;  %v3153_v14 = vadd.f32 %v3137_v61, %v3017_v0  ;;  %v2765_v61 = vsel %vm297_vm5, %v6120_v60, 0.0  ;;  %vm7348_vm5 = vcmp.eq.s32.totalorder %v5344_v15, 6 }
 0x711   :  { %2797 = vadd.xlane.f32.xlu0 %v2796_v57  ;;  %v6722_v52 = vpop.xlane.xlu1 %2114  ;;  %v6724_v5 = vpop.f32.mrb[34].mxu1  ;;  %v4050_v57 = vld [vmem:[%s7157_s4 + $0x19] ss:$0 sm:$0xff]  ;;  %v4042_v24 = vld [vmem:[%s7157_s4 + $0x18] ss:$0 sm:$0xff] }
 0x712   :  { %v6728_v21 = vpop.xlane.xlu0 %2791  ;;  %v4303_v53 = vpop.f32.mrb[35].mxu1  ;;  %v2322_v3 = vmul.f32 %v4050_v57, %v6649_v32  ;;  %v6796_v32 = vld [vmem:[%s7157_s4 + $0x20] ss:$0 sm:$0xff] }
 0x713   :  { %v3259_v26 = vpop.f32.mrb[36].mxu0 }
 0x714   :  { %v6738_v23 = vadd.f32 %v3259_v26, %v3150_v36  ;;  %v4308_v9 = vpop.f32.mrb[37].mxu0  ;;  %3090 = vadd.xlane.f32.xlu1 %v3089_v13  ;;  %v2775_v36 = vsel %vm1899_vm9, %v2757_v16, 0.0  ;;  %v2186_v26 = vmul.f32 %v4042_v24, %v6639_v50  ;;  %v2458_v13 = vmul.f32 %v4058_v33, %v6663_v25  ;;  %v4074_v50 = vld [vmem:[%s7157_s4 + $0x1c] ss:$0 sm:$0xff] }
 0x715   :  { %v3262_v41 = vpop.f32.mrb[38].mxu0  ;;  %2909 = vadd.xlane.f32.xlu0 %v2908_v56  ;;  %v2251_v43 = vpop.xlane.xlu1 %2250 }
 0x716   :  { %v6740_v27 = vadd.f32 %v3262_v41, %v3151_v37  ;;  %v4309_v59 = vpop.f32.mrb[39].mxu0  ;;  %v6742_v30 = vpop.xlane.xlu0 %2927  ;;  %v2323_v8 = vmul.f32 %v4050_v57, %v2251_v43  ;;  %v2338_v37 = vadd.f32 %v2322_v3, %v2186_v26  ;;  %v2594_v41 = vmul.f32 %v4066_v48, %v6684_v29 }
 0x717   :  { %v3306_v10 = vpop.f32.mrb[36].mxu1  ;;  %v2187_v43 = vmul.f32 %v4042_v24, %v6722_v52  ;;  %v2730_v52 = vmul.f32 %v4074_v50, %v6704_v17  ;;  %v4098_v17 = vld [vmem:[%s7157_s4 + $0x1f] ss:$0 sm:$0xff]  ;;  %v2901_v24 = vsel %vm301_vm8, %v6120_v60, 0.0  ;;  %vm7349_vm8 = vcmp.eq.s32.totalorder %v5344_v15, 7 }
 0x718   :  { %v4551_v51 = vpack.i.bf16 %v6740_v27, %v6738_v23  ;;  %v6748_v6 = vadd.f32 %v3306_v10, %v3152_v28  ;;  %2640 = vadd.xlane.f32.xlu1 %v2639_v49  ;;  %v4314_v63 = vpop.f32.mrb[37].mxu1  ;;  %v4082_v10 = vld [vmem:[%s7157_s4 + $0x1d] ss:$0 sm:$0xff]  ;;  %v2474_v29 = vadd.f32 %v2458_v13, %v2338_v37  ;;  %v2935_v13 = vsel %vm1899_vm9, %v2901_v24, 0.0 }
 0x719   :  { %2933 = vadd.xlane.f32.xlu0 %v2932_v44  ;;  %v2387_v1 = vpop.xlane.xlu1 %2386  ;;  %v3309_v7 = vpop.f32.mrb[38].mxu1  ;;  %v2799_v63 = vsel %vm1899_vm9, %v2765_v61, 0.0  ;;  %v2339_v38 = vadd.f32 %v2323_v8, %v2187_v43 }
 0x71a   :  { %v6756_v12 = vadd.f32 %v3309_v7, %v3153_v14  ;;  %v6758_v46 = vpop.xlane.xlu0 %3063  ;;  %v4315_v34 = vpop.f32.mrb[39].mxu1  ;;  %v2459_v0 = vmul.f32 %v4058_v33, %v2387_v1  ;;  %v2893_v14 = vsel %vm7348_vm5, %v6047_v31, 0.0  ;;  %v4090_v7 = vld [vmem:[%s7157_s4 + $0x1e] ss:$0 sm:$0xff]  ;;  %v2610_v57 = vadd.f32 %v2594_v41, %v2474_v29 }
 0x71b   :  { %v6763_v42 = vpop.f32.mrb[40].mxu0  ;;  %v2911_v45 = vsel %vm1899_vm9, %v2893_v14, 0.0 }
 0x71c   :  { %v4556_v22 = vpack.i.bf16 %v6756_v12, %v6748_v6  ;;  %v4320_v55 = vpop.f32.mrb[41].mxu0  ;;  %2664 = vadd.xlane.f32.xlu1 %v2663_v62  ;;  %v2866_v62 = vmul.f32 %v4082_v10, %v6728_v21  ;;  %v2746_v33 = vadd.f32 %v2730_v52, %v2610_v57 }
 0x71d   :  { %3045 = vadd.xlane.f32.xlu0 %v3044_v47  ;;  %v6781_v56 = vpop.f32.mrb[42].mxu0  ;;  %v2523_v39 = vpop.xlane.xlu1 %2522  ;;  %v2475_v55 = vadd.f32 %v2459_v0, %v2339_v38 }
 0x71e   :  { %v2118_v20 = vpop.xlane.xlu0 %2117  ;;  %v4321_v53 = vpop.f32.mrb[43].mxu0  ;;  %v2595_v1 = vmul.f32 %v4066_v48, %v2523_v39  ;;  %v3002_v39 = vmul.f32 %v4090_v7, %v6742_v30  ;;  %v3138_v48 = vmul.f32 %v4098_v17, %v6758_v46  ;;  %v3029_v30 = vsel %vm7349_vm8, %v6047_v31, 0.0 }
 0x71f   :  { %v6787_v58 = vpop.f32.mrb[40].mxu1  ;;  %v2188_v49 = vmul.f32 %v6796_v32, %v2118_v20  ;;  %v2882_v53 = vadd.f32 %v2866_v62, %v2746_v33  ;;  %v3047_v43 = vsel %vm1899_vm9, %v3029_v30, 0.0  ;;  %v4068_v30 = vld [vmem:[%s7157_s4 + $0x2b] ss:$0 sm:$0xff] }
 0x720   :  { %2776 = vadd.xlane.f32.xlu1 %v2775_v36  ;;  %v4326_v18 = vpop.f32.mrb[41].mxu1  ;;  %v2611_v3 = vadd.f32 %v2595_v1, %v2475_v55 }
 0x721   :  { %3069 = vadd.xlane.f32.xlu0 %v3068_v19  ;;  %v2659_v25 = vpop.xlane.xlu1 %2658  ;;  %v6809_v9 = vpop.f32.mrb[42].mxu1  ;;  %v3018_v8 = vadd.f32 %v3002_v39, %v2882_v53 }
 0x722   :  { %v2254_v59 = vpop.xlane.xlu0 %2253  ;;  %v4327_v28 = vpop.f32.mrb[43].mxu1  ;;  %v2731_v47 = vmul.f32 %v4074_v50, %v2659_v25 }
 0x723   :  { %v2324_v44 = vmul.f32 %v6801_v54, %v2254_v59  ;;  %v3154_v50 = vadd.f32 %v3138_v48, %v3018_v8  ;;  %v3037_v28 = vsel %vm7350_vm6, %v6120_v60, 0.0  ;;  %v4044_v48 = vld [vmem:[%s7157_s4 + $0x28] ss:$0 sm:$0xff] }
 0x724   :  { %2800 = vadd.xlane.f32.xlu1 %v2799_v63  ;;  %v2747_v36 = vadd.f32 %v2731_v47, %v2611_v3  ;;  %v3071_v14 = vsel %vm1899_vm9, %v3037_v28, 0.0 }
 0x725   :  { %v6826_v2 = vadd.f32 %v2324_v44, %v2188_v49  ;;  %v2795_v34 = vpop.xlane.xlu1 %2794  ;;  %v3354_v31 = vadd.f32 %v6763_v42, %v3154_v50 }
 0x726   :  { %v6829_v16 = vpop.xlane.xlu0 %2123  ;;  %v2867_v20 = vmul.f32 %v4082_v10, %v2795_v34 }
 0x727   :  { %v2190_v50 = vmul.f32 %v4044_v48, %v6829_v16  ;;  %v4069_v16 = vld [vmem:[%s7157_s4 + $0x33] ss:$0 sm:$0xff] }
 0x728   :  { %2912 = vadd.xlane.f32.xlu1 %v2911_v45  ;;  %v2883_v18 = vadd.f32 %v2867_v20, %v2747_v36  ;;  %v4053_v36 = vld [vmem:[%s7157_s4 + $0x31] ss:$0 sm:$0xff] }
 0x729   :  { %v2931_v21 = vpop.xlane.xlu1 %2930 }
 0x72a   :  { %v3003_v19 = vmul.f32 %v4090_v7, %v2931_v21  ;;  %v6840_v26 = vpop.xlane.xlu0 %2259  ;;  %v4052_v21 = vld [vmem:[%s7157_s4 + $0x29] ss:$0 sm:$0xff] }
 0x72c   :  { %2936 = vadd.xlane.f32.xlu1 %v2935_v13  ;;  %v3019_v25 = vadd.f32 %v3003_v19, %v2883_v18  ;;  %v4060_v19 = vld [vmem:[%s7157_s4 + $0x2a] ss:$0 sm:$0xff]  ;;  %v2326_v13 = vmul.f32 %v4052_v21, %v6840_v26  ;;  %v4045_v18 = vld [vmem:[%s7157_s4 + $0x30] ss:$0 sm:$0xff] }
 0x72d   :  { %v3067_v61 = vpop.xlane.xlu1 %3066 }
 0x72e   :  { %v3139_v37 = vmul.f32 %v4098_v17, %v3067_v61  ;;  %v6846_v41 = vpop.xlane.xlu0 %2129 }
 0x72f   :  { %v6848_v46 = vpop.f32.mrb[44].mxu0  ;;  %v2192_v28 = vmul.f32 %v4045_v18, %v6846_v41 }
 0x730   :  { %v3155_v0 = vadd.f32 %v3139_v37, %v3019_v25  ;;  %v4332_v59 = vpop.f32.mrb[45].mxu0  ;;  %3048 = vadd.xlane.f32.xlu1 %v3047_v43  ;;  %v4061_v43 = vld [vmem:[%s7157_s4 + $0x32] ss:$0 sm:$0xff] }
 0x731   :  { %v6854_v10 = vpop.f32.mrb[46].mxu0  ;;  %v2121_v15 = vpop.xlane.xlu1 %2120  ;;  %v2342_v59 = vadd.f32 %v2326_v13, %v2190_v50 }
 0x732   :  { %v3357_v49 = vadd.f32 %v6781_v56, %v3155_v0  ;;  %v2266_v44 = vpop.xlane.xlu0 %2265  ;;  %v4333_v63 = vpop.f32.mrb[47].mxu0  ;;  %v2189_v38 = vmul.f32 %v6796_v32, %v2121_v15  ;;  %v4076_v0 = vld [vmem:[%s7157_s4 + $0x2c] ss:$0 sm:$0xff] }
 0x733   :  { %v2328_v25 = vmul.f32 %v4053_v36, %v2266_v44 }
 0x734   :  { %v4561_v29 = vpack.i.bf16 %v3357_v49, %v3354_v31  ;;  %3072 = vadd.xlane.f32.xlu1 %v3071_v14 }
 0x735   :  { %v2257_v52 = vpop.xlane.xlu1 %2256 }
 0x736   :  { %v2325_v1 = vmul.f32 %v6801_v54, %v2257_v52  ;;  %v2396_v4 = vpop.xlane.xlu0 %2395 }
 0x737   :  { %4552 = vrot.lane.b32.xlu0 %v4551_v51, %s4739_s16  ;;  %v2462_v37 = vmul.f32 %v4060_v19, %v2396_v4 }
 0x738   :  { %v6865_v60 = vadd.f32 %v2325_v1, %v2189_v38  ;;  %v2344_v38 = vadd.f32 %v2328_v25, %v2192_v28 }
 0x739   :  { %v2127_v42 = vpop.xlane.xlu1 %2126  ;;  %v2478_v1 = vadd.f32 %v2462_v37, %v2342_v59 }
 0x73a   :  { %v2402_v56 = vpop.xlane.xlu0 %2401  ;;  %v2191_v15 = vmul.f32 %v4044_v48, %v2127_v42 }
 0x73b   :  { %v2464_v44 = vmul.f32 %v4061_v43, %v2402_v56 }
 0x73d   :  { %v2263_v7 = vpop.xlane.xlu1 %2262  ;;  %v2480_v48 = vadd.f32 %v2464_v44, %v2344_v38 }
 0x73e   :  { %v2532_v34 = vpop.xlane.xlu0 %2531  ;;  %v2327_v26 = vmul.f32 %v4052_v21, %v2263_v7 }
 0x73f   :  { %v2598_v31 = vmul.f32 %v4068_v30, %v2532_v34  ;;  %v4077_v34 = vld [vmem:[%s7157_s4 + $0x34] ss:$0 sm:$0xff] }
 0x740   :  { %v2343_v4 = vadd.f32 %v2327_v26, %v2191_v15 }
 0x741   :  { %v2133_v57 = vpop.xlane.xlu1 %2132 }
 0x742   :  { %v2538_v62 = vpop.xlane.xlu0 %2537  ;;  %v2193_v42 = vmul.f32 %v4045_v18, %v2133_v57  ;;  %v4085_v57 = vld [vmem:[%s7157_s4 + $0x35] ss:$0 sm:$0xff] }
 0x743   :  { %v2600_v7 = vmul.f32 %v4069_v16, %v2538_v62 }
 0x745   :  { %v2269_v55 = vpop.xlane.xlu1 %2268  ;;  %4557 = vrot.lane.b32.xlu1 %v4556_v22, %s4740_s17 }
 0x746   :  { %v2668_v32 = vpop.xlane.xlu0 %2667  ;;  %v2329_v63 = vmul.f32 %v4053_v36, %v2269_v55  ;;  %v4092_v55 = vld [vmem:[%s7157_s4 + $0x2e] ss:$0 sm:$0xff] }
 0x747   :  { %v2734_v41 = vmul.f32 %v4076_v0, %v2668_v32  ;;  %v4100_v32 = vld [vmem:[%s7157_s4 + $0x2f] ss:$0 sm:$0xff] }
 0x748   :  { %v2345_v36 = vadd.f32 %v2329_v63, %v2193_v42 }
 0x749   :  { %v2399_v54 = vpop.xlane.xlu1 %2398  ;;  %4562 = vrot.lane.b32.xlu1 %v4561_v29, %s4741_s19  ;;  %v4084_v29 = vld [vmem:[%s7157_s4 + $0x2d] ss:$0 sm:$0xff] }
 0x74a   :  { %v2674_v23 = vpop.xlane.xlu0 %2673  ;;  %v2463_v14 = vmul.f32 %v4060_v19, %v2399_v54  ;;  %v2614_v54 = vadd.f32 %v2598_v31, %v2478_v1 }
 0x74b   :  { %v2736_v13 = vmul.f32 %v4077_v34, %v2674_v23 }
 0x74c   :  { %v2479_v19 = vadd.f32 %v2463_v14, %v2343_v4 }
 0x74d   :  { %v2405_v27 = vpop.xlane.xlu1 %2404 }
 0x74e   :  { %v2804_v51 = vpop.xlane.xlu0 %2803 }
 0x751   :  { %v2535_v47 = vpop.xlane.xlu1 %2534 }
 0x752   :  { %v6872_v17 = vpop.xlane.xlu0 %2809  ;;  %v2599_v56 = vmul.f32 %v4068_v30, %v2535_v47  ;;  %v2750_v47 = vadd.f32 %v2734_v41, %v2614_v54 }
 0x753   :  { %v2872_v26 = vmul.f32 %v4085_v57, %v6872_v17 }
 0x754   :  { %v6874_v45 = vpop.f32.mrb[44].mxu1  ;;  %v2615_v25 = vadd.f32 %v2599_v56, %v2479_v19 }
 0x755   :  { %v2541_v24 = vpop.xlane.xlu1 %2540  ;;  %v4338_v33 = vpop.f32.mrb[45].mxu1 }
 0x756   :  { %v2940_v39 = vpop.xlane.xlu0 %2939  ;;  %v6876_v3 = vpop.f32.mrb[46].mxu1  ;;  %v2465_v33 = vmul.f32 %v4061_v43, %v2405_v27  ;;  %v2601_v18 = vmul.f32 %v4069_v16, %v2541_v24 }
 0x757   :  { %v4339_v6 = vpop.f32.mrb[47].mxu1  ;;  %v3006_v30 = vmul.f32 %v4092_v55, %v2940_v39 }
 0x758   :  { %v2870_v6 = vmul.f32 %v4084_v29, %v2804_v51  ;;  %v2616_v51 = vadd.f32 %v2600_v7, %v2480_v48  ;;  %v2481_v50 = vadd.f32 %v2465_v33, %v2345_v36  ;;  %v4584_v7 = vld [vmem:[%s7159_s6] sm:$0xff]  }
 0x759   :  { %v2671_v12 = vpop.xlane.xlu1 %2670  ;;  %4346 = vmatprep.subr.bf16.mxu1 %v4584_v7 }
 0x75a   :  { %v6878_v22 = vpop.xlane.xlu0 %2945  ;;  %v2735_v62 = vmul.f32 %v4076_v0, %v2671_v12  ;;  %v2886_v43 = vadd.f32 %v2870_v6, %v2750_v47  ;;  %v4093_v12 = vld [vmem:[%s7157_s4 + $0x36] ss:$0 sm:$0xff]  ;;  %v2752_v23 = vadd.f32 %v2736_v13, %v2616_v51  ;;  %v2617_v24 = vadd.f32 %v2601_v18, %v2481_v50  ;;  %4347 = vmatpush3.bf16.msra.mxu1 %v4584_v7 }
 0x75b   :  { %v3008_v17 = vmul.f32 %v4093_v12, %v6878_v22 }
 0x75c   :  { %v2751_v15 = vadd.f32 %v2735_v62, %v2615_v25  ;;  %v3022_v39 = vadd.f32 %v3006_v30, %v2886_v43  ;;  %v2888_v14 = vadd.f32 %v2872_v26, %v2752_v23  ;;  %v4067_v43 = vld [vmem:[%s7157_s4 + $0x23] ss:$0 sm:$0xff] }
 0x75d   :  { %v2677_v20 = vpop.xlane.xlu1 %2676 }
 0x75e   :  { %v3076_v53 = vpop.xlane.xlu0 %3075  ;;  %v2737_v0 = vmul.f32 %v4077_v34, %v2677_v20  ;;  %v3024_v34 = vadd.f32 %v3008_v17, %v2888_v14  ;;  %v4046_v17 = vld [vmem:[%s7157_s4 + $0x38] ss:$0 sm:$0xff] }
 0x75f   :  { %v3142_v59 = vmul.f32 %v4100_v32, %v3076_v53 }
 0x761   :  { %v2807_v8 = vpop.xlane.xlu1 %2806  ;;  %v3158_v20 = vadd.f32 %v3142_v59, %v3022_v39  ;;  %v4054_v39 = vld [vmem:[%s7157_s4 + $0x39] ss:$0 sm:$0xff] }
 0x762   :  { %v6899_v61 = vpop.xlane.xlu0 %3081  ;;  %v2871_v37 = vmul.f32 %v4084_v29, %v2807_v8  ;;  %v4101_v8 = vld [vmem:[%s7157_s4 + $0x37] ss:$0 sm:$0xff]  ;;  %v2753_v29 = vadd.f32 %v2737_v0, %v2617_v24 }
 0x763   :  { %v3144_v38 = vmul.f32 %v4101_v8, %v6899_v61  ;;  %v3448_v22 = vadd.f32 %v6848_v46, %v3158_v20  ;;  %v4070_v20 = vld [vmem:[%s7157_s4 + $0x3b] ss:$0 sm:$0xff] }
 0x764   :  { %v2887_v16 = vadd.f32 %v2871_v37, %v2751_v15 }
 0x765   :  { %v2813_v49 = vpop.xlane.xlu1 %2812  ;;  %v3160_v54 = vadd.f32 %v3144_v38, %v3024_v34 }
 0x766   :  { %v6915_v52 = vpop.xlane.xlu0 %2135  ;;  %v2873_v63 = vmul.f32 %v4085_v57, %v2813_v49  ;;  %v4059_v57 = vld [vmem:[%s7157_s4 + $0x22] ss:$0 sm:$0xff] }
 0x767   :  { %v3495_v13 = vadd.f32 %v6874_v45, %v3160_v54 }
 0x768   :  { %v2889_v33 = vadd.f32 %v2873_v63, %v2753_v29 }
 0x769   :  { %v2943_v21 = vpop.xlane.xlu1 %2942 }
 0x76a   :  { %v6929_v27 = vpop.xlane.xlu0 %2271  ;;  %v3007_v31 = vmul.f32 %v4092_v55, %v2943_v21 }
 0x76c   :  { %v3023_v1 = vadd.f32 %v3007_v31, %v2887_v16  ;;  %v4062_v16 = vld [vmem:[%s7157_s4 + $0x3a] ss:$0 sm:$0xff] }
 0x76d   :  { %v2949_v28 = vpop.xlane.xlu1 %2948 }
 0x76e   :  { %v6935_v44 = vpop.xlane.xlu0 %2407  ;;  %v3009_v4 = vmul.f32 %v4093_v12, %v2949_v28 }
 0x76f   :  { %v2466_v38 = vmul.f32 %v4062_v16, %v6935_v44 }
 0x770   :  { %v3025_v6 = vadd.f32 %v3009_v4, %v2889_v33  ;;  %v6985_v4 = vld [vmem:[%s7157_s4 + $0x24] ss:$0 sm:$0xff] }
 0x771   :  { %v3079_v53 = vpop.xlane.xlu1 %3078 }
 0x772   :  { %v3143_v41 = vmul.f32 %v4100_v32, %v3079_v53  ;;  %v2544_v42 = vpop.xlane.xlu0 %2543  ;;  %v2194_v53 = vmul.f32 %v4046_v17, %v6915_v52  ;;  %v4086_v52 = vld [vmem:[%s7157_s4 + $0x3d] ss:$0 sm:$0xff] }
 0x773   :  { %v2602_v34 = vmul.f32 %v4070_v20, %v2544_v42 }
 0x774   :  { %v3159_v56 = vadd.f32 %v3143_v41, %v3023_v1  ;;  %v4078_v41 = vld [vmem:[%s7157_s4 + $0x3c] ss:$0 sm:$0xff] }
 0x775   :  { %v6946_v49 = vpop.f32.mrb[48].mxu0  ;;  %v3085_v55 = vpop.xlane.xlu1 %3084 }
 0x776   :  { %v3451_v61 = vadd.f32 %v6854_v10, %v3159_v56  ;;  %v3145_v21 = vmul.f32 %v4101_v8, %v3085_v55  ;;  %v2680_v48 = vpop.xlane.xlu0 %2679  ;;  %v4344_v36 = vpop.f32.mrb[49].mxu0 }
 0x777   :  { %v6949_v19 = vpop.f32.mrb[50].mxu0  ;;  %v2738_v54 = vmul.f32 %v4078_v41, %v2680_v48 }
 0x778   :  { %v4566_v62 = vpack.i.bf16 %v3451_v61, %v3448_v22  ;;  %v3161_v46 = vadd.f32 %v3145_v21, %v3025_v6  ;;  %v4345_v32 = vpop.f32.mrb[51].mxu0  ;;  %v4094_v21 = vld [vmem:[%s7157_s4 + $0x3e] ss:$0 sm:$0xff] }
 0x779   :  { %v2393_v47 = vpop.xlane.xlu1 %2392 }
 0x77a   :  { %v3498_v18 = vadd.f32 %v6876_v3, %v3161_v46  ;;  %v2461_v30 = vmul.f32 %v4059_v57, %v2393_v47  ;;  %v2816_v10 = vpop.xlane.xlu0 %2815  ;;  %4567 = vrot.lane.b32.xlu1 %v4566_v62, %s4739_s16 }
 0x77b   :  { %v2874_v62 = vmul.f32 %v4086_v52, %v2816_v10 }
 0x77c   :  { %v4571_v51 = vpack.i.bf16 %v3498_v18, %v3495_v13  ;;  %v2477_v50 = vadd.f32 %v2461_v30, %v6865_v60  ;;  %v4102_v13 = vld [vmem:[%s7157_s4 + $0x3f] ss:$0 sm:$0xff] }
 0x77d   :  { %v6958_v25 = vpop.xlane.xlu1 %2504 }
 0x77e   :  { %v2952_v37 = vpop.xlane.xlu0 %2951  ;;  %4572 = vrot.lane.b32.xlu0 %v4571_v51, %s4740_s17 }
 0x77f   :  { %v3010_v30 = vmul.f32 %v4094_v21, %v2952_v37  ;;  %v4071_v37 = vld [vmem:[%s7157_s4 + $0x4] ss:$0 sm:$0xff] }
 0x781   :  { %v2529_v26 = vpop.xlane.xlu1 %2528 }
 0x782   :  { %v2597_v45 = vmul.f32 %v4067_v43, %v2529_v26  ;;  %v3088_v12 = vpop.xlane.xlu0 %3087 }
 0x784   :  { %v6964_v3 = vadd.f32 %v2597_v45, %v2477_v50  ;;  %v4083_v50 = vld [vmem:[%s7157_s4 + $0x25] ss:$0 sm:$0xff]  ;;  %v3146_v45 = vmul.f32 %v4102_v13, %v3088_v12 }
 0x785   :  { %v2139_v0 = vpop.xlane.xlu1 %2138 }
 0x786   :  { %v2390_v59 = vpop.xlane.xlu0 %2389  ;;  %v2195_v33 = vmul.f32 %v4046_v17, %v2139_v0 }
 0x787   :  { %v2460_v28 = vmul.f32 %v4059_v57, %v2390_v59 }
 0x789   :  { %v2476_v15 = vadd.f32 %v2460_v28, %v6826_v2  ;;  %v2275_v60 = vpop.xlane.xlu1 %2274  ;;  %v2330_v2 = vmul.f32 %v4054_v39, %v6929_v27 }
 0x78a   :  { %v2502_v31 = vpop.xlane.xlu0 %2501  ;;  %v2331_v1 = vmul.f32 %v4054_v39, %v2275_v60 }
 0x78b   :  { %v2346_v7 = vadd.f32 %v2330_v2, %v2194_v53 }
 0x78c   :  { %v2347_v6 = vadd.f32 %v2331_v1, %v2195_v33 }
 0x78d   :  { %v2411_v23 = vpop.xlane.xlu1 %2410  ;;  %v2482_v55 = vadd.f32 %v2466_v38, %v2346_v7  ;;  %v4087_v38 = vld [vmem:[%s7157_s4 + $0x6] ss:$0 sm:$0xff] }
 0x78e   :  { %v2526_v24 = vpop.xlane.xlu0 %2525  ;;  %v2467_v56 = vmul.f32 %v4062_v16, %v2411_v23  ;;  %v4079_v16 = vld [vmem:[%s7157_s4 + $0x5] ss:$0 sm:$0xff] }
 0x78f   :  { %v2596_v8 = vmul.f32 %v4067_v43, %v2526_v24  ;;  %v2618_v42 = vadd.f32 %v2602_v34, %v2482_v55  ;;  %v4585_v24 = vld [vmem:[%s7159_s6 + $0x8] sm:$0xff]  }
 0x790   :  { %v2483_v46 = vadd.f32 %v2467_v56, %v2347_v6  ;;  %4348 = vmatprep.subr.bf16.mxu1 %v4585_v24 }
 0x791   :  { %v2612_v63 = vadd.f32 %v2596_v8, %v2476_v15  ;;  %v2547_v14 = vpop.xlane.xlu1 %2546  ;;  %v2754_v18 = vadd.f32 %v2738_v54, %v2618_v42  ;;  %v4063_v15 = vld [vmem:[%s7157_s4 + $0x3] ss:$0 sm:$0xff]  ;;  %4349 = vmatpush3.bf16.msra.mxu1 %v4585_v24 }
 0x792   :  { %v2638_v29 = vpop.xlane.xlu0 %2637  ;;  %v2603_v61 = vmul.f32 %v4070_v20, %v2547_v14  ;;  %v2588_v39 = vmul.f32 %v4063_v15, %v2502_v31  ;;  %v4091_v31 = vld [vmem:[%s7157_s4 + $0x26] ss:$0 sm:$0xff] }
 0x793   :  { %v2890_v26 = vadd.f32 %v2874_v62, %v2754_v18  ;;  %v2724_v20 = vmul.f32 %v4071_v37, %v2638_v29 }
 0x794   :  { %v2619_v48 = vadd.f32 %v2603_v61, %v2483_v46  ;;  %v2604_v1 = vadd.f32 %v2588_v39, %v6407_v35 }
 0x795   :  { %v2683_v27 = vpop.xlane.xlu1 %2682  ;;  %v3026_v60 = vadd.f32 %v3010_v30, %v2890_v26  ;;  %v2589_v30 = vmul.f32 %v4063_v15, %v6958_v25 }
 0x796   :  { %v2662_v22 = vpop.xlane.xlu0 %2661  ;;  %v2739_v32 = vmul.f32 %v4078_v41, %v2683_v27  ;;  %v2740_v29 = vadd.f32 %v2724_v20, %v2604_v1 }
 0x797   :  { %v2732_v44 = vmul.f32 %v6985_v4, %v2662_v22  ;;  %v3162_v17 = vadd.f32 %v3146_v45, %v3026_v60 }
 0x798   :  { %v2755_v0 = vadd.f32 %v2739_v32, %v2619_v48 }
 0x799   :  { %v2748_v36 = vadd.f32 %v2732_v44, %v2612_v63  ;;  %v2819_v57 = vpop.xlane.xlu1 %2818  ;;  %v3542_v7 = vadd.f32 %v6946_v49, %v3162_v17  ;;  %v4095_v44 = vld [vmem:[%s7157_s4 + $0x7] ss:$0 sm:$0xff] }
 0x79a   :  { %v2774_v47 = vpop.xlane.xlu0 %2773  ;;  %v2875_v51 = vmul.f32 %v4086_v52, %v2819_v57 }
 0x79b   :  { %v2860_v41 = vmul.f32 %v4079_v16, %v2774_v47 }
 0x79c   :  { %v2891_v23 = vadd.f32 %v2875_v51, %v2755_v0 }
 0x79d   :  { %v2955_v43 = vpop.xlane.xlu1 %2954  ;;  %v2876_v55 = vadd.f32 %v2860_v41, %v2740_v29 }
 0x79e   :  { %v3011_v10 = vmul.f32 %v4094_v21, %v2955_v43  ;;  %v2798_v59 = vpop.xlane.xlu0 %2797  ;;  %v2605_v43 = vadd.f32 %v2589_v30, %v6506_v40 }
 0x79f   :  { %v2868_v28 = vmul.f32 %v4083_v50, %v2798_v59 }
 0x7a0   :  { %v3027_v63 = vadd.f32 %v3011_v10, %v2891_v23 }
 0x7a1   :  { %v2884_v12 = vadd.f32 %v2868_v28, %v2748_v36  ;;  %v3091_v8 = vpop.xlane.xlu1 %3090  ;;  %v4099_v36 = vld [vmem:[%s7157_s4 + $0x27] ss:$0 sm:$0xff] }
 0x7a2   :  { %v3147_v14 = vmul.f32 %v4102_v13, %v3091_v8  ;;  %v2910_v2 = vpop.xlane.xlu0 %2909 }
 0x7a3   :  { %v2996_v56 = vmul.f32 %v4087_v38, %v2910_v2 }
 0x7a4   :  { %v3163_v53 = vadd.f32 %v3147_v14, %v3027_v63 }
 0x7a5   :  { %v2641_v27 = vpop.xlane.xlu1 %2640  ;;  %v3012_v49 = vadd.f32 %v2996_v56, %v2876_v55 }
 0x7a6   :  { %v3545_v34 = vadd.f32 %v6949_v19, %v3163_v53  ;;  %v2934_v33 = vpop.xlane.xlu0 %2933 }
 0x7a7   :  { %v3004_v22 = vmul.f32 %v4091_v31, %v2934_v33 }
 0x7a8   :  { %v4576_v52 = vpack.i.bf16 %v3545_v34, %v3542_v7 }
 0x7a9   :  { %v3020_v54 = vadd.f32 %v3004_v22, %v2884_v12  ;;  %v2665_v6 = vpop.xlane.xlu1 %2664 }
 0x7aa   :  { %v2733_v35 = vmul.f32 %v6985_v4, %v2665_v6  ;;  %v3046_v61 = vpop.xlane.xlu0 %3045  ;;  %4577 = vrot.lane.b32.xlu1 %v4576_v52, %s4741_s19 }
 0x7ab   :  { %v3132_v21 = vmul.f32 %v4095_v44, %v3046_v61 }
 0x7ac   :  { %v2749_v19 = vadd.f32 %v2733_v35, %v6964_v3  ;;  %v2725_v3 = vmul.f32 %v4071_v37, %v2641_v27 }
 0x7ad   :  { %v3148_v57 = vadd.f32 %v3132_v21, %v3012_v49  ;;  %v2777_v42 = vpop.xlane.xlu1 %2776 }
 0x7ae   :  { %v3070_v62 = vpop.xlane.xlu0 %3069  ;;  %v2861_v26 = vmul.f32 %v4079_v16, %v2777_v42  ;;  %v2741_v0 = vadd.f32 %v2725_v3, %v2605_v43 }
 0x7af   :  { %v3213_v46 = vadd.f32 %v6713_v11, %v3148_v57  ;;  %v3140_v32 = vmul.f32 %v4099_v36, %v3070_v62 }
 0x7b0   :  { %v2877_v28 = vadd.f32 %v2861_v26, %v2741_v0 }
 0x7b1   :  { %v3156_v47 = vadd.f32 %v3140_v32, %v3020_v54  ;;  %v2801_v13 = vpop.xlane.xlu1 %2800 }
 0x7b2   :  { %v2869_v4 = vmul.f32 %v4083_v50, %v2801_v13  ;;  %v4553_v15 = vpop.permute.xlu0 %4552 }
 0x7b3   :  { %v3401_v18 = vadd.f32 %v6787_v58, %v3156_v47  ;;  %v4554_v8 = vunpack.i.l.bf16 %v4553_v15  ;;  %v4555_v63 = vunpack.i.h.bf16 %v4553_v15  ;;  %v4696_v47 = vld [vmem:[%s7153_s0] sm:$0xff] }
 0x7b4   :  { %v2885_v48 = vadd.f32 %v2869_v4, %v2749_v19  ;;  %v4111_v19 = vld [vmem:[%s7162_s9 + $0x2] ss:$0 sm:$0xff] }
 0x7b5   :  { %v2913_v51 = vpop.xlane.xlu1 %2912  ;;  %v3572_v2 = vsel %vm7351_vm15, %v3213_v46, %v4554_v8 }
 0x7b6   :  { %v2997_v10 = vmul.f32 %v4087_v38, %v2913_v51  ;;  %v4698_v51 = vld [vmem:[%s7153_s0 + $0x8] sm:$0xff] }
 0x7b8   :  { %v3013_v23 = vadd.f32 %v2997_v10, %v2877_v28 }
 0x7b9   :  { %v2937_v45 = vpop.xlane.xlu1 %2936 }
 0x7ba   :  { %v3005_v59 = vmul.f32 %v4091_v31, %v2937_v45  ;;  %v4699_v45 = vld [vmem:[%s7153_s0 + $0x18] sm:$0xff] }
 0x7bc   :  { %v3021_v11 = vadd.f32 %v3005_v59, %v2885_v48 }
 0x7bd   :  { %v3049_v60 = vpop.xlane.xlu1 %3048 }
 0x7be   :  { %v3133_v24 = vmul.f32 %v4095_v44, %v3049_v60  ;;  %v4116_v60 = vld [vmem:[%s7162_s9 + $0x4] ss:$0 sm:$0xff] }
 0x7c0   :  { %v3149_v50 = vadd.f32 %v3133_v24, %v3013_v23 }
 0x7c1   :  { %v3073_v39 = vpop.xlane.xlu1 %3072 }
 0x7c2   :  { %v3216_v58 = vadd.f32 %v6724_v5, %v3149_v50  ;;  %v3141_v25 = vmul.f32 %v4099_v36, %v3073_v39 }
 0x7c4   :  { %v3157_v12 = vadd.f32 %v3141_v25, %v3021_v11  ;;  %v3573_v20 = vsel %vm7352_vm13, %v3216_v58, %v4555_v63 }
 0x7c5   :  { %v4558_v37 = vpop.permute.xlu1 %4557 }
 0x7c6   :  { %v3404_v40 = vadd.f32 %v6809_v9, %v3157_v12  ;;  %v4560_v17 = vunpack.i.h.bf16 %v4558_v37  ;;  %v4559_v16 = vunpack.i.l.bf16 %v4558_v37 }
 0x7c8   :  { %v3575_v5 = vsel %vm1899_vm9, %v3573_v20, %v4560_v17  ;;  %v3574_v31 = vsel %vm1899_vm9, %v3572_v2, %v4559_v16 }
 0x7c9   :  { %v4563_v14 = vpop.permute.xlu1 %4562 }
 0x7ca   :  { %v4565_v53 = vunpack.i.h.bf16 %v4563_v14  ;;  %v4564_v38 = vunpack.i.l.bf16 %v4563_v14 }
 0x7cc   :  { %v3577_v1 = vsel %vm3576_vm14, %v3574_v31, %v4564_v38  ;;  %v3578_v41 = vsel %vm3576_vm14, %v3575_v5, %v4565_v53 }
 0x7cd   :  { %v3609_v9 = vpack.c.bf16 %v3578_v41, %v3577_v1  ;;  %v4586_v41 = vld [vmem:[%s7160_s7] sm:$0xff]  }
 0x7ce   :  { %4354 = vmatprep.subr.bf16.mxu0 %v4586_v41 }
 0x7cf   :  { %4350 = vmatprep.mubr.msk.bf16.mxu1 %vm7353_vm12, %v3609_v9  ;;  %v4587_v9 = vld [vmem:[%s7160_s7 + $0x8] sm:$0xff]   ;;  %4355 = vmatpush3.bf16.msra.mxu0 %v4586_v41 }
 0x7d0   :  { %4356 = vmatprep.subr.bf16.mxu0 %v4587_v9 }
 0x7d3   :  { %4357 = vmatpush3.bf16.msra.mxu0 %v4587_v9 }
 0x7ec   :  { %v4568_v27 = vpop.permute.xlu1 %4567 }
 0x7ed   :  { %v4570_v34 = vunpack.i.h.bf16 %v4568_v27  ;;  %v4569_v33 = vunpack.i.l.bf16 %v4568_v27 }
 0x7ef   :  { %v3603_v52 = vsel %vm7354_vm2, %v3401_v18, %v4569_v33  ;;  %v3604_v44 = vsel %vm7355_vm0, %v3404_v40, %v4570_v34  ;;  %v4697_v18 = vld [vmem:[%s7153_s0 + $0x10] sm:$0xff] }
 0x7f0   :  { %v4573_v7 = vpop.permute.xlu0 %4572 }
 0x7f1   :  { %v4575_v29 = vunpack.i.h.bf16 %v4573_v7  ;;  %v4574_v56 = vunpack.i.l.bf16 %v4573_v7 }
 0x7f3   :  { %v3606_v6 = vsel %vm1899_vm9, %v3604_v44, %v4575_v29  ;;  %v3605_v35 = vsel %vm1899_vm9, %v3603_v52, %v4574_v56  ;;  %vm7357_vm9 = vmmov %vm7356_vm10 }
 0x7f4   :  { %vm7358_vm1 = vmmov %vm7357_vm9 }
 0x7f5   :  { %vm7359_vm7 = vmmov %vm7358_vm1 }
 0x7f6   :  { %vm7360_vm11 = vmmov %vm7358_vm1 }
 0x7f7   :  { %vm7361_vm4 = vmmov %vm7358_vm1 }
 0x7f8   :  { %vm7362_vm3 = vmmov %vm7358_vm1 }
 0x7f9   :  { %vm7363_vm5 = vmmov %vm7358_vm1 }
 0x7fa   :  { %vm7364_vm8 = vmmov %vm7358_vm1 }
 0x81c   :  { %v4578_v22 = vpop.permute.xlu1 %4577 }
 0x81d   :  { %v4580_v55 = vunpack.i.h.bf16 %v4578_v22  ;;  %v4579_v54 = vunpack.i.l.bf16 %v4578_v22 }
 0x81f   :  { %v3607_v61 = vsel %vm3576_vm14, %v3605_v35, %v4579_v54  ;;  %v3608_v49 = vsel %vm3576_vm14, %v3606_v6, %v4580_v55 }
 0x820   :  { %v3610_v21 = vpack.c.bf16 %v3608_v49, %v3607_v61 }
 0x822   :  { %4351 = vmatmul.mubr.msk.bf16.vlgmr.msra.gmra.mrb[48].mxu1 %vm7356_vm10, %v3610_v21 }
 0x8f5   :  { %v4352_v36 = vpop.f32.mrb[48].mxu1 }
 0x8f6   :  { %v3671_v57 = vpop.f32.mrb[49].mxu1  ;;  %v3680_v42 = vadd.f32 %v4352_v36, %v4111_v19 }
 0x8f7   :  { %v3672_v62 = vadd.f32 %v4111_v19, %v3671_v57  ;;  %v4353_v46 = vpop.f32.mrb[50].mxu1 }
 0x8f8   :  { %v3674_v32 = vpop.f32.mrb[51].mxu1  ;;  %v7064_v30 = vadd.f32 %v4697_v18, %v3680_v42  ;;  %v3683_v48 = vadd.f32 %v4353_v46, %v4111_v19 }
 0x8f9   :  { %v7059_v13 = vadd.f32 %v4696_v47, %v3672_v62  ;;  %v3675_v4 = vadd.f32 %v4111_v19, %v3674_v32 }
 0x8fa   :  { %v7078_v0 = vadd.f32 %v4699_v45, %v3683_v48  ;;  %v3696_v10 = vsel %vm7359_vm7, %v7064_v30, 0.0  ;;  %vm3937_vm7 = vcmask 523264  }
 0x8fb   :  { %v7069_v3 = vadd.f32 %v4698_v51, %v3675_v4  ;;  %v3690_v43 = vsel %vm7357_vm9, %v7059_v13, 0.0  ;;  %vm7365_vm9 = vmmov %vm7358_vm1 }
 0x8fc   :  { %3691 = vadd.xlane.f32.xlu0 %v3690_v43  ;;  %v3699_v59 = vsel %vm7360_vm11, %v7078_v0, 0.0  ;;  %vm7366_vm11 = vmmov %vm7358_vm1 }
 0x8fd   :  { %v3693_v26 = vsel %vm7358_vm1, %v7069_v3, 0.0 }
 0x8fe   :  { %3694 = vadd.xlane.f32.xlu1 %v3693_v26 }
 0x900   :  { %3697 = vadd.xlane.f32.xlu0 %v3696_v10 }
 0x904   :  { %3700 = vadd.xlane.f32.xlu0 %v3699_v59 }
 0x989   :  { %v3692_v28 = vpop.xlane.xlu0 %3691 }
 0x98a   :  { %v3702_v11 = vmul.f32 0.03125, %v3692_v28 }
 0x98b   :  { %v3695_v23 = vpop.xlane.xlu1 %3694 }
 0x98c   :  { %v3706_v24 = vsub.f32 %v7059_v13, %v3702_v11  ;;  %v3703_v50 = vmul.f32 0.03125, %v3695_v23 }
 0x98d   :  { %v3698_v39 = vpop.xlane.xlu0 %3697 }
 0x98e   :  { %v7088_v58 = vmul.f32 %v4116_v60, %v3706_v24  ;;  %v3707_v25 = vsub.f32 %v7069_v3, %v3703_v50  ;;  %v3704_v15 = vmul.f32 0.03125, %v3698_v39  ;;  %v3710_v12 = vmul.f32 %v3706_v24, %v3706_v24 }
 0x990   :  { %v7091_v37 = vmul.f32 %v4116_v60, %v3707_v25  ;;  %v3708_v8 = vsub.f32 %v7064_v30, %v3704_v15  ;;  %v3714_v40 = vsel %vm7361_vm4, %v3710_v12, 0.0  ;;  %v3711_v17 = vmul.f32 %v3707_v25, %v3707_v25  ;;  %vm7367_vm4 = vmmov %vm7358_vm1 }
 0x991   :  { %3715 = vadd.xlane.f32.xlu0 %v3714_v40  ;;  %v3701_v16 = vpop.xlane.xlu0 %3700 }
 0x992   :  { %v7095_v63 = vmul.f32 %v4116_v60, %v3708_v8  ;;  %v3705_v14 = vmul.f32 0.03125, %v3701_v16  ;;  %v3717_v2 = vsel %vm7362_vm3, %v3711_v17, 0.0  ;;  %v3712_v20 = vmul.f32 %v3708_v8, %v3708_v8  ;;  %vm7368_vm3 = vmmov %vm7358_vm1 }
 0x993   :  { %3718 = vadd.xlane.f32.xlu1 %v3717_v2  ;;  %v4117_v2 = vld [vmem:[%s7162_s9 + $0x1] ss:$0 sm:$0xff] }
 0x994   :  { %v3709_v53 = vsub.f32 %v7078_v0, %v3705_v14  ;;  %v3720_v38 = vsel %vm7363_vm5, %v3712_v20, 0.0  ;;  %v4591_v14 = vld [vmem:[%s7161_s8 + $0x18] sm:$0xff]   ;;  %vm7369_vm5 = vmmov %vm7358_vm1 }
 0x995   :  { %3721 = vadd.xlane.f32.xlu0 %v3720_v38 }
 0x996   :  { %v7100_v5 = vmul.f32 %v4116_v60, %v3709_v53  ;;  %v3713_v31 = vmul.f32 %v3709_v53, %v3709_v53 }
 0x998   :  { %v3723_v1 = vsel %vm7364_vm8, %v3713_v31, 0.0 }
 0x999   :  { %3724 = vadd.xlane.f32.xlu1 %v3723_v1 }
 0x9aa   :  { %3934 = vrot.lane.b32.xlu1 %v4111_v19, %s4724_s23 }
 0x9ab   :  { %3779 = vrot.lane.b32.xlu0 %v4116_v60, %s4724_s23 }
 0xa1e   :  { %v3716_v27 = vpop.xlane.xlu0 %3715 }
 0xa1f   :  { %v3726_v7 = vmul.f32 0.032258064, %v3716_v27 }
 0xa20   :  { %v3719_v34 = vpop.xlane.xlu1 %3718 }
 0xa21   :  { %4672 = vrsqrt.f32 %v3726_v7  ;;  %v3727_v33 = vmul.f32 0.032258064, %v3719_v34  ;;  %vm3732_vm6 = vcmp.eq.f32.partialorder %v3726_v7, inf  ;;  %v3735_v54 = vand.u32 2147483648, %v3726_v7 }
 0xa22   :  { %v3722_v29 = vpop.xlane.xlu0 %3721  ;;  %vm3734_vm14 = vcmp.eq.f32.partialorder %v3726_v7, 0.0 }
 0xa23   :  { %v3728_v56 = vmul.f32 0.032258064, %v3722_v29  ;;  %4674 = vrsqrt.f32 %v3727_v33  ;;  %vm3739_vm15 = vcmp.eq.f32.partialorder %v3727_v33, inf  ;;  %v3742_v19 = vand.u32 2147483648, %v3727_v33 }
 0xa24   :  { %vm3741_vm13 = vcmp.eq.f32.partialorder %v3727_v33, 0.0 }
 0xa25   :  { %4676 = vrsqrt.f32 %v3728_v56  ;;  %vm3746_vm12 = vcmp.eq.f32.partialorder %v3728_v56, inf  ;;  %v3749_v62 = vand.u32 2147483648, %v3728_v56  ;;  %vm3748_vm2 = vcmp.eq.f32.partialorder %v3728_v56, 0.0 }
 0xa26   :  { %v3725_v22 = vpop.xlane.xlu1 %3724  ;;  %v3780_v60 = vpop.permute.xlu0 %3779 }
 0xa27   :  { %v3729_v52 = vmul.f32 0.032258064, %v3725_v22 }
 0xa29   :  { %4678 = vrsqrt.f32 %v3729_v52  ;;  %vm3753_vm0 = vcmp.eq.f32.partialorder %v3729_v52, inf  ;;  %v3756_v43 = vand.u32 2147483648, %v3729_v52  ;;  %vm3755_vm10 = vcmp.eq.f32.partialorder %v3729_v52, 0.0 }
 0xa2b   :  { %v4673_v44 = vpop.eup %4672 }
 0xa2c   :  { %v3731_v55 = vmul.f32 %v4673_v44, %v3726_v7 }
 0xa2d   :  { %v4675_v6 = vpop.eup %4674 }
 0xa2e   :  { %v3733_v35 = vsel %vm3732_vm6, %v3726_v7, %v3731_v55  ;;  %v3738_v49 = vmul.f32 %v4675_v6, %v3727_v33 }
 0xa2f   :  { %v4677_v61 = vpop.eup %4676  ;;  %v3736_v21 = vsel %vm3734_vm14, %v3735_v54, %v3733_v35 }
 0xa30   :  { %v3745_v36 = vmul.f32 %v4677_v61, %v3728_v56  ;;  %v3766_v57 = vadd.f32 1e-06, %v3736_v21  ;;  %v3740_v42 = vsel %vm3739_vm15, %v3727_v33, %v3738_v49 }
 0xa31   :  { %v3743_v32 = vsel %vm3741_vm13, %v3742_v19, %v3740_v42 }
 0xa32   :  { %v3747_v46 = vsel %vm3746_vm12, %v3728_v56, %v3745_v36  ;;  %4680 = vrcp.f32 %v3766_v57  ;;  %v3767_v18 = vadd.f32 1e-06, %v3743_v32 }
 0xa33   :  { %v4679_v47 = vpop.eup %4678  ;;  %v3750_v4 = vsel %vm3748_vm2, %v3749_v62, %v3747_v46 }
 0xa34   :  { %v3752_v48 = vmul.f32 %v4679_v47, %v3729_v52  ;;  %v3768_v51 = vadd.f32 1e-06, %v3750_v4  ;;  %4682 = vrcp.f32 %v3767_v18 }
 0xa36   :  { %v3754_v26 = vsel %vm3753_vm0, %v3729_v52, %v3752_v48  ;;  %4684 = vrcp.f32 %v3768_v51 }
 0xa37   :  { %v3757_v45 = vsel %vm3755_vm10, %v3756_v43, %v3754_v26 }
 0xa38   :  { %v3769_v10 = vadd.f32 1e-06, %v3757_v45 }
 0xa3a   :  { %4686 = vrcp.f32 %v3769_v10 }
 0xa3c   :  { %v4681_v59 = vpop.eup %4680 }
 0xa3d   :  { %v3771_v28 = vmul.f32 %v4681_v59, %v7088_v58  ;;  %v4588_v58 = vld [vmem:[%s7161_s8] sm:$0xff]  }
 0xa3e   :  { %v4683_v11 = vpop.eup %4682  ;;  %4362 = vmatprep.subr.bf16.mxu1 %v4588_v58 }
 0xa3f   :  { %v3773_v24 = vmul.f32 %v4683_v11, %v7091_v37  ;;  %v3782_v50 = vadd.f32 %v3780_v60, %v3771_v28  ;;  %v4589_v37 = vld [vmem:[%s7161_s8 + $0x8] sm:$0xff]   ;;  %4363 = vmatpush3.bf16.msra.mxu1 %v4588_v58 }
 0xa40   :  { %v4685_v23 = vpop.eup %4684  ;;  %4364 = vmatprep.subr.bf16.mxu1 %v4589_v37 }
 0xa41   :  { %v3783_v39 = vadd.f32 %v3780_v60, %v3773_v24  ;;  %v3775_v25 = vmul.f32 %v4685_v23, %v7095_v63  ;;  %v4590_v63 = vld [vmem:[%s7161_s8 + $0x10] sm:$0xff]   ;;  %s4742_s8 = smov [#allocation2]  }
 0xa42   :  { %s4006_s9 = sshll.u32 %s4742_s8, 4  ;;  %s4007_s9 = int_to_ptr.vmem [resolvable:$true] %s4006_s9 }
 0xa43   :  { %v3786_v12 = vpack.c.bf16 %v3783_v39, %v3782_v50  ;;  %v3784_v40 = vadd.f32 %v3780_v60, %v3775_v25  ;;  %4365 = vmatpush3.bf16.msra.mxu1 %v4589_v37  ;;  %v3935_v50 = vpop.permute.xlu1 %3934  ;;  %s4700_s28 = scalar_lea.vmem %s4007_s9, 512  ;;  %p4705_p1 = scmp.lt.s32.totalorder %s4007_s9, %s4007_s9 }
 0xa44   :  { %v4687_v15 = vpop.eup %4686  ;;  %4366 = vmatprep.subr.bf16.mxu1 %v4590_v63  ;;  %p4701_p0 = scmp.ne.s32.totalorder %s4007_s9, %s4700_s28  ;;  %p4706_p2 = scmp.lt.s32.totalorder %s4700_s28, %s4700_s28 }
 0xa45   :  { %v3777_v8 = vmul.f32 %v4687_v15, %v7100_v5  ;;  %4358 = vmatprep.mubr.msk.bf16.mxu0 %vm7365_vm9, %v3786_v12 }
 0xa46   :  { %p4707_p3 = por %p4706_p2, %p4705_p1 }
 0xa47   :  { %v3785_v17 = vadd.f32 %v3780_v60, %v3777_v8  ;;  %4367 = vmatpush3.bf16.msra.mxu1 %v4590_v63 }
 0xa48   :  { %4368 = vmatprep.subr.bf16.mxu1 %v4591_v14  ;;  %p4708_p4 = pnand %p4707_p3, %p4701_p0 }
 0xa49   :  { %v3787_v16 = vpack.c.bf16 %v3785_v17, %v3784_v40 }
 0xa4b   :  { %4359 = vmatmul.mubr.msk.bf16.vlgmr.msra.gmra.mrb[52].mxu0 %vm7358_vm1, %v3787_v16  ;;  %4369 = vmatpush3.bf16.msra.mxu1 %v4591_v14 }
 0xb1e   :  { %v4360_v20 = vpop.f32.mrb[52].mxu0 }
 0xb1f   :  { %v3857_v53 = vadd.f32 %v4360_v20, %v4117_v2  ;;  %v3848_v38 = vpop.f32.mrb[53].mxu0 }
 0xb20   :  { %v3849_v5 = vadd.f32 %v4117_v2, %v3848_v38  ;;  %v4361_v31 = vpop.f32.mrb[54].mxu0 }
 0xb21   :  { %v3869_v1 = vmul.f32 0.044715, %v3857_v53  ;;  %v3860_v41 = vadd.f32 %v4361_v31, %v4117_v2  ;;  %v3851_v9 = vpop.f32.mrb[55].mxu0  ;;  %v3865_v48 = vmul.f32 0.5, %v3857_v53 }
 0xb22   :  { %v3867_v27 = vmul.f32 0.044715, %v3849_v5  ;;  %v3852_v7 = vadd.f32 %v4117_v2, %v3851_v9  ;;  %v3863_v26 = vmul.f32 0.5, %v3849_v5 }
 0xb23   :  { %v3873_v34 = vmul.f32 %v3869_v1, %v3857_v53  ;;  %v3870_v33 = vmul.f32 0.044715, %v3860_v41  ;;  %v3866_v51 = vmul.f32 0.5, %v3860_v41 }
 0xb24   :  { %v3871_v29 = vmul.f32 %v3867_v27, %v3849_v5  ;;  %v3868_v56 = vmul.f32 0.044715, %v3852_v7  ;;  %v3864_v45 = vmul.f32 0.5, %v3852_v7 }
 0xb25   :  { %v3877_v22 = vmul.f32 %v3873_v34, %v3857_v53  ;;  %v3874_v52 = vmul.f32 %v3870_v33, %v3860_v41 }
 0xb26   :  { %v3875_v44 = vmul.f32 %v3871_v29, %v3849_v5  ;;  %v3872_v55 = vmul.f32 %v3868_v56, %v3852_v7 }
 0xb27   :  { %v3881_v54 = vadd.f32 %v3877_v22, %v3857_v53  ;;  %v3878_v6 = vmul.f32 %v3874_v52, %v3860_v41 }
 0xb28   :  { %v3879_v35 = vadd.f32 %v3875_v44, %v3849_v5  ;;  %v3876_v61 = vmul.f32 %v3872_v55, %v3852_v7 }
 0xb29   :  { %v3885_v49 = vmul.f32 0.7978846, %v3881_v54  ;;  %v3882_v21 = vadd.f32 %v3878_v6, %v3860_v41 }
 0xb2a   :  { %v3883_v19 = vmul.f32 0.7978846, %v3879_v35  ;;  %v3880_v36 = vadd.f32 %v3876_v61, %v3852_v7 }
 0xb2b   :  { %4688 = vtanh.f32 %v3885_v49  ;;  %v3886_v57 = vmul.f32 0.7978846, %v3882_v21 }
 0xb2c   :  { %4690 = vtanh.f32 %v3883_v19  ;;  %v3884_v42 = vmul.f32 0.7978846, %v3880_v36 }
 0xb2d   :  { %4692 = vtanh.f32 %v3886_v57 }
 0xb2e   :  { %4694 = vtanh.f32 %v3884_v42 }
 0xb35   :  { %v4689_v62 = vpop.eup %4688 }
 0xb36   :  { %v4691_v46 = vpop.eup %4690  ;;  %v3893_v32 = vadd.f32 1.0, %v4689_v62 }
 0xb37   :  { %v4693_v47 = vpop.eup %4692  ;;  %v3891_v4 = vadd.f32 1.0, %v4691_v46 }
 0xb38   :  { %v4695_v18 = vpop.eup %4694  ;;  %v3894_v43 = vadd.f32 1.0, %v4693_v47  ;;  %v3897_v59 = vmul.f32 %v3893_v32, %v3865_v48 }
 0xb39   :  { %v3892_v10 = vadd.f32 1.0, %v4695_v18  ;;  %v3895_v11 = vmul.f32 %v3891_v4, %v3863_v26 }
 0xb3a   :  { %v3898_v28 = vmul.f32 %v3894_v43, %v3866_v51 }
 0xb3b   :  { %v3896_v60 = vmul.f32 %v3892_v10, %v3864_v45 }
 0xb3c   :  { %v3900_v23 = vpack.c.bf16 %v3898_v28, %v3897_v59 }
 0xb3d   :  { %v3899_v24 = vpack.c.bf16 %v3896_v60, %v3895_v11 }
 0xb3f   :  { %4370 = vmatprep.mubr.msk.bf16.mxu1 %vm3937_vm7, %v3899_v24 }
 0xb40   :  { %4371 = vmatmul.mubr.msk.bf16.vlgmr.msra.gmra.mrb[52].mxu1 %vm3937_vm7, %v3900_v23 }
 0xc13   :  { %v4372_v39 = vpop.f32.mrb[52].mxu1 }
 0xc14   :  { %v3987_v25 = vadd.f32 %v4372_v39, %v3935_v50  ;;  %v3978_v15 = vpop.f32.mrb[53].mxu1 }
 0xc15   :  { %v3979_v12 = vadd.f32 %v3978_v15, %v3935_v50  ;;  %v4373_v8 = vpop.f32.mrb[54].mxu1 }
 0xc16   :  { %v3995_v40 = vadd.f32 %v3987_v25, %v7064_v30  ;;  %v3990_v17 = vadd.f32 %v4373_v8, %v3935_v50  ;;  %v3981_v16 = vpop.f32.mrb[55].mxu1 }
 0xc17   :  { %v3993_v58 = vadd.f32 %v3979_v12, %v7059_v13  ;;  %v3982_v37 = vadd.f32 %v3981_v16, %v3935_v50 }
 0xc18   :  { %3999 = vst.msk [vmem:[#allocation2 + $0x10] sm:$0xff] %vm7366_vm11, %v3995_v40  ;;  %v3996_v63 = vadd.f32 %v3990_v17, %v7078_v0 }
 0xc19   :  { %3997 = vst.msk [vmem:[#allocation2] sm:$0xff] %vm7367_vm4, %v3993_v58  ;;  %v3994_v14 = vadd.f32 %v3982_v37, %v7069_v3 }
 0xc1a   :  { %4000 = vst.msk [vmem:[#allocation2 + $0x18] sm:$0xff] %vm7368_vm3, %v3996_v63 }
 0xc1b   :  { %3998 = vst.msk [vmem:[#allocation2 + $0x8] sm:$0xff] %vm7369_vm5, %v3994_v14 }
 0xc1c   :  { %4711 = shalt.err (!%p4708_p4)
}
 0xc1d   :  { %s4712_s1 = scalar_lea.hbm %s7163_s10, 512 }
 0xc1e   :  { %p4713_p5 = scmp.ne.s32.totalorder %s7163_s10, %s4712_s1  ;;  %p4716_p6 = scmp.lt.u32.totalorder %s4712_s1, %s7163_s10 }
 0xc20   :  { %p4718_p7 = pnand %p4716_p6, %p4713_p5 }
 0xc22   :  { %4721 = shalt.err (!%p4718_p7)
}
 0xc23   :  { %s4743_s12 = smov 128  }
 0xc24   :  { %4012 = dma.vmem_to_hbm [thread:$0]  %s4007_s9, 512, %s7163_s10, [#allocation3], %s4743_s12, %s4743_s12, %s4739_s16  }
 0xc25   :  { %4722 = dma.done.wait [#allocation3], 512  }
 0xc26   :  { %4723 = vsyncadd [#allocation3], 4294966784 }
 0xc27   :  { %4016 = vsyncpa [#allocation3], 1 }

</bundles_post_ra>
